<compile_context>
chip_gen: v7x
topology: tpu7x:2x2x1
jax: 0.10.0
libtpu: 0.0.40
codegen_flags: <defaults>
</compile_context>

<pallas_src>
import jax
import jax.numpy as jnp
from jax.experimental import pallas as pl
from jax.experimental.pallas import tpu as pltpu


CFG = dict(
    in_channels=80, out_channels=1, channels=32, kernel_size=7,
    upsample_scales=(8, 4), upsample_kernel_sizes=(16, 8),
    resblock_kernel_sizes=(3, 7), resblock_dilations=((1, 3), (1, 3)),
    lrelu_slope=0.1,
)


# ---------------------------------------------------------------------------
# In-kernel building blocks (operate on VMEM-resident values)
# ---------------------------------------------------------------------------
def _leaky(x, slope):
    return jnp.where(x > 0, x, slope * x)


def _conv_same(x, w_packed, b, K, dil):
    """'same' dilated conv.  x: (C_in, T); w_packed: (C_out, K*C_in) with
    column order [tap k major, channel minor]; b: (C_out, 1).
    One im2col MXU matmul instead of K tiny per-tap matmuls."""
    C_in, T = x.shape
    pad = (K - 1) // 2 * dil
    if pad > 0:
        z = jnp.zeros((C_in, pad), x.dtype)
        xp = jnp.concatenate([z, x, z], axis=1)
    else:
        xp = x
    cols = jnp.concatenate([xp[:, k * dil:k * dil + T] for k in range(K)],
                           axis=0)                                   # (K*C_in, T)
    return jnp.dot(w_packed, cols, preferred_element_type=jnp.float32) + b


def _upsample_phases(x, w_all, b_all):
    """All `stride` polyphase outputs of ConvTranspose1d(K=2*stride,
    padding=stride//2) in ONE stacked matmul.  x: (C_in, T);
    w_all: (stride*C_out, 3*C_in) with shift order [-1, 0, +1] per phase;
    b_all: (stride*C_out, 1).  Returns (stride*C_out, T): row p*C_out + c is
    output channel c of phase p, i.e. output sample t*stride + p."""
    C_in, T = x.shape
    z = jnp.zeros((C_in, 1), x.dtype)
    xp = jnp.concatenate([z, x, z], axis=1)                          # (C_in, T+2)
    # rows: [shift -1 | shift 0 | shift +1]  ->  (3*C_in, T)
    x3 = jnp.concatenate([xp[:, 0:T], xp[:, 1:T + 1], xp[:, 2:T + 2]], axis=0)
    return jnp.dot(w_all, x3, preferred_element_type=jnp.float32) + b_all


def _resblocks(x, it, rb_ks, rb_dils, slope):
    """Averaged sum of all resblocks at one resolution (matches HiFiGAN)."""
    acc = None
    for j, K_r in enumerate(rb_ks):
        xb = x
        for dil in rb_dils[j]:
            w1, b1, w2, b2 = next(it), next(it), next(it), next(it)
            xt = _conv_same(_leaky(xb, slope), w1[...], b1[...], K_r, dil)
            xt = _conv_same(_leaky(xt, slope), w2[...], b2[...], K_r, 1)
            xb = xt + xb                                             # residual, in VMEM
        acc = xb if acc is None else acc + xb
    return acc * (1.0 / len(rb_ks))


# ---------------------------------------------------------------------------
# One-time weight packing (hoisted out of the per-call path)
# ---------------------------------------------------------------------------
def pack_conv(w_oik, b):
    """PyTorch Conv1d weight (C_out, C_in, K) -> (C_out, K*C_in), bias -> (C_out,1)."""
    C_out, C_in, K = w_oik.shape
    w = jnp.reshape(jnp.transpose(w_oik, (0, 2, 1)), (C_out, K * C_in))
    return [w.astype(jnp.float32), jnp.reshape(b, (C_out, 1)).astype(jnp.float32)]


def pack_conv_transpose(w_iok, b, stride):
    """PyTorch ConvTranspose1d weight (C_in, C_out, K) -> stacked per-phase
    packed (stride*C_out, 3*C_in) + tiled bias (stride*C_out, 1) for the
    single-matmul polyphase kernel (shift order [-1, 0, +1] per phase)."""
    C_in, C_out, K = w_iok.shape
    # TODO(synk): odd upsample scales / K != 2*stride need the general
    # polyphase (output_padding); all standard HiFiGAN configs satisfy this.
    assert stride % 2 == 0 and K == 2 * stride
    half = stride // 2
    wt = jnp.transpose(w_iok, (2, 1, 0)).astype(jnp.float32)   # (K, C_out, C_in)
    zero = jnp.zeros((C_out, C_in), jnp.float32)
    phases = []
    for p in range(stride):
        if p < half:
            w_m1, w_0, w_p1 = wt[p + stride + half], wt[p + half], zero
        else:
            w_m1, w_0, w_p1 = zero, wt[p + half], wt[p - half]
        phases.append(jnp.concatenate([w_m1, w_0, w_p1], axis=1))  # (C_out, 3*C_in)
    w_all = jnp.concatenate(phases, axis=0)                        # (s*C_out, 3*C_in)
    b1 = jnp.reshape(b, (1, C_out)).astype(jnp.float32)
    b_all = jnp.reshape(jnp.tile(b1, (stride, 1)), (stride * C_out, 1))
    return [w_all, b_all]


def _interleave_phases(ph, stride, c_out):
    """(stride*C_out, T) phase-major -> (C_out, stride*T) contiguous time.
    Pure data movement: a cheap XLA transpose between pallas_calls (replaces
    the old in-kernel O(T^2) 0/1 selection matmuls)."""
    T = ph.shape[1]
    return jnp.transpose(jnp.reshape(ph, (stride, c_out, T)),
                         (1, 2, 0)).reshape(c_out, stride * T)


# ---------------------------------------------------------------------------
# Stage-fused HiFiGAN forward: 3 pallas_calls, all per-stage work in VMEM
# ---------------------------------------------------------------------------
def build_vocoder(cfg, params):
    slope = float(cfg['lrelu_slope'])
    K_main = cfg['kernel_size']
    scales = cfg['upsample_scales']
    rb_ks = cfg['resblock_kernel_sizes']
    rb_dils = cfg['resblock_dilations']
    n_blocks = len(rb_ks)
    ch = cfg['channels']
    n_stages = len(scales)
    ch_after = [ch // (2 ** (i + 1)) for i in range(n_stages)]

    # ---- pack every weight once (outside jit) ----
    p_head = (pack_conv(*params['input_conv'])
              + pack_conv_transpose(*params['upsamples'][0], stride=scales[0]))
    p_stages = []
    for i in range(n_stages):
        plist = []
        for j in range(n_blocks):
            blk = params['blocks'][i * n_blocks + j]
            for d_idx in range(len(rb_dils[j])):
                plist += pack_conv(*blk['convs1'][d_idx])
                plist += pack_conv(*blk['convs2'][d_idx])
        if i + 1 < n_stages:
            plist += pack_conv_transpose(*params['upsamples'][i + 1],
                                         stride=scales[i + 1])
        else:
            plist += pack_conv(*params['output_conv'])
        p_stages.append(tuple(plist))
    packed = (tuple(p_head),) + tuple(p_stages)

    # ---- kernels (every intermediate inside a call stays in VMEM) ----
    def head_kernel(mel_ref, w_in, b_in, w_up, b_up, out_ref):
        x = _conv_same(mel_ref[...], w_in[...], b_in[...], K_main, 1)
        out_ref[...] = _upsample_phases(_leaky(x, slope), w_up[...], b_up[...])

    def make_stage_kernel(is_last):
        def kernel(*refs):
            x_ref, out_ref = refs[0], refs[-1]
            it = iter(refs[1:-1])
            x = _resblocks(x_ref[...], it, rb_ks, rb_dils, slope)
            w, b = next(it), next(it)
            if is_last:
                y = _conv_same(_leaky(x, 0.01), w[...], b[...], K_main, 1)
                out_ref[...] = jnp.tanh(y)
            else:
                out_ref[...] = _upsample_phases(_leaky(x, slope), w[...], b[...])
        return kernel

    stage_kernels = [make_stage_kernel(i == n_stages - 1) for i in range(n_stages)]

    def _call(kernel, args, out_shape):
        return pl.pallas_call(
            kernel,
            out_shape=jax.ShapeDtypeStruct(out_shape, jnp.float32),
            in_specs=[pl.BlockSpec(memory_space=pltpu.MemorySpace.VMEM)
                      for _ in args],
            out_specs=pl.BlockSpec(memory_space=pltpu.MemorySpace.VMEM),
        )(*args)

    def forward(packed_weights, mel):
        t_cur = mel.shape[1]
        # head: input conv + LeakyReLU + polyphase upsample #0 (phase-major)
        ph = _call(head_kernel, (mel,) + tuple(packed_weights[0]),
                   (scales[0] * ch_after[0], t_cur))
        x = _interleave_phases(ph, scales[0], ch_after[0])
        t_cur *= scales[0]
        for i in range(n_stages):
            is_last = (i == n_stages - 1)
            if is_last:
                out_shape = (cfg['out_channels'], t_cur)
            else:
                out_shape = (scales[i + 1] * ch_after[i + 1], t_cur)
            y = _call(stage_kernels[i], (x,) + tuple(packed_weights[i + 1]),
                      out_shape)
            if is_last:
                return y[0]                                         # 1-D waveform
            x = _interleave_phases(y, scales[i + 1], ch_after[i + 1])
            t_cur *= scales[i + 1]

    return packed, forward


# ---------------------------------------------------------------------------
# Pure-JAX reference (independent formulation: zero-stuffing transposed conv)
# ---------------------------------------------------------------------------
def _conv1d_ref(x, w_oik, b, *, dilation=1, padding=0, pre_slope=None,
                post_tanh=False):
    C_out, C_in, K = w_oik.shape
    T_out = x.shape[1] + 2 * padding - dilation * (K - 1)
    xp = jnp.pad(x, ((0, 0), (padding, padding)))
    if pre_slope is not None:
        xp = jnp.where(xp > 0, xp, pre_slope * xp)
    acc = jnp.broadcast_to(b[:, None], (C_out, T_out)).astype(jnp.float32)
    for k in range(K):
        acc = acc + w_oik[:, :, k] @ xp[:, k * dilation:k * dilation + T_out]
    if post_tanh:
        acc = jnp.tanh(acc)
    return acc


def _conv_transpose1d_ref(x, w_iok, b, *, stride, padding, pre_slope):
    C_in, C_out, K = w_iok.shape
    if pre_slope is not None:
        x = jnp.where(x > 0, x, pre_slope * x)
    T = x.shape[1]
    x_stuff = jnp.zeros((C_in, (T - 1) * stride + 1), x.dtype)
    x_stuff = x_stuff.at[:, ::stride].set(x)
    w_oik = jnp.transpose(jnp.flip(w_iok, axis=2), (1, 0, 2))
    return _conv1d_ref(x_stuff, w_oik, b, dilation=1, padding=K - 1 - padding)


def hifigan_forward_ref(params, mel, cfg):
    slope = cfg['lrelu_slope']
    pad = (cfg['kernel_size'] - 1) // 2
    w, b = params['input_conv']
    c = _conv1d_ref(mel, w, b, dilation=1, padding=pad)
    nb = len(cfg['resblock_kernel_sizes'])
    for i, s in enumerate(cfg['upsample_scales']):
        wt, bt = params['upsamples'][i]
        c = _conv_transpose1d_ref(c, wt, bt, stride=s,
                                  padding=s // 2 + s % 2, pre_slope=slope)
        cs = None
        for j in range(nb):
            blk = params['blocks'][i * nb + j]
            K_r = cfg['resblock_kernel_sizes'][j]
            xb = c
            for d_idx, dil in enumerate(cfg['resblock_dilations'][j]):
                w1, b1 = blk['convs1'][d_idx]
                xt = _conv1d_ref(xb, w1, b1, dilation=dil,
                                 padding=(K_r - 1) // 2 * dil, pre_slope=slope)
                w2, b2 = blk['convs2'][d_idx]
                xt = _conv1d_ref(xt, w2, b2, dilation=1,
                                 padding=(K_r - 1) // 2, pre_slope=slope)
                xb = xt + xb
            cs = xb if cs is None else cs + xb
        c = cs / nb
    wo, bo = params['output_conv']
    c = _conv1d_ref(c, wo, bo, dilation=1, padding=pad, pre_slope=0.01,
                    post_tanh=True)
    return c[0]


# ---------------------------------------------------------------------------
# Synthetic parameter init (checkpoint loading / weight-norm folding omitted)
# ---------------------------------------------------------------------------
def _init_conv(key, c_out, c_in, k, scale=0.1):
    kw, kb = jax.random.split(key)
    return (scale * jax.random.normal(kw, (c_out, c_in, k), jnp.float32),
            scale * jax.random.normal(kb, (c_out,), jnp.float32))


def init_hifigan_params(key, cfg):
    # NOTE: params contain ONLY arrays (no Python ints) so they can safely be
    # passed through jax.jit; all static structure comes from CFG.
    keys = iter(jax.random.split(key, 64))
    ch = cfg['channels']
    params = {'input_conv': _init_conv(next(keys), ch, cfg['in_channels'],
                                       cfg['kernel_size'])}
    ups, blocks = [], []
    for i, (s, ks) in enumerate(zip(cfg['upsample_scales'],
                                    cfg['upsample_kernel_sizes'])):
        cin, cout = ch // (2 ** i), ch // (2 ** (i + 1))
        kw, kb = jax.random.split(next(keys))
        ups.append((0.1 * jax.random.normal(kw, (cin, cout, ks), jnp.float32),
                    0.1 * jax.random.normal(kb, (cout,), jnp.float32)))
        for rk, dils in zip(cfg['resblock_kernel_sizes'],
                            cfg['resblock_dilations']):
            blocks.append(dict(
                convs1=[_init_conv(next(keys), cout, cout, rk) for _ in dils],
                convs2=[_init_conv(next(keys), cout, cout, rk) for _ in dils]))
    params['upsamples'] = ups
    params['blocks'] = blocks
    cfin = ch // (2 ** len(cfg['upsample_scales']))
    params['output_conv'] = _init_conv(next(keys), cfg['out_channels'], cfin,
                                       cfg['kernel_size'])
    return params


if __name__ == "__main__":
    key = jax.random.PRNGKey(0)
    kp, km = jax.random.split(key)
    params = init_hifigan_params(kp, CFG)

    T = 8
    mel = jax.random.normal(km, (CFG['in_channels'], T), jnp.float32)

    packed, forward = build_vocoder(CFG, params)
    fwd = jax.jit(forward)
    wave = jax.block_until_ready(fwd(packed, mel))

    # correctness check against an independent pure-JAX reference
    wave_ref = hifigan_forward_ref(params, mel, CFG)

    total_up = 1
    for s in CFG['upsample_scales']:
        total_up *= s
    assert wave.shape == (T * total_up,), wave.shape
    assert bool(jnp.all(jnp.isfinite(wave)))
    assert bool(jnp.allclose(wave, wave_ref, atol=1e-3, rtol=1e-3)), \
        float(jnp.max(jnp.abs(wave - wave_ref)))

    print("KERNEL_OK")
</pallas_src>

<mosaic_0001>
module attributes {stable_mosaic.version = 11 : i64} {
  func.func @head_kernel(%arg0: memref<80x8xf32, #tpu.memory_space<vmem>>, %arg1: memref<32x560xf32, #tpu.memory_space<vmem>>, %arg2: memref<32x1xf32, #tpu.memory_space<vmem>>, %arg3: memref<128x96xf32, #tpu.memory_space<vmem>>, %arg4: memref<128x1xf32, #tpu.memory_space<vmem>>, %arg5: memref<128x8xf32, #tpu.memory_space<vmem>>) attributes {dimension_semantics = [], scalar_prefetch = 0 : i64, scratch_operands = 0 : i64, tpu.core_type = #tpu.core_type<tc>} {
    %c0 = arith.constant 0 : index
    %c0_0 = arith.constant 0 : index
    %0 = vector.load %arg0[%c0, %c0_0] : memref<80x8xf32, #tpu.memory_space<vmem>>, vector<80x8xf32>
    %c0_1 = arith.constant 0 : index
    %c0_2 = arith.constant 0 : index
    %1 = vector.load %arg1[%c0_1, %c0_2] : memref<32x560xf32, #tpu.memory_space<vmem>>, vector<32x560xf32>
    %c0_3 = arith.constant 0 : index
    %c0_4 = arith.constant 0 : index
    %2 = vector.load %arg2[%c0_3, %c0_4] : memref<32x1xf32, #tpu.memory_space<vmem>>, vector<32x1xf32>
    %cst = arith.constant 0.000000e+00 : f32
    %3 = vector.broadcast %cst : f32 to vector<80x3xf32>
    %4 = tpu.concatenate %3, %0, %3 in 1 : vector<80x3xf32>, vector<80x8xf32>, vector<80x3xf32> -> vector<80x14xf32>
    %5 = vector.extract_strided_slice %4 {offsets = [0, 0], sizes = [80, 8], strides = [1, 1]} : vector<80x14xf32> to vector<80x8xf32>
    %6 = vector.extract_strided_slice %4 {offsets = [0, 1], sizes = [80, 8], strides = [1, 1]} : vector<80x14xf32> to vector<80x8xf32>
    %7 = vector.extract_strided_slice %4 {offsets = [0, 2], sizes = [80, 8], strides = [1, 1]} : vector<80x14xf32> to vector<80x8xf32>
    %8 = vector.extract_strided_slice %4 {offsets = [0, 3], sizes = [80, 8], strides = [1, 1]} : vector<80x14xf32> to vector<80x8xf32>
    %9 = vector.extract_strided_slice %4 {offsets = [0, 4], sizes = [80, 8], strides = [1, 1]} : vector<80x14xf32> to vector<80x8xf32>
    %10 = vector.extract_strided_slice %4 {offsets = [0, 5], sizes = [80, 8], strides = [1, 1]} : vector<80x14xf32> to vector<80x8xf32>
    %11 = vector.extract_strided_slice %4 {offsets = [0, 6], sizes = [80, 8], strides = [1, 1]} : vector<80x14xf32> to vector<80x8xf32>
    %12 = tpu.concatenate %5, %6, %7, %8, %9, %10, %11 in 0 : vector<80x8xf32>, vector<80x8xf32>, vector<80x8xf32>, vector<80x8xf32>, vector<80x8xf32>, vector<80x8xf32>, vector<80x8xf32> -> vector<560x8xf32>
    %cst_5 = arith.constant dense<0.000000e+00> : vector<32x8xf32>
    %13 = tpu.matmul %1, %12, %cst_5 {dimension_numbers = #tpu.dot_dimension_numbers<[1], [0], [0], [1], [0, 0, 1, 1], [], []>} : vector<32x560xf32>, vector<560x8xf32>, vector<32x8xf32> -> vector<32x8xf32>
    %14 = vector.broadcast %2 : vector<32x1xf32> to vector<32x8xf32>
    %15 = arith.addf %13, %14 : vector<32x8xf32>
    %cst_6 = arith.constant 0.000000e+00 : f32
    %16 = vector.broadcast %cst_6 : f32 to vector<32x8xf32>
    %17 = arith.cmpf ogt, %15, %16 : vector<32x8xf32>
    %cst_7 = arith.constant 1.000000e-01 : f32
    %18 = vector.broadcast %cst_7 : f32 to vector<32x8xf32>
    %19 = arith.mulf %18, %15 : vector<32x8xf32>
    %20 = arith.select %17, %15, %19 : vector<32x8xi1>, vector<32x8xf32>
    %c0_8 = arith.constant 0 : index
    %c0_9 = arith.constant 0 : index
    %21 = vector.load %arg3[%c0_8, %c0_9] : memref<128x96xf32, #tpu.memory_space<vmem>>, vector<128x96xf32>
    %c0_10 = arith.constant 0 : index
    %c0_11 = arith.constant 0 : index
    %22 = vector.load %arg4[%c0_10, %c0_11] : memref<128x1xf32, #tpu.memory_space<vmem>>, vector<128x1xf32>
    %cst_12 = arith.constant 0.000000e+00 : f32
    %23 = vector.broadcast %cst_12 : f32 to vector<32x1xf32>
    %24 = tpu.concatenate %23, %20, %23 in 1 : vector<32x1xf32>, vector<32x8xf32>, vector<32x1xf32> -> vector<32x10xf32>
    %25 = vector.extract_strided_slice %24 {offsets = [0, 0], sizes = [32, 8], strides = [1, 1]} : vector<32x10xf32> to vector<32x8xf32>
    %26 = vector.extract_strided_slice %24 {offsets = [0, 1], sizes = [32, 8], strides = [1, 1]} : vector<32x10xf32> to vector<32x8xf32>
    %27 = vector.extract_strided_slice %24 {offsets = [0, 2], sizes = [32, 8], strides = [1, 1]} : vector<32x10xf32> to vector<32x8xf32>
    %28 = tpu.concatenate %25, %26, %27 in 0 : vector<32x8xf32>, vector<32x8xf32>, vector<32x8xf32> -> vector<96x8xf32>
    %cst_13 = arith.constant dense<0.000000e+00> : vector<128x8xf32>
    %29 = tpu.matmul %21, %28, %cst_13 {dimension_numbers = #tpu.dot_dimension_numbers<[1], [0], [0], [1], [0, 0, 1, 1], [], []>} : vector<128x96xf32>, vector<96x8xf32>, vector<128x8xf32> -> vector<128x8xf32>
    %30 = vector.broadcast %22 : vector<128x1xf32> to vector<128x8xf32>
    %31 = arith.addf %29, %30 : vector<128x8xf32>
    %c0_14 = arith.constant 0 : index
    %c0_15 = arith.constant 0 : index
    %32 = vector.load %arg5[%c0_14, %c0_15] : memref<128x8xf32, #tpu.memory_space<vmem>>, vector<128x8xf32>
    tpu.vector_store %arg5[%c0_14, %c0_15], %31 {strides = array<i32>} : memref<128x8xf32, #tpu.memory_space<vmem>>, vector<128x8xf32>,
    return
  }
}

module attributes {stable_mosaic.version = 11 : i64} {
  func.func @kernel(%arg0: memref<16x64xf32, #tpu.memory_space<vmem>>, %arg1: memref<16x48xf32, #tpu.memory_space<vmem>>, %arg2: memref<16x1xf32, #tpu.memory_space<vmem>>, %arg3: memref<16x48xf32, #tpu.memory_space<vmem>>, %arg4: memref<16x1xf32, #tpu.memory_space<vmem>>, %arg5: memref<16x48xf32, #tpu.memory_space<vmem>>, %arg6: memref<16x1xf32, #tpu.memory_space<vmem>>, %arg7: memref<16x48xf32, #tpu.memory_space<vmem>>, %arg8: memref<16x1xf32, #tpu.memory_space<vmem>>, %arg9: memref<16x112xf32, #tpu.memory_space<vmem>>, %arg10: memref<16x1xf32, #tpu.memory_space<vmem>>, %arg11: memref<16x112xf32, #tpu.memory_space<vmem>>, %arg12: memref<16x1xf32, #tpu.memory_space<vmem>>, %arg13: memref<16x112xf32, #tpu.memory_space<vmem>>, %arg14: memref<16x1xf32, #tpu.memory_space<vmem>>, %arg15: memref<16x112xf32, #tpu.memory_space<vmem>>, %arg16: memref<16x1xf32, #tpu.memory_space<vmem>>, %arg17: memref<32x48xf32, #tpu.memory_space<vmem>>, %arg18: memref<32x1xf32, #tpu.memory_space<vmem>>, %arg19: memref<32x64xf32, #tpu.memory_space<vmem>>) attributes {dimension_semantics = [], scalar_prefetch = 0 : i64, scratch_operands = 0 : i64, tpu.core_type = #tpu.core_type<tc>} {
    %c0 = arith.constant 0 : index
    %c0_0 = arith.constant 0 : index
    %0 = vector.load %arg0[%c0, %c0_0] : memref<16x64xf32, #tpu.memory_space<vmem>>, vector<16x64xf32>
    %cst = arith.constant 0.000000e+00 : f32
    %1 = vector.broadcast %cst : f32 to vector<16x64xf32>
    %2 = arith.cmpf ogt, %0, %1 : vector<16x64xf32>
    %cst_1 = arith.constant 1.000000e-01 : f32
    %3 = vector.broadcast %cst_1 : f32 to vector<16x64xf32>
    %4 = arith.mulf %3, %0 : vector<16x64xf32>
    %5 = arith.select %2, %0, %4 : vector<16x64xi1>, vector<16x64xf32>
    %c0_2 = arith.constant 0 : index
    %c0_3 = arith.constant 0 : index
    %6 = vector.load %arg1[%c0_2, %c0_3] : memref<16x48xf32, #tpu.memory_space<vmem>>, vector<16x48xf32>
    %c0_4 = arith.constant 0 : index
    %c0_5 = arith.constant 0 : index
    %7 = vector.load %arg2[%c0_4, %c0_5] : memref<16x1xf32, #tpu.memory_space<vmem>>, vector<16x1xf32>
    %cst_6 = arith.constant 0.000000e+00 : f32
    %8 = vector.broadcast %cst_6 : f32 to vector<16x1xf32>
    %9 = tpu.concatenate %8, %5, %8 in 1 : vector<16x1xf32>, vector<16x64xf32>, vector<16x1xf32> -> vector<16x66xf32>
    %10 = vector.extract_strided_slice %9 {offsets = [0, 0], sizes = [16, 64], strides = [1, 1]} : vector<16x66xf32> to vector<16x64xf32>
    %11 = vector.extract_strided_slice %9 {offsets = [0, 1], sizes = [16, 64], strides = [1, 1]} : vector<16x66xf32> to vector<16x64xf32>
    %12 = vector.extract_strided_slice %9 {offsets = [0, 2], sizes = [16, 64], strides = [1, 1]} : vector<16x66xf32> to vector<16x64xf32>
    %13 = tpu.concatenate %10, %11, %12 in 0 : vector<16x64xf32>, vector<16x64xf32>, vector<16x64xf32> -> vector<48x64xf32>
    %cst_7 = arith.constant dense<0.000000e+00> : vector<16x64xf32>
    %14 = tpu.matmul %6, %13, %cst_7 {dimension_numbers = #tpu.dot_dimension_numbers<[1], [0], [0], [1], [0, 0, 1, 1], [], []>} : vector<16x48xf32>, vector<48x64xf32>, vector<16x64xf32> -> vector<16x64xf32>
    %15 = vector.broadcast %7 : vector<16x1xf32> to vector<16x64xf32>
    %16 = arith.addf %14, %15 : vector<16x64xf32>
    %cst_8 = arith.constant 0.000000e+00 : f32
    %17 = vector.broadcast %cst_8 : f32 to vector<16x64xf32>
    %18 = arith.cmpf ogt, %16, %17 : vector<16x64xf32>
    %cst_9 = arith.constant 1.000000e-01 : f32
    %19 = vector.broadcast %cst_9 : f32 to vector<16x64xf32>
    %20 = arith.mulf %19, %16 : vector<16x64xf32>
    %21 = arith.select %18, %16, %20 : vector<16x64xi1>, vector<16x64xf32>
    %c0_10 = arith.constant 0 : index
    %c0_11 = arith.constant 0 : index
    %22 = vector.load %arg3[%c0_10, %c0_11] : memref<16x48xf32, #tpu.memory_space<vmem>>, vector<16x48xf32>
    %c0_12 = arith.constant 0 : index
    %c0_13 = arith.constant 0 : index
    %23 = vector.load %arg4[%c0_12, %c0_13] : memref<16x1xf32, #tpu.memory_space<vmem>>, vector<16x1xf32>
    %cst_14 = arith.constant 0.000000e+00 : f32
    %24 = vector.broadcast %cst_14 : f32 to vector<16x1xf32>
    %25 = tpu.concatenate %24, %21, %24 in 1 : vector<16x1xf32>, vector<16x64xf32>, vector<16x1xf32> -> vector<16x66xf32>
    %26 = vector.extract_strided_slice %25 {offsets = [0, 0], sizes = [16, 64], strides = [1, 1]} : vector<16x66xf32> to vector<16x64xf32>
    %27 = vector.extract_strided_slice %25 {offsets = [0, 1], sizes = [16, 64], strides = [1, 1]} : vector<16x66xf32> to vector<16x64xf32>
    %28 = vector.extract_strided_slice %25 {offsets = [0, 2], sizes = [16, 64], strides = [1, 1]} : vector<16x66xf32> to vector<16x64xf32>
    %29 = tpu.concatenate %26, %27, %28 in 0 : vector<16x64xf32>, vector<16x64xf32>, vector<16x64xf32> -> vector<48x64xf32>
    %cst_15 = arith.constant dense<0.000000e+00> : vector<16x64xf32>
    %30 = tpu.matmul %22, %29, %cst_15 {dimension_numbers = #tpu.dot_dimension_numbers<[1], [0], [0], [1], [0, 0, 1, 1], [], []>} : vector<16x48xf32>, vector<48x64xf32>, vector<16x64xf32> -> vector<16x64xf32>
    %31 = vector.broadcast %23 : vector<16x1xf32> to vector<16x64xf32>
    %32 = arith.addf %30, %31 : vector<16x64xf32>
    %33 = arith.addf %32, %0 : vector<16x64xf32>
    %cst_16 = arith.constant 0.000000e+00 : f32
    %34 = vector.broadcast %cst_16 : f32 to vector<16x64xf32>
    %35 = arith.cmpf ogt, %33, %34 : vector<16x64xf32>
    %cst_17 = arith.constant 1.000000e-01 : f32
    %36 = vector.broadcast %cst_17 : f32 to vector<16x64xf32>
    %37 = arith.mulf %36, %33 : vector<16x64xf32>
    %38 = arith.select %35, %33, %37 : vector<16x64xi1>, vector<16x64xf32>
    %c0_18 = arith.constant 0 : index
    %c0_19 = arith.constant 0 : index
    %39 = vector.load %arg5[%c0_18, %c0_19] : memref<16x48xf32, #tpu.memory_space<vmem>>, vector<16x48xf32>
    %c0_20 = arith.constant 0 : index
    %c0_21 = arith.constant 0 : index
    %40 = vector.load %arg6[%c0_20, %c0_21] : memref<16x1xf32, #tpu.memory_space<vmem>>, vector<16x1xf32>
    %cst_22 = arith.constant 0.000000e+00 : f32
    %41 = vector.broadcast %cst_22 : f32 to vector<16x3xf32>
    %42 = tpu.concatenate %41, %38, %41 in 1 : vector<16x3xf32>, vector<16x64xf32>, vector<16x3xf32> -> vector<16x70xf32>
    %43 = vector.extract_strided_slice %42 {offsets = [0, 0], sizes = [16, 64], strides = [1, 1]} : vector<16x70xf32> to vector<16x64xf32>
    %44 = vector.extract_strided_slice %42 {offsets = [0, 3], sizes = [16, 64], strides = [1, 1]} : vector<16x70xf32> to vector<16x64xf32>
    %45 = vector.extract_strided_slice %42 {offsets = [0, 6], sizes = [16, 64], strides = [1, 1]} : vector<16x70xf32> to vector<16x64xf32>
    %46 = tpu.concatenate %43, %44, %45 in 0 : vector<16x64xf32>, vector<16x64xf32>, vector<16x64xf32> -> vector<48x64xf32>
    %cst_23 = arith.constant dense<0.000000e+00> : vector<16x64xf32>
    %47 = tpu.matmul %39, %46, %cst_23 {dimension_numbers = #tpu.dot_dimension_numbers<[1], [0], [0], [1], [0, 0, 1, 1], [], []>} : vector<16x48xf32>, vector<48x64xf32>, vector<16x64xf32> -> vector<16x64xf32>
    %48 = vector.broadcast %40 : vector<16x1xf32> to vector<16x64xf32>
    %49 = arith.addf %47, %48 : vector<16x64xf32>
    %cst_24 = arith.constant 0.000000e+00 : f32
    %50 = vector.broadcast %cst_24 : f32 to vector<16x64xf32>
    %51 = arith.cmpf ogt, %49, %50 : vector<16x64xf32>
    %cst_25 = arith.constant 1.000000e-01 : f32
    %52 = vector.broadcast %cst_25 : f32 to vector<16x64xf32>
    %53 = arith.mulf %52, %49 : vector<16x64xf32>
    %54 = arith.select %51, %49, %53 : vector<16x64xi1>, vector<16x64xf32>
    %c0_26 = arith.constant 0 : index
    %c0_27 = arith.constant 0 : index
    %55 = vector.load %arg7[%c0_26, %c0_27] : memref<16x48xf32, #tpu.memory_space<vmem>>, vector<16x48xf32>
    %c0_28 = arith.constant 0 : index
    %c0_29 = arith.constant 0 : index
    %56 = vector.load %arg8[%c0_28, %c0_29] : memref<16x1xf32, #tpu.memory_space<vmem>>, vector<16x1xf32>
    %cst_30 = arith.constant 0.000000e+00 : f32
    %57 = vector.broadcast %cst_30 : f32 to vector<16x1xf32>
    %58 = tpu.concatenate %57, %54, %57 in 1 : vector<16x1xf32>, vector<16x64xf32>, vector<16x1xf32> -> vector<16x66xf32>
    %59 = vector.extract_strided_slice %58 {offsets = [0, 0], sizes = [16, 64], strides = [1, 1]} : vector<16x66xf32> to vector<16x64xf32>
    %60 = vector.extract_strided_slice %58 {offsets = [0, 1], sizes = [16, 64], strides = [1, 1]} : vector<16x66xf32> to vector<16x64xf32>
    %61 = vector.extract_strided_slice %58 {offsets = [0, 2], sizes = [16, 64], strides = [1, 1]} : vector<16x66xf32> to vector<16x64xf32>
    %62 = tpu.concatenate %59, %60, %61 in 0 : vector<16x64xf32>, vector<16x64xf32>, vector<16x64xf32> -> vector<48x64xf32>
    %cst_31 = arith.constant dense<0.000000e+00> : vector<16x64xf32>
    %63 = tpu.matmul %55, %62, %cst_31 {dimension_numbers = #tpu.dot_dimension_numbers<[1], [0], [0], [1], [0, 0, 1, 1], [], []>} : vector<16x48xf32>, vector<48x64xf32>, vector<16x64xf32> -> vector<16x64xf32>
    %64 = vector.broadcast %56 : vector<16x1xf32> to vector<16x64xf32>
    %65 = arith.addf %63, %64 : vector<16x64xf32>
    %66 = arith.addf %65, %33 : vector<16x64xf32>
    %cst_32 = arith.constant 0.000000e+00 : f32
    %67 = vector.broadcast %cst_32 : f32 to vector<16x64xf32>
    %68 = arith.cmpf ogt, %0, %67 : vector<16x64xf32>
    %cst_33 = arith.constant 1.000000e-01 : f32
    %69 = vector.broadcast %cst_33 : f32 to vector<16x64xf32>
    %70 = arith.mulf %69, %0 : vector<16x64xf32>
    %71 = arith.select %68, %0, %70 : vector<16x64xi1>, vector<16x64xf32>
    %c0_34 = arith.constant 0 : index
    %c0_35 = arith.constant 0 : index
    %72 = vector.load %arg9[%c0_34, %c0_35] : memref<16x112xf32, #tpu.memory_space<vmem>>, vector<16x112xf32>
    %c0_36 = arith.constant 0 : index
    %c0_37 = arith.constant 0 : index
    %73 = vector.load %arg10[%c0_36, %c0_37] : memref<16x1xf32, #tpu.memory_space<vmem>>, vector<16x1xf32>
    %cst_38 = arith.constant 0.000000e+00 : f32
    %74 = vector.broadcast %cst_38 : f32 to vector<16x3xf32>
    %75 = tpu.concatenate %74, %71, %74 in 1 : vector<16x3xf32>, vector<16x64xf32>, vector<16x3xf32> -> vector<16x70xf32>
    %76 = vector.extract_strided_slice %75 {offsets = [0, 0], sizes = [16, 64], strides = [1, 1]} : vector<16x70xf32> to vector<16x64xf32>
    %77 = vector.extract_strided_slice %75 {offsets = [0, 1], sizes = [16, 64], strides = [1, 1]} : vector<16x70xf32> to vector<16x64xf32>
    %78 = vector.extract_strided_slice %75 {offsets = [0, 2], sizes = [16, 64], strides = [1, 1]} : vector<16x70xf32> to vector<16x64xf32>
    %79 = vector.extract_strided_slice %75 {offsets = [0, 3], sizes = [16, 64], strides = [1, 1]} : vector<16x70xf32> to vector<16x64xf32>
    %80 = vector.extract_strided_slice %75 {offsets = [0, 4], sizes = [16, 64], strides = [1, 1]} : vector<16x70xf32> to vector<16x64xf32>
    %81 = vector.extract_strided_slice %75 {offsets = [0, 5], sizes = [16, 64], strides = [1, 1]} : vector<16x70xf32> to vector<16x64xf32>
    %82 = vector.extract_strided_slice %75 {offsets = [0, 6], sizes = [16, 64], strides = [1, 1]} : vector<16x70xf32> to vector<16x64xf32>
    %83 = tpu.concatenate %76, %77, %78, %79, %80, %81, %82 in 0 : vector<16x64xf32>, vector<16x64xf32>, vector<16x64xf32>, vector<16x64xf32>, vector<16x64xf32>, vector<16x64xf32>, vector<16x64xf32> -> vector<112x64xf32>
    %cst_39 = arith.constant dense<0.000000e+00> : vector<16x64xf32>
    %84 = tpu.matmul %72, %83, %cst_39 {dimension_numbers = #tpu.dot_dimension_numbers<[1], [0], [0], [1], [0, 0, 1, 1], [], []>} : vector<16x112xf32>, vector<112x64xf32>, vector<16x64xf32> -> vector<16x64xf32>
    %85 = vector.broadcast %73 : vector<16x1xf32> to vector<16x64xf32>
    %86 = arith.addf %84, %85 : vector<16x64xf32>
    %cst_40 = arith.constant 0.000000e+00 : f32
    %87 = vector.broadcast %cst_40 : f32 to vector<16x64xf32>
    %88 = arith.cmpf ogt, %86, %87 : vector<16x64xf32>
    %cst_41 = arith.constant 1.000000e-01 : f32
    %89 = vector.broadcast %cst_41 : f32 to vector<16x64xf32>
    %90 = arith.mulf %89, %86 : vector<16x64xf32>
    %91 = arith.select %88, %86, %90 : vector<16x64xi1>, vector<16x64xf32>
    %c0_42 = arith.constant 0 : index
    %c0_43 = arith.constant 0 : index
    %92 = vector.load %arg11[%c0_42, %c0_43] : memref<16x112xf32, #tpu.memory_space<vmem>>, vector<16x112xf32>
    %c0_44 = arith.constant 0 : index
    %c0_45 = arith.constant 0 : index
    %93 = vector.load %arg12[%c0_44, %c0_45] : memref<16x1xf32, #tpu.memory_space<vmem>>, vector<16x1xf32>
    %cst_46 = arith.constant 0.000000e+00 : f32
    %94 = vector.broadcast %cst_46 : f32 to vector<16x3xf32>
    %95 = tpu.concatenate %94, %91, %94 in 1 : vector<16x3xf32>, vector<16x64xf32>, vector<16x3xf32> -> vector<16x70xf32>
    %96 = vector.extract_strided_slice %95 {offsets = [0, 0], sizes = [16, 64], strides = [1, 1]} : vector<16x70xf32> to vector<16x64xf32>
    %97 = vector.extract_strided_slice %95 {offsets = [0, 1], sizes = [16, 64], strides = [1, 1]} : vector<16x70xf32> to vector<16x64xf32>
    %98 = vector.extract_strided_slice %95 {offsets = [0, 2], sizes = [16, 64], strides = [1, 1]} : vector<16x70xf32> to vector<16x64xf32>
    %99 = vector.extract_strided_slice %95 {offsets = [0, 3], sizes = [16, 64], strides = [1, 1]} : vector<16x70xf32> to vector<16x64xf32>
    %100 = vector.extract_strided_slice %95 {offsets = [0, 4], sizes = [16, 64], strides = [1, 1]} : vector<16x70xf32> to vector<16x64xf32>
    %101 = vector.extract_strided_slice %95 {offsets = [0, 5], sizes = [16, 64], strides = [1, 1]} : vector<16x70xf32> to vector<16x64xf32>
    %102 = vector.extract_strided_slice %95 {offsets = [0, 6], sizes = [16, 64], strides = [1, 1]} : vector<16x70xf32> to vector<16x64xf32>
    %103 = tpu.concatenate %96, %97, %98, %99, %100, %101, %102 in 0 : vector<16x64xf32>, vector<16x64xf32>, vector<16x64xf32>, vector<16x64xf32>, vector<16x64xf32>, vector<16x64xf32>, vector<16x64xf32> -> vector<112x64xf32>
    %cst_47 = arith.constant dense<0.000000e+00> : vector<16x64xf32>
    %104 = tpu.matmul %92, %103, %cst_47 {dimension_numbers = #tpu.dot_dimension_numbers<[1], [0], [0], [1], [0, 0, 1, 1], [], []>} : vector<16x112xf32>, vector<112x64xf32>, vector<16x64xf32> -> vector<16x64xf32>
    %105 = vector.broadcast %93 : vector<16x1xf32> to vector<16x64xf32>
    %106 = arith.addf %104, %105 : vector<16x64xf32>
    %107 = arith.addf %106, %0 : vector<16x64xf32>
    %cst_48 = arith.constant 0.000000e+00 : f32
    %108 = vector.broadcast %cst_48 : f32 to vector<16x64xf32>
    %109 = arith.cmpf ogt, %107, %108 : vector<16x64xf32>
    %cst_49 = arith.constant 1.000000e-01 : f32
    %110 = vector.broadcast %cst_49 : f32 to vector<16x64xf32>
    %111 = arith.mulf %110, %107 : vector<16x64xf32>
    %112 = arith.select %109, %107, %111 : vector<16x64xi1>, vector<16x64xf32>
    %c0_50 = arith.constant 0 : index
    %c0_51 = arith.constant 0 : index
    %113 = vector.load %arg13[%c0_50, %c0_51] : memref<16x112xf32, #tpu.memory_space<vmem>>, vector<16x112xf32>
    %c0_52 = arith.constant 0 : index
    %c0_53 = arith.constant 0 : index
    %114 = vector.load %arg14[%c0_52, %c0_53] : memref<16x1xf32, #tpu.memory_space<vmem>>, vector<16x1xf32>
    %cst_54 = arith.constant 0.000000e+00 : f32
    %115 = vector.broadcast %cst_54 : f32 to vector<16x9xf32>
    %116 = tpu.concatenate %115, %112, %115 in 1 : vector<16x9xf32>, vector<16x64xf32>, vector<16x9xf32> -> vector<16x82xf32>
    %117 = vector.extract_strided_slice %116 {offsets = [0, 0], sizes = [16, 64], strides = [1, 1]} : vector<16x82xf32> to vector<16x64xf32>
    %118 = vector.extract_strided_slice %116 {offsets = [0, 3], sizes = [16, 64], strides = [1, 1]} : vector<16x82xf32> to vector<16x64xf32>
    %119 = vector.extract_strided_slice %116 {offsets = [0, 6], sizes = [16, 64], strides = [1, 1]} : vector<16x82xf32> to vector<16x64xf32>
    %120 = vector.extract_strided_slice %116 {offsets = [0, 9], sizes = [16, 64], strides = [1, 1]} : vector<16x82xf32> to vector<16x64xf32>
    %121 = vector.extract_strided_slice %116 {offsets = [0, 12], sizes = [16, 64], strides = [1, 1]} : vector<16x82xf32> to vector<16x64xf32>
    %122 = vector.extract_strided_slice %116 {offsets = [0, 15], sizes = [16, 64], strides = [1, 1]} : vector<16x82xf32> to vector<16x64xf32>
    %123 = vector.extract_strided_slice %116 {offsets = [0, 18], sizes = [16, 64], strides = [1, 1]} : vector<16x82xf32> to vector<16x64xf32>
    %124 = tpu.concatenate %117, %118, %119, %120, %121, %122, %123 in 0 : vector<16x64xf32>, vector<16x64xf32>, vector<16x64xf32>, vector<16x64xf32>, vector<16x64xf32>, vector<16x64xf32>, vector<16x64xf32> -> vector<112x64xf32>
    %cst_55 = arith.constant dense<0.000000e+00> : vector<16x64xf32>
    %125 = tpu.matmul %113, %124, %cst_55 {dimension_numbers = #tpu.dot_dimension_numbers<[1], [0], [0], [1], [0, 0, 1, 1], [], []>} : vector<16x112xf32>, vector<112x64xf32>, vector<16x64xf32> -> vector<16x64xf32>
    %126 = vector.broadcast %114 : vector<16x1xf32> to vector<16x64xf32>
    %127 = arith.addf %125, %126 : vector<16x64xf32>
    %cst_56 = arith.constant 0.000000e+00 : f32
    %128 = vector.broadcast %cst_56 : f32 to vector<16x64xf32>
    %129 = arith.cmpf ogt, %127, %128 : vector<16x64xf32>
    %cst_57 = arith.constant 1.000000e-01 : f32
    %130 = vector.broadcast %cst_57 : f32 to vector<16x64xf32>
    %131 = arith.mulf %130, %127 : vector<16x64xf32>
    %132 = arith.select %129, %127, %131 : vector<16x64xi1>, vector<16x64xf32>
    %c0_58 = arith.constant 0 : index
    %c0_59 = arith.constant 0 : index
    %133 = vector.load %arg15[%c0_58, %c0_59] : memref<16x112xf32, #tpu.memory_space<vmem>>, vector<16x112xf32>
    %c0_60 = arith.constant 0 : index
    %c0_61 = arith.constant 0 : index
    %134 = vector.load %arg16[%c0_60, %c0_61] : memref<16x1xf32, #tpu.memory_space<vmem>>, vector<16x1xf32>
    %cst_62 = arith.constant 0.000000e+00 : f32
    %135 = vector.broadcast %cst_62 : f32 to vector<16x3xf32>
    %136 = tpu.concatenate %135, %132, %135 in 1 : vector<16x3xf32>, vector<16x64xf32>, vector<16x3xf32> -> vector<16x70xf32>
    %137 = vector.extract_strided_slice %136 {offsets = [0, 0], sizes = [16, 64], strides = [1, 1]} : vector<16x70xf32> to vector<16x64xf32>
    %138 = vector.extract_strided_slice %136 {offsets = [0, 1], sizes = [16, 64], strides = [1, 1]} : vector<16x70xf32> to vector<16x64xf32>
    %139 = vector.extract_strided_slice %136 {offsets = [0, 2], sizes = [16, 64], strides = [1, 1]} : vector<16x70xf32> to vector<16x64xf32>
    %140 = vector.extract_strided_slice %136 {offsets = [0, 3], sizes = [16, 64], strides = [1, 1]} : vector<16x70xf32> to vector<16x64xf32>
    %141 = vector.extract_strided_slice %136 {offsets = [0, 4], sizes = [16, 64], strides = [1, 1]} : vector<16x70xf32> to vector<16x64xf32>
    %142 = vector.extract_strided_slice %136 {offsets = [0, 5], sizes = [16, 64], strides = [1, 1]} : vector<16x70xf32> to vector<16x64xf32>
    %143 = vector.extract_strided_slice %136 {offsets = [0, 6], sizes = [16, 64], strides = [1, 1]} : vector<16x70xf32> to vector<16x64xf32>
    %144 = tpu.concatenate %137, %138, %139, %140, %141, %142, %143 in 0 : vector<16x64xf32>, vector<16x64xf32>, vector<16x64xf32>, vector<16x64xf32>, vector<16x64xf32>, vector<16x64xf32>, vector<16x64xf32> -> vector<112x64xf32>
    %cst_63 = arith.constant dense<0.000000e+00> : vector<16x64xf32>
    %145 = tpu.matmul %133, %144, %cst_63 {dimension_numbers = #tpu.dot_dimension_numbers<[1], [0], [0], [1], [0, 0, 1, 1], [], []>} : vector<16x112xf32>, vector<112x64xf32>, vector<16x64xf32> -> vector<16x64xf32>
    %146 = vector.broadcast %134 : vector<16x1xf32> to vector<16x64xf32>
    %147 = arith.addf %145, %146 : vector<16x64xf32>
    %148 = arith.addf %147, %107 : vector<16x64xf32>
    %149 = arith.addf %66, %148 : vector<16x64xf32>
    %cst_64 = arith.constant 5.000000e-01 : f32
    %150 = vector.broadcast %cst_64 : f32 to vector<16x64xf32>
    %151 = arith.mulf %149, %150 : vector<16x64xf32>
    %cst_65 = arith.constant 0.000000e+00 : f32
    %152 = vector.broadcast %cst_65 : f32 to vector<16x64xf32>
    %153 = arith.cmpf ogt, %151, %152 : vector<16x64xf32>
    %cst_66 = arith.constant 1.000000e-01 : f32
    %154 = vector.broadcast %cst_66 : f32 to vector<16x64xf32>
    %155 = arith.mulf %154, %151 : vector<16x64xf32>
    %156 = arith.select %153, %151, %155 : vector<16x64xi1>, vector<16x64xf32>
    %c0_67 = arith.constant 0 : index
    %c0_68 = arith.constant 0 : index
    %157 = vector.load %arg17[%c0_67, %c0_68] : memref<32x48xf32, #tpu.memory_space<vmem>>, vector<32x48xf32>
    %c0_69 = arith.constant 0 : index
    %c0_70 = arith.constant 0 : index
    %158 = vector.load %arg18[%c0_69, %c0_70] : memref<32x1xf32, #tpu.memory_space<vmem>>, vector<32x1xf32>
    %cst_71 = arith.constant 0.000000e+00 : f32
    %159 = vector.broadcast %cst_71 : f32 to vector<16x1xf32>
    %160 = tpu.concatenate %159, %156, %159 in 1 : vector<16x1xf32>, vector<16x64xf32>, vector<16x1xf32> -> vector<16x66xf32>
    %161 = vector.extract_strided_slice %160 {offsets = [0, 0], sizes = [16, 64], strides = [1, 1]} : vector<16x66xf32> to vector<16x64xf32>
    %162 = vector.extract_strided_slice %160 {offsets = [0, 1], sizes = [16, 64], strides = [1, 1]} : vector<16x66xf32> to vector<16x64xf32>
    %163 = vector.extract_strided_slice %160 {offsets = [0, 2], sizes = [16, 64], strides = [1, 1]} : vector<16x66xf32> to vector<16x64xf32>
    %164 = tpu.concatenate %161, %162, %163 in 0 : vector<16x64xf32>, vector<16x64xf32>, vector<16x64xf32> -> vector<48x64xf32>
    %cst_72 = arith.constant dense<0.000000e+00> : vector<32x64xf32>
    %165 = tpu.matmul %157, %164, %cst_72 {dimension_numbers = #tpu.dot_dimension_numbers<[1], [0], [0], [1], [0, 0, 1, 1], [], []>} : vector<32x48xf32>, vector<48x64xf32>, vector<32x64xf32> -> vector<32x64xf32>
    %166 = vector.broadcast %158 : vector<32x1xf32> to vector<32x64xf32>
    %167 = arith.addf %165, %166 : vector<32x64xf32>
    %c0_73 = arith.constant 0 : index
    %c0_74 = arith.constant 0 : index
    %168 = vector.load %arg19[%c0_73, %c0_74] : memref<32x64xf32, #tpu.memory_space<vmem>>, vector<32x64xf32>
    tpu.vector_store %arg19[%c0_73, %c0_74], %167 {strides = array<i32>} : memref<32x64xf32, #tpu.memory_space<vmem>>, vector<32x64xf32>,
    return
  }
}

module attributes {stable_mosaic.version = 11 : i64} {
  func.func @kernel(%arg0: memref<8x256xf32, #tpu.memory_space<vmem>>, %arg1: memref<8x24xf32, #tpu.memory_space<vmem>>, %arg2: memref<8x1xf32, #tpu.memory_space<vmem>>, %arg3: memref<8x24xf32, #tpu.memory_space<vmem>>, %arg4: memref<8x1xf32, #tpu.memory_space<vmem>>, %arg5: memref<8x24xf32, #tpu.memory_space<vmem>>, %arg6: memref<8x1xf32, #tpu.memory_space<vmem>>, %arg7: memref<8x24xf32, #tpu.memory_space<vmem>>, %arg8: memref<8x1xf32, #tpu.memory_space<vmem>>, %arg9: memref<8x56xf32, #tpu.memory_space<vmem>>, %arg10: memref<8x1xf32, #tpu.memory_space<vmem>>, %arg11: memref<8x56xf32, #tpu.memory_space<vmem>>, %arg12: memref<8x1xf32, #tpu.memory_space<vmem>>, %arg13: memref<8x56xf32, #tpu.memory_space<vmem>>, %arg14: memref<8x1xf32, #tpu.memory_space<vmem>>, %arg15: memref<8x56xf32, #tpu.memory_space<vmem>>, %arg16: memref<8x1xf32, #tpu.memory_space<vmem>>, %arg17: memref<1x56xf32, #tpu.memory_space<vmem>>, %arg18: memref<1x1xf32, #tpu.memory_space<vmem>>, %arg19: memref<1x256xf32, #tpu.memory_space<vmem>>) attributes {dimension_semantics = [], scalar_prefetch = 0 : i64, scratch_operands = 0 : i64, tpu.core_type = #tpu.core_type<tc>} {
    %c0 = arith.constant 0 : index
    %c0_0 = arith.constant 0 : index
    %0 = vector.load %arg0[%c0, %c0_0] : memref<8x256xf32, #tpu.memory_space<vmem>>, vector<8x256xf32>
    %cst = arith.constant 0.000000e+00 : f32
    %1 = vector.broadcast %cst : f32 to vector<8x256xf32>
    %2 = arith.cmpf ogt, %0, %1 : vector<8x256xf32>
    %cst_1 = arith.constant 1.000000e-01 : f32
    %3 = vector.broadcast %cst_1 : f32 to vector<8x256xf32>
    %4 = arith.mulf %3, %0 : vector<8x256xf32>
    %5 = arith.select %2, %0, %4 : vector<8x256xi1>, vector<8x256xf32>
    %c0_2 = arith.constant 0 : index
    %c0_3 = arith.constant 0 : index
    %6 = vector.load %arg1[%c0_2, %c0_3] : memref<8x24xf32, #tpu.memory_space<vmem>>, vector<8x24xf32>
    %c0_4 = arith.constant 0 : index
    %c0_5 = arith.constant 0 : index
    %7 = vector.load %arg2[%c0_4, %c0_5] : memref<8x1xf32, #tpu.memory_space<vmem>>, vector<8x1xf32>
    %cst_6 = arith.constant 0.000000e+00 : f32
    %8 = vector.broadcast %cst_6 : f32 to vector<8x1xf32>
    %9 = tpu.concatenate %8, %5, %8 in 1 : vector<8x1xf32>, vector<8x256xf32>, vector<8x1xf32> -> vector<8x258xf32>
    %10 = vector.extract_strided_slice %9 {offsets = [0, 0], sizes = [8, 256], strides = [1, 1]} : vector<8x258xf32> to vector<8x256xf32>
    %11 = vector.extract_strided_slice %9 {offsets = [0, 1], sizes = [8, 256], strides = [1, 1]} : vector<8x258xf32> to vector<8x256xf32>
    %12 = vector.extract_strided_slice %9 {offsets = [0, 2], sizes = [8, 256], strides = [1, 1]} : vector<8x258xf32> to vector<8x256xf32>
    %13 = tpu.concatenate %10, %11, %12 in 0 : vector<8x256xf32>, vector<8x256xf32>, vector<8x256xf32> -> vector<24x256xf32>
    %cst_7 = arith.constant dense<0.000000e+00> : vector<8x256xf32>
    %14 = tpu.matmul %6, %13, %cst_7 {dimension_numbers = #tpu.dot_dimension_numbers<[1], [0], [0], [1], [0, 0, 1, 1], [], []>} : vector<8x24xf32>, vector<24x256xf32>, vector<8x256xf32> -> vector<8x256xf32>
    %15 = vector.broadcast %7 : vector<8x1xf32> to vector<8x256xf32>
    %16 = arith.addf %14, %15 : vector<8x256xf32>
    %cst_8 = arith.constant 0.000000e+00 : f32
    %17 = vector.broadcast %cst_8 : f32 to vector<8x256xf32>
    %18 = arith.cmpf ogt, %16, %17 : vector<8x256xf32>
    %cst_9 = arith.constant 1.000000e-01 : f32
    %19 = vector.broadcast %cst_9 : f32 to vector<8x256xf32>
    %20 = arith.mulf %19, %16 : vector<8x256xf32>
    %21 = arith.select %18, %16, %20 : vector<8x256xi1>, vector<8x256xf32>
    %c0_10 = arith.constant 0 : index
    %c0_11 = arith.constant 0 : index
    %22 = vector.load %arg3[%c0_10, %c0_11] : memref<8x24xf32, #tpu.memory_space<vmem>>, vector<8x24xf32>
    %c0_12 = arith.constant 0 : index
    %c0_13 = arith.constant 0 : index
    %23 = vector.load %arg4[%c0_12, %c0_13] : memref<8x1xf32, #tpu.memory_space<vmem>>, vector<8x1xf32>
    %cst_14 = arith.constant 0.000000e+00 : f32
    %24 = vector.broadcast %cst_14 : f32 to vector<8x1xf32>
    %25 = tpu.concatenate %24, %21, %24 in 1 : vector<8x1xf32>, vector<8x256xf32>, vector<8x1xf32> -> vector<8x258xf32>
    %26 = vector.extract_strided_slice %25 {offsets = [0, 0], sizes = [8, 256], strides = [1, 1]} : vector<8x258xf32> to vector<8x256xf32>
    %27 = vector.extract_strided_slice %25 {offsets = [0, 1], sizes = [8, 256], strides = [1, 1]} : vector<8x258xf32> to vector<8x256xf32>
    %28 = vector.extract_strided_slice %25 {offsets = [0, 2], sizes = [8, 256], strides = [1, 1]} : vector<8x258xf32> to vector<8x256xf32>
    %29 = tpu.concatenate %26, %27, %28 in 0 : vector<8x256xf32>, vector<8x256xf32>, vector<8x256xf32> -> vector<24x256xf32>
    %cst_15 = arith.constant dense<0.000000e+00> : vector<8x256xf32>
    %30 = tpu.matmul %22, %29, %cst_15 {dimension_numbers = #tpu.dot_dimension_numbers<[1], [0], [0], [1], [0, 0, 1, 1], [], []>} : vector<8x24xf32>, vector<24x256xf32>, vector<8x256xf32> -> vector<8x256xf32>
    %31 = vector.broadcast %23 : vector<8x1xf32> to vector<8x256xf32>
    %32 = arith.addf %30, %31 : vector<8x256xf32>
    %33 = arith.addf %32, %0 : vector<8x256xf32>
    %cst_16 = arith.constant 0.000000e+00 : f32
    %34 = vector.broadcast %cst_16 : f32 to vector<8x256xf32>
    %35 = arith.cmpf ogt, %33, %34 : vector<8x256xf32>
    %cst_17 = arith.constant 1.000000e-01 : f32
    %36 = vector.broadcast %cst_17 : f32 to vector<8x256xf32>
    %37 = arith.mulf %36, %33 : vector<8x256xf32>
    %38 = arith.select %35, %33, %37 : vector<8x256xi1>, vector<8x256xf32>
    %c0_18 = arith.constant 0 : index
    %c0_19 = arith.constant 0 : index
    %39 = vector.load %arg5[%c0_18, %c0_19] : memref<8x24xf32, #tpu.memory_space<vmem>>, vector<8x24xf32>
    %c0_20 = arith.constant 0 : index
    %c0_21 = arith.constant 0 : index
    %40 = vector.load %arg6[%c0_20, %c0_21] : memref<8x1xf32, #tpu.memory_space<vmem>>, vector<8x1xf32>
    %cst_22 = arith.constant 0.000000e+00 : f32
    %41 = vector.broadcast %cst_22 : f32 to vector<8x3xf32>
    %42 = tpu.concatenate %41, %38, %41 in 1 : vector<8x3xf32>, vector<8x256xf32>, vector<8x3xf32> -> vector<8x262xf32>
    %43 = vector.extract_strided_slice %42 {offsets = [0, 0], sizes = [8, 256], strides = [1, 1]} : vector<8x262xf32> to vector<8x256xf32>
    %44 = vector.extract_strided_slice %42 {offsets = [0, 3], sizes = [8, 256], strides = [1, 1]} : vector<8x262xf32> to vector<8x256xf32>
    %45 = vector.extract_strided_slice %42 {offsets = [0, 6], sizes = [8, 256], strides = [1, 1]} : vector<8x262xf32> to vector<8x256xf32>
    %46 = tpu.concatenate %43, %44, %45 in 0 : vector<8x256xf32>, vector<8x256xf32>, vector<8x256xf32> -> vector<24x256xf32>
    %cst_23 = arith.constant dense<0.000000e+00> : vector<8x256xf32>
    %47 = tpu.matmul %39, %46, %cst_23 {dimension_numbers = #tpu.dot_dimension_numbers<[1], [0], [0], [1], [0, 0, 1, 1], [], []>} : vector<8x24xf32>, vector<24x256xf32>, vector<8x256xf32> -> vector<8x256xf32>
    %48 = vector.broadcast %40 : vector<8x1xf32> to vector<8x256xf32>
    %49 = arith.addf %47, %48 : vector<8x256xf32>
    %cst_24 = arith.constant 0.000000e+00 : f32
    %50 = vector.broadcast %cst_24 : f32 to vector<8x256xf32>
    %51 = arith.cmpf ogt, %49, %50 : vector<8x256xf32>
    %cst_25 = arith.constant 1.000000e-01 : f32
    %52 = vector.broadcast %cst_25 : f32 to vector<8x256xf32>
    %53 = arith.mulf %52, %49 : vector<8x256xf32>
    %54 = arith.select %51, %49, %53 : vector<8x256xi1>, vector<8x256xf32>
    %c0_26 = arith.constant 0 : index
    %c0_27 = arith.constant 0 : index
    %55 = vector.load %arg7[%c0_26, %c0_27] : memref<8x24xf32, #tpu.memory_space<vmem>>, vector<8x24xf32>
    %c0_28 = arith.constant 0 : index
    %c0_29 = arith.constant 0 : index
    %56 = vector.load %arg8[%c0_28, %c0_29] : memref<8x1xf32, #tpu.memory_space<vmem>>, vector<8x1xf32>
    %cst_30 = arith.constant 0.000000e+00 : f32
    %57 = vector.broadcast %cst_30 : f32 to vector<8x1xf32>
    %58 = tpu.concatenate %57, %54, %57 in 1 : vector<8x1xf32>, vector<8x256xf32>, vector<8x1xf32> -> vector<8x258xf32>
    %59 = vector.extract_strided_slice %58 {offsets = [0, 0], sizes = [8, 256], strides = [1, 1]} : vector<8x258xf32> to vector<8x256xf32>
    %60 = vector.extract_strided_slice %58 {offsets = [0, 1], sizes = [8, 256], strides = [1, 1]} : vector<8x258xf32> to vector<8x256xf32>
    %61 = vector.extract_strided_slice %58 {offsets = [0, 2], sizes = [8, 256], strides = [1, 1]} : vector<8x258xf32> to vector<8x256xf32>
    %62 = tpu.concatenate %59, %60, %61 in 0 : vector<8x256xf32>, vector<8x256xf32>, vector<8x256xf32> -> vector<24x256xf32>
    %cst_31 = arith.constant dense<0.000000e+00> : vector<8x256xf32>
    %63 = tpu.matmul %55, %62, %cst_31 {dimension_numbers = #tpu.dot_dimension_numbers<[1], [0], [0], [1], [0, 0, 1, 1], [], []>} : vector<8x24xf32>, vector<24x256xf32>, vector<8x256xf32> -> vector<8x256xf32>
    %64 = vector.broadcast %56 : vector<8x1xf32> to vector<8x256xf32>
    %65 = arith.addf %63, %64 : vector<8x256xf32>
    %66 = arith.addf %65, %33 : vector<8x256xf32>
    %cst_32 = arith.constant 0.000000e+00 : f32
    %67 = vector.broadcast %cst_32 : f32 to vector<8x256xf32>
    %68 = arith.cmpf ogt, %0, %67 : vector<8x256xf32>
    %cst_33 = arith.constant 1.000000e-01 : f32
    %69 = vector.broadcast %cst_33 : f32 to vector<8x256xf32>
    %70 = arith.mulf %69, %0 : vector<8x256xf32>
    %71 = arith.select %68, %0, %70 : vector<8x256xi1>, vector<8x256xf32>
    %c0_34 = arith.constant 0 : index
    %c0_35 = arith.constant 0 : index
    %72 = vector.load %arg9[%c0_34, %c0_35] : memref<8x56xf32, #tpu.memory_space<vmem>>, vector<8x56xf32>
    %c0_36 = arith.constant 0 : index
    %c0_37 = arith.constant 0 : index
    %73 = vector.load %arg10[%c0_36, %c0_37] : memref<8x1xf32, #tpu.memory_space<vmem>>, vector<8x1xf32>
    %cst_38 = arith.constant 0.000000e+00 : f32
    %74 = vector.broadcast %cst_38 : f32 to vector<8x3xf32>
    %75 = tpu.concatenate %74, %71, %74 in 1 : vector<8x3xf32>, vector<8x256xf32>, vector<8x3xf32> -> vector<8x262xf32>
    %76 = vector.extract_strided_slice %75 {offsets = [0, 0], sizes = [8, 256], strides = [1, 1]} : vector<8x262xf32> to vector<8x256xf32>
    %77 = vector.extract_strided_slice %75 {offsets = [0, 1], sizes = [8, 256], strides = [1, 1]} : vector<8x262xf32> to vector<8x256xf32>
    %78 = vector.extract_strided_slice %75 {offsets = [0, 2], sizes = [8, 256], strides = [1, 1]} : vector<8x262xf32> to vector<8x256xf32>
    %79 = vector.extract_strided_slice %75 {offsets = [0, 3], sizes = [8, 256], strides = [1, 1]} : vector<8x262xf32> to vector<8x256xf32>
    %80 = vector.extract_strided_slice %75 {offsets = [0, 4], sizes = [8, 256], strides = [1, 1]} : vector<8x262xf32> to vector<8x256xf32>
    %81 = vector.extract_strided_slice %75 {offsets = [0, 5], sizes = [8, 256], strides = [1, 1]} : vector<8x262xf32> to vector<8x256xf32>
    %82 = vector.extract_strided_slice %75 {offsets = [0, 6], sizes = [8, 256], strides = [1, 1]} : vector<8x262xf32> to vector<8x256xf32>
    %83 = tpu.concatenate %76, %77, %78, %79, %80, %81, %82 in 0 : vector<8x256xf32>, vector<8x256xf32>, vector<8x256xf32>, vector<8x256xf32>, vector<8x256xf32>, vector<8x256xf32>, vector<8x256xf32> -> vector<56x256xf32>
    %cst_39 = arith.constant dense<0.000000e+00> : vector<8x256xf32>
    %84 = tpu.matmul %72, %83, %cst_39 {dimension_numbers = #tpu.dot_dimension_numbers<[1], [0], [0], [1], [0, 0, 1, 1], [], []>} : vector<8x56xf32>, vector<56x256xf32>, vector<8x256xf32> -> vector<8x256xf32>
    %85 = vector.broadcast %73 : vector<8x1xf32> to vector<8x256xf32>
    %86 = arith.addf %84, %85 : vector<8x256xf32>
    %cst_40 = arith.constant 0.000000e+00 : f32
    %87 = vector.broadcast %cst_40 : f32 to vector<8x256xf32>
    %88 = arith.cmpf ogt, %86, %87 : vector<8x256xf32>
    %cst_41 = arith.constant 1.000000e-01 : f32
    %89 = vector.broadcast %cst_41 : f32 to vector<8x256xf32>
    %90 = arith.mulf %89, %86 : vector<8x256xf32>
    %91 = arith.select %88, %86, %90 : vector<8x256xi1>, vector<8x256xf32>
    %c0_42 = arith.constant 0 : index
    %c0_43 = arith.constant 0 : index
    %92 = vector.load %arg11[%c0_42, %c0_43] : memref<8x56xf32, #tpu.memory_space<vmem>>, vector<8x56xf32>
    %c0_44 = arith.constant 0 : index
    %c0_45 = arith.constant 0 : index
    %93 = vector.load %arg12[%c0_44, %c0_45] : memref<8x1xf32, #tpu.memory_space<vmem>>, vector<8x1xf32>
    %cst_46 = arith.constant 0.000000e+00 : f32
    %94 = vector.broadcast %cst_46 : f32 to vector<8x3xf32>
    %95 = tpu.concatenate %94, %91, %94 in 1 : vector<8x3xf32>, vector<8x256xf32>, vector<8x3xf32> -> vector<8x262xf32>
    %96 = vector.extract_strided_slice %95 {offsets = [0, 0], sizes = [8, 256], strides = [1, 1]} : vector<8x262xf32> to vector<8x256xf32>
    %97 = vector.extract_strided_slice %95 {offsets = [0, 1], sizes = [8, 256], strides = [1, 1]} : vector<8x262xf32> to vector<8x256xf32>
    %98 = vector.extract_strided_slice %95 {offsets = [0, 2], sizes = [8, 256], strides = [1, 1]} : vector<8x262xf32> to vector<8x256xf32>
    %99 = vector.extract_strided_slice %95 {offsets = [0, 3], sizes = [8, 256], strides = [1, 1]} : vector<8x262xf32> to vector<8x256xf32>
    %100 = vector.extract_strided_slice %95 {offsets = [0, 4], sizes = [8, 256], strides = [1, 1]} : vector<8x262xf32> to vector<8x256xf32>
    %101 = vector.extract_strided_slice %95 {offsets = [0, 5], sizes = [8, 256], strides = [1, 1]} : vector<8x262xf32> to vector<8x256xf32>
    %102 = vector.extract_strided_slice %95 {offsets = [0, 6], sizes = [8, 256], strides = [1, 1]} : vector<8x262xf32> to vector<8x256xf32>
    %103 = tpu.concatenate %96, %97, %98, %99, %100, %101, %102 in 0 : vector<8x256xf32>, vector<8x256xf32>, vector<8x256xf32>, vector<8x256xf32>, vector<8x256xf32>, vector<8x256xf32>, vector<8x256xf32> -> vector<56x256xf32>
    %cst_47 = arith.constant dense<0.000000e+00> : vector<8x256xf32>
    %104 = tpu.matmul %92, %103, %cst_47 {dimension_numbers = #tpu.dot_dimension_numbers<[1], [0], [0], [1], [0, 0, 1, 1], [], []>} : vector<8x56xf32>, vector<56x256xf32>, vector<8x256xf32> -> vector<8x256xf32>
    %105 = vector.broadcast %93 : vector<8x1xf32> to vector<8x256xf32>
    %106 = arith.addf %104, %105 : vector<8x256xf32>
    %107 = arith.addf %106, %0 : vector<8x256xf32>
    %cst_48 = arith.constant 0.000000e+00 : f32
    %108 = vector.broadcast %cst_48 : f32 to vector<8x256xf32>
    %109 = arith.cmpf ogt, %107, %108 : vector<8x256xf32>
    %cst_49 = arith.constant 1.000000e-01 : f32
    %110 = vector.broadcast %cst_49 : f32 to vector<8x256xf32>
    %111 = arith.mulf %110, %107 : vector<8x256xf32>
    %112 = arith.select %109, %107, %111 : vector<8x256xi1>, vector<8x256xf32>
    %c0_50 = arith.constant 0 : index
    %c0_51 = arith.constant 0 : index
    %113 = vector.load %arg13[%c0_50, %c0_51] : memref<8x56xf32, #tpu.memory_space<vmem>>, vector<8x56xf32>
    %c0_52 = arith.constant 0 : index
    %c0_53 = arith.constant 0 : index
    %114 = vector.load %arg14[%c0_52, %c0_53] : memref<8x1xf32, #tpu.memory_space<vmem>>, vector<8x1xf32>
    %cst_54 = arith.constant 0.000000e+00 : f32
    %115 = vector.broadcast %cst_54 : f32 to vector<8x9xf32>
    %116 = tpu.concatenate %115, %112, %115 in 1 : vector<8x9xf32>, vector<8x256xf32>, vector<8x9xf32> -> vector<8x274xf32>
    %117 = vector.extract_strided_slice %116 {offsets = [0, 0], sizes = [8, 256], strides = [1, 1]} : vector<8x274xf32> to vector<8x256xf32>
    %118 = vector.extract_strided_slice %116 {offsets = [0, 3], sizes = [8, 256], strides = [1, 1]} : vector<8x274xf32> to vector<8x256xf32>
    %119 = vector.extract_strided_slice %116 {offsets = [0, 6], sizes = [8, 256], strides = [1, 1]} : vector<8x274xf32> to vector<8x256xf32>
    %120 = vector.extract_strided_slice %116 {offsets = [0, 9], sizes = [8, 256], strides = [1, 1]} : vector<8x274xf32> to vector<8x256xf32>
    %121 = vector.extract_strided_slice %116 {offsets = [0, 12], sizes = [8, 256], strides = [1, 1]} : vector<8x274xf32> to vector<8x256xf32>
    %122 = vector.extract_strided_slice %116 {offsets = [0, 15], sizes = [8, 256], strides = [1, 1]} : vector<8x274xf32> to vector<8x256xf32>
    %123 = vector.extract_strided_slice %116 {offsets = [0, 18], sizes = [8, 256], strides = [1, 1]} : vector<8x274xf32> to vector<8x256xf32>
    %124 = tpu.concatenate %117, %118, %119, %120, %121, %122, %123 in 0 : vector<8x256xf32>, vector<8x256xf32>, vector<8x256xf32>, vector<8x256xf32>, vector<8x256xf32>, vector<8x256xf32>, vector<8x256xf32> -> vector<56x256xf32>
    %cst_55 = arith.constant dense<0.000000e+00> : vector<8x256xf32>
    %125 = tpu.matmul %113, %124, %cst_55 {dimension_numbers = #tpu.dot_dimension_numbers<[1], [0], [0], [1], [0, 0, 1, 1], [], []>} : vector<8x56xf32>, vector<56x256xf32>, vector<8x256xf32> -> vector<8x256xf32>
    %126 = vector.broadcast %114 : vector<8x1xf32> to vector<8x256xf32>
    %127 = arith.addf %125, %126 : vector<8x256xf32>
    %cst_56 = arith.constant 0.000000e+00 : f32
    %128 = vector.broadcast %cst_56 : f32 to vector<8x256xf32>
    %129 = arith.cmpf ogt, %127, %128 : vector<8x256xf32>
    %cst_57 = arith.constant 1.000000e-01 : f32
    %130 = vector.broadcast %cst_57 : f32 to vector<8x256xf32>
    %131 = arith.mulf %130, %127 : vector<8x256xf32>
    %132 = arith.select %129, %127, %131 : vector<8x256xi1>, vector<8x256xf32>
    %c0_58 = arith.constant 0 : index
    %c0_59 = arith.constant 0 : index
    %133 = vector.load %arg15[%c0_58, %c0_59] : memref<8x56xf32, #tpu.memory_space<vmem>>, vector<8x56xf32>
    %c0_60 = arith.constant 0 : index
    %c0_61 = arith.constant 0 : index
    %134 = vector.load %arg16[%c0_60, %c0_61] : memref<8x1xf32, #tpu.memory_space<vmem>>, vector<8x1xf32>
    %cst_62 = arith.constant 0.000000e+00 : f32
    %135 = vector.broadcast %cst_62 : f32 to vector<8x3xf32>
    %136 = tpu.concatenate %135, %132, %135 in 1 : vector<8x3xf32>, vector<8x256xf32>, vector<8x3xf32> -> vector<8x262xf32>
    %137 = vector.extract_strided_slice %136 {offsets = [0, 0], sizes = [8, 256], strides = [1, 1]} : vector<8x262xf32> to vector<8x256xf32>
    %138 = vector.extract_strided_slice %136 {offsets = [0, 1], sizes = [8, 256], strides = [1, 1]} : vector<8x262xf32> to vector<8x256xf32>
    %139 = vector.extract_strided_slice %136 {offsets = [0, 2], sizes = [8, 256], strides = [1, 1]} : vector<8x262xf32> to vector<8x256xf32>
    %140 = vector.extract_strided_slice %136 {offsets = [0, 3], sizes = [8, 256], strides = [1, 1]} : vector<8x262xf32> to vector<8x256xf32>
    %141 = vector.extract_strided_slice %136 {offsets = [0, 4], sizes = [8, 256], strides = [1, 1]} : vector<8x262xf32> to vector<8x256xf32>
    %142 = vector.extract_strided_slice %136 {offsets = [0, 5], sizes = [8, 256], strides = [1, 1]} : vector<8x262xf32> to vector<8x256xf32>
    %143 = vector.extract_strided_slice %136 {offsets = [0, 6], sizes = [8, 256], strides = [1, 1]} : vector<8x262xf32> to vector<8x256xf32>
    %144 = tpu.concatenate %137, %138, %139, %140, %141, %142, %143 in 0 : vector<8x256xf32>, vector<8x256xf32>, vector<8x256xf32>, vector<8x256xf32>, vector<8x256xf32>, vector<8x256xf32>, vector<8x256xf32> -> vector<56x256xf32>
    %cst_63 = arith.constant dense<0.000000e+00> : vector<8x256xf32>
    %145 = tpu.matmul %133, %144, %cst_63 {dimension_numbers = #tpu.dot_dimension_numbers<[1], [0], [0], [1], [0, 0, 1, 1], [], []>} : vector<8x56xf32>, vector<56x256xf32>, vector<8x256xf32> -> vector<8x256xf32>
    %146 = vector.broadcast %134 : vector<8x1xf32> to vector<8x256xf32>
    %147 = arith.addf %145, %146 : vector<8x256xf32>
    %148 = arith.addf %147, %107 : vector<8x256xf32>
    %149 = arith.addf %66, %148 : vector<8x256xf32>
    %cst_64 = arith.constant 5.000000e-01 : f32
    %150 = vector.broadcast %cst_64 : f32 to vector<8x256xf32>
    %151 = arith.mulf %149, %150 : vector<8x256xf32>
    %cst_65 = arith.constant 0.000000e+00 : f32
    %152 = vector.broadcast %cst_65 : f32 to vector<8x256xf32>
    %153 = arith.cmpf ogt, %151, %152 : vector<8x256xf32>
    %cst_66 = arith.constant 0.00999999977 : f32
    %154 = vector.broadcast %cst_66 : f32 to vector<8x256xf32>
    %155 = arith.mulf %154, %151 : vector<8x256xf32>
    %156 = arith.select %153, %151, %155 : vector<8x256xi1>, vector<8x256xf32>
    %c0_67 = arith.constant 0 : index
    %c0_68 = arith.constant 0 : index
    %157 = vector.load %arg17[%c0_67, %c0_68] : memref<1x56xf32, #tpu.memory_space<vmem>>, vector<1x56xf32>
    %c0_69 = arith.constant 0 : index
    %c0_70 = arith.constant 0 : index
    %158 = vector.load %arg18[%c0_69, %c0_70] : memref<1x1xf32, #tpu.memory_space<vmem>>, vector<1x1xf32>
    %cst_71 = arith.constant 0.000000e+00 : f32
    %159 = vector.broadcast %cst_71 : f32 to vector<8x3xf32>
    %160 = tpu.concatenate %159, %156, %159 in 1 : vector<8x3xf32>, vector<8x256xf32>, vector<8x3xf32> -> vector<8x262xf32>
    %161 = vector.extract_strided_slice %160 {offsets = [0, 0], sizes = [8, 256], strides = [1, 1]} : vector<8x262xf32> to vector<8x256xf32>
    %162 = vector.extract_strided_slice %160 {offsets = [0, 1], sizes = [8, 256], strides = [1, 1]} : vector<8x262xf32> to vector<8x256xf32>
    %163 = vector.extract_strided_slice %160 {offsets = [0, 2], sizes = [8, 256], strides = [1, 1]} : vector<8x262xf32> to vector<8x256xf32>
    %164 = vector.extract_strided_slice %160 {offsets = [0, 3], sizes = [8, 256], strides = [1, 1]} : vector<8x262xf32> to vector<8x256xf32>
    %165 = vector.extract_strided_slice %160 {offsets = [0, 4], sizes = [8, 256], strides = [1, 1]} : vector<8x262xf32> to vector<8x256xf32>
    %166 = vector.extract_strided_slice %160 {offsets = [0, 5], sizes = [8, 256], strides = [1, 1]} : vector<8x262xf32> to vector<8x256xf32>
    %167 = vector.extract_strided_slice %160 {offsets = [0, 6], sizes = [8, 256], strides = [1, 1]} : vector<8x262xf32> to vector<8x256xf32>
    %168 = tpu.concatenate %161, %162, %163, %164, %165, %166, %167 in 0 : vector<8x256xf32>, vector<8x256xf32>, vector<8x256xf32>, vector<8x256xf32>, vector<8x256xf32>, vector<8x256xf32>, vector<8x256xf32> -> vector<56x256xf32>
    %cst_72 = arith.constant dense<0.000000e+00> : vector<1x256xf32>
    %169 = tpu.matmul %157, %168, %cst_72 {dimension_numbers = #tpu.dot_dimension_numbers<[1], [0], [0], [1], [0, 0, 1, 1], [], []>} : vector<1x56xf32>, vector<56x256xf32>, vector<1x256xf32> -> vector<1x256xf32>
    %170 = vector.broadcast %158 : vector<1x1xf32> to vector<1x256xf32>
    %171 = arith.addf %169, %170 : vector<1x256xf32>
    %172 = math.tanh %171 : vector<1x256xf32>
    %c0_73 = arith.constant 0 : index
    %c0_74 = arith.constant 0 : index
    %173 = vector.load %arg19[%c0_73, %c0_74] : memref<1x256xf32, #tpu.memory_space<vmem>>, vector<1x256xf32>
    tpu.vector_store %arg19[%c0_73, %c0_74], %172 {strides = array<i32>} : memref<1x256xf32, #tpu.memory_space<vmem>>, vector<1x256xf32>,
    return
  }
}

</mosaic_0001>

<bundles_post_ra>
// kernel: forward.3
= control target key start
LH: loop header
LB: loop body
LE: loop exit
PB: predicated region body
PF: predicated region fallthrough
CT: control target
= control target key end

     0   :  { %s1550_s9 = smov 3   ;;  %vm94_vm0 = vcmask 23552   ;;  %vm105_vm1 = vcmask 89088   ;;  %s1552_s14 = smov 124   ;;  %v1557_v62 = vmov 0   ;;  %vm326_vm3 = vcmask 392192   ;;  %s2012_s0 = inlined_call_operand.vmem [shape: f32[80,8], index: 0, kind: input, shape index: {}]   ;;  %s2013_s1 = inlined_call_operand.vmem [shape: f32[32,560], index: 1, kind: input, shape index: {}]   ;;  %s2014_s2 = inlined_call_operand.vmem [shape: f32[32,1], index: 2, kind: input, shape index: {}]   ;;  %s2015_s4 = inlined_call_operand.vmem [shape: f32[128,1], index: 4, kind: input, shape index: {}]   ;;  %s2016_s3 = inlined_call_operand.vmem [shape: f32[128,96], index: 3, kind: input, shape index: {}]   ;;  %s2017_s5 = inlined_call_operand.vmem [shape: f32[128,8], index: 5, kind: output, shape index: {}]  }
   0x1   :  { %v26_v0 = vld [vmem:[%s2012_s0 + $0x30] sm:$0xff]  ;;  %v27_v1 = vld [vmem:[%s2012_s0 + $0x38] sm:$0xff]  ;;  %v28_v2 = vld [vmem:[%s2012_s0 + $0x40] sm:$0xff]  ;;  %s1553_s15 = smov 125   ;;  %s1554_s16 = smov 126   ;;  %1518 = vset.pattern.permute.xlu1 %v1557_v62  ;;  %1519 = vset.pattern.permute.xlu0 %v1557_v62  ;;  %vm654_vm8 = vcmask 7168  }
   0x2   :  { %v1343_v3 = vpack.i.bf16 %v27_v1, %v26_v0  ;;  %v29_v4 = vld [vmem:[%s2012_s0 + $0x48] sm:$0xff]  ;;  %v22_v5 = vld [vmem:[%s2012_s0 + $0x10] sm:$0xff]  ;;  %v23_v6 = vld [vmem:[%s2012_s0 + $0x18] sm:$0xff]  ;;  %s1555_s17 = smov 123   ;;  %s1556_s20 = smov 122   ;;  %vm659_vm9 = vcmask 72704  }
   0x3   :  { %v1353_v7 = vpack.i.bf16 %v23_v6, %v22_v5  ;;  %v20_v8 = vld [vmem:[%s2012_s0] sm:$0xff]  ;;  %v21_v9 = vld [vmem:[%s2012_s0 + $0x8] sm:$0xff]  ;;  %v1348_v10 = vpack.i.bf16 %v29_v4, %v28_v2  ;;  %v33_v61 = vld [vmem:[%s2013_s1 + $0x18] sm:$0xff]  ;;  %vm772_vm11 = vcmask 785408   ;;  %vm966_vm12 = vcmask 64512  }
   0x4   :  { %1344 = vrot.lane.b32.xlu0 %v1343_v3, %s1550_s9  ;;  %v1358_v11 = vpack.i.bf16 %v21_v9, %v20_v8  ;;  %v24_v12 = vld [vmem:[%s2012_s0 + $0x20] sm:$0xff]  ;;  %v25_v13 = vld [vmem:[%s2012_s0 + $0x28] sm:$0xff]  ;;  %s1551_s0 = smov 127   ;;  %488 = vmatprep.mubr.f32.mxu1 %v33_v61  ;;  %v52_v1 = vld [vmem:[%s2014_s2 + $0x10] sm:$0xff] }
   0x5   :  { %1354 = vrot.lane.b32.xlu1 %v1353_v7, %s1550_s9  ;;  %v1363_v14 = vpack.i.bf16 %v25_v13, %v24_v12  ;;  %v31_v60 = vld [vmem:[%s2013_s1 + $0x8] sm:$0xff]  ;;  %v50_v63 = vld [vmem:[%s2014_s2] sm:$0xff]  ;;  %v53_v2 = vld [vmem:[%s2014_s2 + $0x18] sm:$0xff] }
   0x6   :  { %403 = vmatprep.mubr.f32.mxu0 %v31_v60  ;;  %v51_v0 = vld [vmem:[%s2014_s2 + $0x8] sm:$0xff]  ;;  %vm1722_vm2 = vmpackc.low %vm105_vm1, %vm105_vm1 }
   0x7   :  { %vm1806_vm10 = vmpackc.low %vm659_vm9, %vm659_vm9 }
   0x8   :  { %1349 = vrot.lane.b32.xlu0 %v1348_v10, %s1550_s9 }
   0x9   :  { %1359 = vrot.lane.b32.xlu1 %v1358_v11, %s1550_s9 }
   0xc   :  { %1364 = vrot.lane.b32.xlu0 %v1363_v14, %s1550_s9 }
  0x76   :  { %v1345_v15 = vpop.permute.xlu0 %1344 }
  0x77   :  { %v1347_v16 = vunpack.i.h.bf16 %v1345_v15  ;;  %v1346_v17 = vunpack.i.l.bf16 %v1345_v15  ;;  %v1355_v18 = vpop.permute.xlu1 %1354 }
  0x78   :  { %v1357_v19 = vunpack.i.h.bf16 %v1355_v18  ;;  %v1356_v20 = vunpack.i.l.bf16 %v1355_v18 }
  0x79   :  { %v1620_v21 = vsel %vm94_vm0, 0.0, %v1347_v16  ;;  %v1623_v22 = vsel %vm94_vm0, 0.0, %v1346_v17 }
  0x7a   :  { %v113_v23 = vsel %vm105_vm1, %v1620_v21, 0.0  ;;  %v112_v24 = vsel %vm105_vm1, %v1623_v22, 0.0  ;;  %v1230_v25 = vpack.c.bf16 %v1620_v21, %v1623_v22  ;;  %v1350_v26 = vpop.permute.xlu0 %1349  ;;  %v1632_v27 = vsel %vm94_vm0, 0.0, %v1357_v19 }
  0x7b   :  { %v1352_v28 = vunpack.i.h.bf16 %v1350_v26  ;;  %v1351_v29 = vunpack.i.l.bf16 %v1350_v26  ;;  %v1635_v30 = vsel %vm94_vm0, 0.0, %v1356_v20  ;;  %v1360_v31 = vpop.permute.xlu1 %1359  ;;  %v1639_v33 = vpack.i.bf16 %v113_v23, %v112_v24 }
  0x7c   :  { %v1220_v32 = vpack.c.bf16 %v1632_v27, %v1635_v30  ;;  %v1362_v34 = vunpack.i.h.bf16 %v1360_v31  ;;  %v109_v37 = vsel %vm105_vm1, %v1632_v27, 0.0  ;;  %v1361_v38 = vunpack.i.l.bf16 %v1360_v31 }
  0x7d   :  { %v1642_v35 = vsel %vm94_vm0, 0.0, %v1352_v28  ;;  %v1645_v36 = vsel %vm94_vm0, 0.0, %v1351_v29  ;;  %1369 = vrot.lane.b32.xlu1 %v1639_v33, %s1551_s0  ;;  %v108_v47 = vsel %vm105_vm1, %v1635_v30, 0.0 }
  0x7e   :  { %v115_v39 = vsel %vm105_vm1, %v1642_v35, 0.0  ;;  %v114_v40 = vsel %vm105_vm1, %v1645_v36, 0.0  ;;  %v1235_v41 = vpack.c.bf16 %v1642_v35, %v1645_v36  ;;  %v1658_v42 = vsel %vm94_vm0, 0.0, %v1362_v34  ;;  %v1365_v43 = vpop.permute.xlu0 %1364 }
  0x7f   :  { %v107_v44 = vsel %vm105_vm1, %v1658_v42, 0.0  ;;  %v1663_v45 = vsel %vm94_vm0, 0.0, %v1361_v38  ;;  %v1373_v46 = vpack.i.bf16 %v115_v39, %v114_v40  ;;  %v1367_v49 = vunpack.i.h.bf16 %v1365_v43 }
  0x80   :  { %v106_v48 = vsel %vm105_vm1, %v1663_v45, 0.0  ;;  %v1366_v50 = vunpack.i.l.bf16 %v1365_v43  ;;  %v1383_v57 = vpack.i.bf16 %v109_v37, %v108_v47  ;;  %v1215_v59 = vpack.c.bf16 %v1658_v42, %v1663_v45 }
  0x81   :  { %1374 = vrot.lane.b32.xlu0 %v1373_v46, %s1551_s0  ;;  %1379 = vrot.lane.b32.xlu1 %v1373_v46, %s1552_s14  ;;  %v1672_v51 = vsel %vm94_vm0, 0.0, %v1367_v49  ;;  %v1388_v53 = vpack.i.bf16 %v107_v44, %v106_v48 }
  0x82   :  { %v1675_v52 = vsel %vm94_vm0, 0.0, %v1366_v50  ;;  %v111_v54 = vsel %vm105_vm1, %v1672_v51, 0.0 }
  0x83   :  { %v110_v55 = vsel %vm105_vm1, %v1675_v52, 0.0  ;;  %v1225_v56 = vpack.c.bf16 %v1672_v51, %v1675_v52 }
  0x84   :  { %v1398_v58 = vpack.i.bf16 %v111_v54, %v110_v55 }
  0x85   :  { %1384 = vrot.lane.b32.xlu0 %v1383_v57, %s1553_s15  ;;  %1389 = vrot.lane.b32.xlu1 %v1388_v53, %s1554_s16 }
  0x89   :  { %1394 = vrot.lane.b32.xlu0 %v1388_v53, %s1555_s17  ;;  %1399 = vrot.lane.b32.xlu1 %v1398_v58, %s1553_s15 }
  0x8d   :  { %1404 = vrot.lane.b32.xlu0 %v1383_v57, %s1554_s16  ;;  %1409 = vrot.lane.b32.xlu1 %v1383_v57, %s1555_s17 }
  0x91   :  { %1414 = vrot.lane.b32.xlu0 %v1639_v33, %s1553_s15  ;;  %1419 = vrot.lane.b32.xlu1 %v1398_v58, %s1554_s16 }
  0x95   :  { %1424 = vrot.lane.b32.xlu0 %v1398_v58, %s1555_s17  ;;  %1429 = vrot.lane.b32.xlu1 %v1373_v46, %s1553_s15 }
  0x99   :  { %1434 = vrot.lane.b32.xlu0 %v1639_v33, %s1554_s16  ;;  %1439 = vrot.lane.b32.xlu1 %v1639_v33, %s1555_s17 }
  0x9d   :  { %1444 = vrot.lane.b32.xlu0 %v1388_v53, %s1551_s0  ;;  %1449 = vrot.lane.b32.xlu1 %v1388_v53, %s1552_s14 }
  0xa1   :  { %1454 = vrot.lane.b32.xlu0 %v1373_v46, %s1554_s16  ;;  %1459 = vrot.lane.b32.xlu1 %v1373_v46, %s1555_s17 }
  0xa5   :  { %1464 = vrot.lane.b32.xlu0 %v1383_v57, %s1551_s0  ;;  %1469 = vrot.lane.b32.xlu1 %v1383_v57, %s1552_s14 }
  0xa9   :  { %1474 = vrot.lane.b32.xlu0 %v1388_v53, %s1553_s15  ;;  %1479 = vrot.lane.b32.xlu1 %v1388_v53, %s1556_s20 }
  0xad   :  { %1484 = vrot.lane.b32.xlu0 %v1398_v58, %s1551_s0  ;;  %1489 = vrot.lane.b32.xlu1 %v1398_v58, %s1552_s14 }
  0xb1   :  { %1494 = vrot.lane.b32.xlu0 %v1383_v57, %s1556_s20  ;;  %1499 = vrot.lane.b32.xlu1 %v1639_v33, %s1552_s14 }
  0xb5   :  { %1504 = vrot.lane.b32.xlu0 %v1398_v58, %s1556_s20  ;;  %1509 = vrot.lane.b32.xlu1 %v1639_v33, %s1556_s20 }
  0xb9   :  { %1514 = vrot.lane.b32.xlu0 %v1373_v46, %s1556_s20  ;;  %308 = vperm.xlu1 %1518, %v50_v63  }
  0xbd   :  { %313 = vperm.xlu0 %1519, %v51_v0   ;;  %318 = vperm.xlu1 %1518, %v52_v1  }
  0xc1   :  { %323 = vperm.xlu1 %1518, %v53_v2  }
  0xef   :  { %v1370_v3 = vpop.permute.xlu1 %1369 }
  0xf0   :  { %v1372_v4 = vunpack.i.h.bf16 %v1370_v3  ;;  %v1371_v5 = vunpack.i.l.bf16 %v1370_v3 }
  0xf2   :  { %v1213_v7 = vpack.c.bf16 %v1372_v4, %v1371_v5 }
  0xf3   :  { %v1375_v6 = vpop.permute.xlu0 %1374  ;;  %v1380_v11 = vpop.permute.xlu1 %1379 }
  0xf4   :  { %v1377_v9 = vunpack.i.h.bf16 %v1375_v6  ;;  %v1376_v10 = vunpack.i.l.bf16 %v1375_v6  ;;  %v1382_v12 = vunpack.i.h.bf16 %v1380_v11  ;;  %v1381_v13 = vunpack.i.l.bf16 %v1380_v11  ;;  %1214 = vmatprep.subr.bf16.mxu0 %v1213_v7 }
  0xf5   :  { %1217 = vmatpush3.bf16.msk.msra.mxu0 %vm1722_vm2, %v1215_v59 }
  0xf6   :  { %v1218_v14 = vpack.c.bf16 %v1377_v9, %v1376_v10  ;;  %v1250_v16 = vpack.c.bf16 %v1382_v12, %v1381_v13 }
  0xf7   :  { %v1385_v15 = vpop.permute.xlu0 %1384  ;;  %v1390_v19 = vpop.permute.xlu1 %1389 }
  0xf8   :  { %v1387_v17 = vunpack.i.h.bf16 %v1385_v15  ;;  %v1386_v18 = vunpack.i.l.bf16 %v1385_v15  ;;  %1219 = vmatprep.subr.bf16.mxu0 %v1218_v14  ;;  %v1392_v20 = vunpack.i.h.bf16 %v1390_v19  ;;  %v1391_v23 = vunpack.i.l.bf16 %v1390_v19  ;;  %1251 = vmatprep.subr.bf16.mxu1 %v1250_v16 }
  0xf9   :  { %1222 = vmatpush3.bf16.msk.msra.mxu0 %vm1722_vm2, %v1220_v32 }
  0xfa   :  { %v1252_v24 = vpack.c.bf16 %v1387_v17, %v1386_v18  ;;  %v1223_v26 = vpack.c.bf16 %v1392_v20, %v1391_v23 }
  0xfb   :  { %v1395_v28 = vpop.permute.xlu0 %1394  ;;  %v1400_v33 = vpop.permute.xlu1 %1399 }
  0xfc   :  { %v1397_v29 = vunpack.i.h.bf16 %v1395_v28  ;;  %v1396_v31 = vunpack.i.l.bf16 %v1395_v28  ;;  %1253 = vmatpush3.bf16.msra.mxu1 %v1252_v24  ;;  %v1402_v34 = vunpack.i.h.bf16 %v1400_v33  ;;  %v1401_v37 = vunpack.i.l.bf16 %v1400_v33  ;;  %1224 = vmatprep.subr.bf16.mxu0 %v1223_v26 }
  0xfd   :  { %1227 = vmatpush3.bf16.msk.msra.mxu0 %vm1722_vm2, %v1225_v56 }
  0xfe   :  { %v1254_v38 = vpack.c.bf16 %v1397_v29, %v1396_v31  ;;  %v1256_v27 = vpack.c.bf16 %v1402_v34, %v1401_v37 }
  0xff   :  { %v1405_v30 = vpop.permute.xlu0 %1404  ;;  %v1410_v40 = vpop.permute.xlu1 %1409 }
 0x100   :  { %v1407_v32 = vunpack.i.h.bf16 %v1405_v30  ;;  %v1406_v39 = vunpack.i.l.bf16 %v1405_v30  ;;  %1255 = vmatprep.subr.bf16.mxu1 %v1254_v38  ;;  %v1412_v42 = vunpack.i.h.bf16 %v1410_v40  ;;  %v1411_v43 = vunpack.i.l.bf16 %v1410_v40 }
 0x101   :  { %1257 = vmatpush3.bf16.msra.mxu1 %v1256_v27 }
 0x102   :  { %v1228_v44 = vpack.c.bf16 %v1407_v32, %v1406_v39  ;;  %v1258_v45 = vpack.c.bf16 %v1412_v42, %v1411_v43 }
 0x103   :  { %v1415_v46 = vpop.permute.xlu0 %1414  ;;  %v1420_v49 = vpop.permute.xlu1 %1419 }
 0x104   :  { %v1417_v47 = vunpack.i.h.bf16 %v1415_v46  ;;  %v1416_v48 = vunpack.i.l.bf16 %v1415_v46  ;;  %1229 = vmatprep.subr.bf16.mxu0 %v1228_v44  ;;  %v1422_v50 = vunpack.i.h.bf16 %v1420_v49  ;;  %v1421_v51 = vunpack.i.l.bf16 %v1420_v49  ;;  %1259 = vmatprep.subr.bf16.mxu1 %v1258_v45 }
 0x105   :  { %1232 = vmatpush3.bf16.msk.msra.mxu0 %vm1722_vm2, %v1230_v25 }
 0x106   :  { %v1260_v52 = vpack.c.bf16 %v1417_v47, %v1416_v48  ;;  %v1233_v53 = vpack.c.bf16 %v1422_v50, %v1421_v51  ;;  %v30_v50 = vld [vmem:[%s2013_s1] sm:$0xff] }
 0x107   :  { %v1425_v54 = vpop.permute.xlu0 %1424  ;;  %v1430_v57 = vpop.permute.xlu1 %1429 }
 0x108   :  { %v1427_v55 = vunpack.i.h.bf16 %v1425_v54  ;;  %v1426_v56 = vunpack.i.l.bf16 %v1425_v54  ;;  %1261 = vmatpush3.bf16.msra.mxu1 %v1260_v52  ;;  %v1432_v58 = vunpack.i.h.bf16 %v1430_v57  ;;  %v1431_v59 = vunpack.i.l.bf16 %v1430_v57  ;;  %1234 = vmatprep.subr.bf16.mxu0 %v1233_v53  ;;  %v36_v53 = vld [vmem:[%s2013_s1 + $0x30] sm:$0xff] }
 0x109   :  { %1237 = vmatpush3.bf16.msk.msra.mxu0 %vm1722_vm2, %v1235_v41 }
 0x10a   :  { %v1262_v60 = vpack.c.bf16 %v1427_v55, %v1426_v56  ;;  %v1264_v21 = vpack.c.bf16 %v1432_v58, %v1431_v59 }
 0x10b   :  { %v1435_v22 = vpop.permute.xlu0 %1434  ;;  %v1440_v62 = vpop.permute.xlu1 %1439 }
 0x10c   :  { %v1437_v25 = vunpack.i.h.bf16 %v1435_v22  ;;  %v1436_v61 = vunpack.i.l.bf16 %v1435_v22  ;;  %1263 = vmatprep.subr.bf16.mxu1 %v1262_v60  ;;  %v1442_v63 = vunpack.i.h.bf16 %v1440_v62  ;;  %v1441_v0 = vunpack.i.l.bf16 %v1440_v62  ;;  %v35_v60 = vld [vmem:[%s2013_s1 + $0x28] sm:$0xff]  ;;  %v41_v62 = vld [vmem:[%s2013_s1 + $0x58] sm:$0xff] }
 0x10d   :  { %1265 = vmatpush3.bf16.msra.mxu1 %v1264_v21 }
 0x10e   :  { %v1238_v1 = vpack.c.bf16 %v1437_v25, %v1436_v61  ;;  %v1266_v2 = vpack.c.bf16 %v1442_v63, %v1441_v0  ;;  %v32_v25 = vld [vmem:[%s2013_s1 + $0x10] sm:$0xff]  ;;  %v38_v0 = vld [vmem:[%s2013_s1 + $0x40] sm:$0xff] }
 0x10f   :  { %v1445_v3 = vpop.permute.xlu0 %1444  ;;  %v1450_v6 = vpop.permute.xlu1 %1449 }
 0x110   :  { %v1447_v4 = vunpack.i.h.bf16 %v1445_v3  ;;  %v1446_v5 = vunpack.i.l.bf16 %v1445_v3  ;;  %1239 = vmatprep.subr.bf16.mxu0 %v1238_v1  ;;  %v1452_v35 = vunpack.i.h.bf16 %v1450_v6  ;;  %v1451_v36 = vunpack.i.l.bf16 %v1450_v6  ;;  %1267 = vmatprep.subr.bf16.mxu1 %v1266_v2  ;;  %v46_v6 = vld [vmem:[%s2013_s1 + $0x80] sm:$0xff] }
 0x112   :  { %v1240_v41 = vpack.c.bf16 %v1447_v4, %v1446_v5  ;;  %v1268_v7 = vpack.c.bf16 %v1452_v35, %v1451_v36  ;;  %v40_v4 = vld [vmem:[%s2013_s1 + $0x50] sm:$0xff]  ;;  %v37_v5 = vld [vmem:[%s2013_s1 + $0x38] sm:$0xff]  ;;  %v43_v35 = vld [vmem:[%s2013_s1 + $0x68] sm:$0xff] }
 0x113   :  { %v1455_v8 = vpop.permute.xlu0 %1454  ;;  %v1460_v11 = vpop.permute.xlu1 %1459 }
 0x114   :  { %v1457_v9 = vunpack.i.h.bf16 %v1455_v8  ;;  %v1456_v10 = vunpack.i.l.bf16 %v1455_v8  ;;  %1241 = vmatpush3.bf16.msra.mxu0 %v1240_v41  ;;  %v1462_v12 = vunpack.i.h.bf16 %v1460_v11  ;;  %v1461_v13 = vunpack.i.l.bf16 %v1460_v11  ;;  %1269 = vmatpush3.bf16.msra.mxu1 %v1268_v7  ;;  %v45_v41 = vld [vmem:[%s2013_s1 + $0x78] sm:$0xff]  ;;  %v42_v7 = vld [vmem:[%s2013_s1 + $0x60] sm:$0xff]  ;;  %v39_v11 = vld [vmem:[%s2013_s1 + $0x48] sm:$0xff] }
 0x115   :  { %v34_v8 = vld [vmem:[%s2013_s1 + $0x20] sm:$0xff] }
 0x116   :  { %v1242_v14 = vpack.c.bf16 %v1457_v9, %v1456_v10  ;;  %v1270_v15 = vpack.c.bf16 %v1462_v12, %v1461_v13  ;;  %v48_v9 = vld [vmem:[%s2013_s1 + $0x90] sm:$0xff]  ;;  %v47_v10 = vld [vmem:[%s2013_s1 + $0x88] sm:$0xff]  ;;  %v49_v13 = vld [vmem:[%s2013_s1 + $0x98] sm:$0xff] }
 0x117   :  { %v1465_v16 = vpop.permute.xlu0 %1464  ;;  %v1470_v19 = vpop.permute.xlu1 %1469  ;;  %v44_v12 = vld [vmem:[%s2013_s1 + $0x70] sm:$0xff]  ;;  %s1558_s1 = smov 1  }
 0x118   :  { %v1467_v17 = vunpack.i.h.bf16 %v1465_v16  ;;  %v1466_v18 = vunpack.i.l.bf16 %v1465_v16  ;;  %1243 = vmatprep.subr.bf16.mxu0 %v1242_v14  ;;  %v1472_v20 = vunpack.i.h.bf16 %v1470_v19  ;;  %v1471_v23 = vunpack.i.l.bf16 %v1470_v19  ;;  %1271 = vmatprep.subr.bf16.mxu1 %v1270_v15 }
 0x11a   :  { %v1244_v24 = vpack.c.bf16 %v1467_v17, %v1466_v18  ;;  %v1272_v26 = vpack.c.bf16 %v1472_v20, %v1471_v23 }
 0x11b   :  { %v1475_v28 = vpop.permute.xlu0 %1474  ;;  %v1480_v33 = vpop.permute.xlu1 %1479 }
 0x11c   :  { %v1477_v29 = vunpack.i.h.bf16 %v1475_v28  ;;  %v1476_v31 = vunpack.i.l.bf16 %v1475_v28  ;;  %1245 = vmatpush3.bf16.msra.mxu0 %v1244_v24  ;;  %v1482_v34 = vunpack.i.h.bf16 %v1480_v33  ;;  %v1481_v37 = vunpack.i.l.bf16 %v1480_v33  ;;  %1273 = vmatpush3.bf16.msra.mxu1 %v1272_v26 }
 0x11e   :  { %v1246_v38 = vpack.c.bf16 %v1477_v29, %v1476_v31  ;;  %v1274_v27 = vpack.c.bf16 %v1482_v34, %v1481_v37 }
 0x11f   :  { %v1485_v30 = vpop.permute.xlu0 %1484  ;;  %v1490_v40 = vpop.permute.xlu1 %1489 }
 0x120   :  { %v1487_v32 = vunpack.i.h.bf16 %v1485_v30  ;;  %v1486_v39 = vunpack.i.l.bf16 %v1485_v30  ;;  %1247 = vmatprep.subr.bf16.mxu0 %v1246_v38  ;;  %v1492_v42 = vunpack.i.h.bf16 %v1490_v40  ;;  %v1491_v43 = vunpack.i.l.bf16 %v1490_v40  ;;  %1275 = vmatprep.subr.bf16.mxu1 %v1274_v27 }
 0x122   :  { %v1248_v44 = vpack.c.bf16 %v1487_v32, %v1486_v39  ;;  %v1276_v45 = vpack.c.bf16 %v1492_v42, %v1491_v43 }
 0x123   :  { %v1495_v46 = vpop.permute.xlu0 %1494  ;;  %v1500_v49 = vpop.permute.xlu1 %1499 }
 0x124   :  { %v1497_v47 = vunpack.i.h.bf16 %v1495_v46  ;;  %v1496_v48 = vunpack.i.l.bf16 %v1495_v46  ;;  %1249 = vmatpush3.bf16.msra.mxu0 %v1248_v44  ;;  %v1502_v51 = vunpack.i.h.bf16 %v1500_v49  ;;  %v1501_v52 = vunpack.i.l.bf16 %v1500_v49  ;;  %1277 = vmatpush3.bf16.msra.mxu1 %v1276_v45 }
 0x126   :  { %v1278_v54 = vpack.c.bf16 %v1497_v47, %v1496_v48  ;;  %v1280_v55 = vpack.c.bf16 %v1502_v51, %v1501_v52 }
 0x127   :  { %v1505_v56 = vpop.permute.xlu0 %1504  ;;  %404 = vmatmul.mubr.f32.vlgmr.msra.gmra.mrb[0].mxu0 %v30_v50  ;;  %v1510_v59 = vpop.permute.xlu1 %1509 }
 0x128   :  { %v1507_v57 = vunpack.i.h.bf16 %v1505_v56  ;;  %v1506_v58 = vunpack.i.l.bf16 %v1505_v56  ;;  %1279 = vmatprep.subr.bf16.mxu1 %v1278_v54  ;;  %408 = vmatprep.mubr.f32.mxu0 %v36_v53  ;;  %v1512_v21 = vunpack.i.h.bf16 %v1510_v59  ;;  %v1511_v22 = vunpack.i.l.bf16 %v1510_v59 }
 0x129   :  { %1281 = vmatpush3.bf16.msra.mxu1 %v1280_v55 }
 0x12a   :  { %v1282_v61 = vpack.c.bf16 %v1507_v57, %v1506_v58  ;;  %v1286_v1 = vpack.c.bf16 %v1512_v21, %v1511_v22 }
 0x12b   :  { %v1515_v63 = vpop.permute.xlu0 %1514  ;;  %409 = vmatmul.mubr.f32.gmra.mrb[2].mxu0 %v35_v60 }
 0x12c   :  { %v1517_v2 = vunpack.i.h.bf16 %v1515_v63  ;;  %v1516_v3 = vunpack.i.l.bf16 %v1515_v63  ;;  %489 = vmatmul.mubr.f32.vlgmr.msra.gmra.mrb[0].mxu1 %v32_v25  ;;  %1283 = vmatprep.subr.bf16.mxu0 %v1282_v61 }
 0x12d   :  { %1285 = vmatpush3.bf16.msra.mxu0 %v1282_v61  ;;  %413 = vmatprep.mubr.f32.mxu0 %v41_v62 }
 0x12e   :  { %1287 = vmatprep.subr.bf16.mxu0 %v1286_v1  ;;  %493 = vmatprep.mubr.f32.mxu1 %v38_v0  ;;  %v1290_v36 = vpack.c.bf16 %v1517_v2, %v1516_v3 }
 0x12f   :  { %414 = vmatmul.mubr.f32.gmra.mrb[4].mxu0 %v40_v4 }
 0x130   :  { %494 = vmatmul.mubr.f32.gmra.mrb[2].mxu1 %v37_v5  ;;  %418 = vmatprep.mubr.f32.mxu0 %v46_v6 }
 0x131   :  { %1289 = vmatpush3.bf16.msra.mxu0 %v1286_v1  ;;  %498 = vmatprep.mubr.f32.mxu1 %v43_v35 }
 0x132   :  { %1291 = vmatprep.subr.bf16.mxu0 %v1290_v36 }
 0x133   :  { %419 = vmatmul.mubr.f32.gmra.mrb[6].mxu0 %v45_v41 }
 0x134   :  { %499 = vmatmul.mubr.f32.gmra.mrb[4].mxu1 %v42_v7  ;;  %1159 = vmatprep.mubr.msk.f32.mxu0 %vm326_vm3, %v34_v8 }
 0x135   :  { %1293 = vmatpush3.bf16.msra.mxu0 %v1290_v36  ;;  %503 = vmatprep.mubr.f32.mxu1 %v48_v9 }
 0x138   :  { %504 = vmatmul.mubr.f32.gmra.mrb[6].mxu1 %v47_v10  ;;  %1160 = vmatmul.mubr.msk.f32.vlgmr.msra.gmra.mrb[8].mxu0 %vm326_vm3, %v39_v11  ;;  %v309_v17 = vpop.permute.xlu1 %308 }
 0x139   :  { %1162 = vmatprep.mubr.msk.f32.mxu0 %vm326_vm3, %v44_v12 }
 0x13c   :  { %1163 = vmatmul.mubr.msk.f32.gmra.mrb[10].mxu0 %vm326_vm3, %v49_v13  ;;  %v314_v31 = vpop.permute.xlu0 %313  ;;  %v319_v38 = vpop.permute.xlu1 %318 }
 0x140   :  { %v324_v49 = vpop.permute.xlu1 %323 }
 0x1fa   :  { %v1053_v14 = vpop.f32.mrb[0].mxu0 }
 0x1fb   :  { %v1054_v15 = vpop.f32.mrb[1].mxu0 }
 0x1fc   :  { %v1055_v16 = vadd.f32 %v1054_v15, %v1053_v14 }
 0x1fe   :  { %v1056_v18 = vpop.f32.mrb[2].mxu0  ;;  %v406_v26 = vadd.f32 %v1055_v16, %v309_v17 }
 0x1ff   :  { %v1097_v19 = vpop.f32.mrb[0].mxu1  ;;  %v1057_v20 = vpop.f32.mrb[3].mxu0 }
 0x200   :  { %v1098_v23 = vpop.f32.mrb[1].mxu1  ;;  %v1058_v24 = vadd.f32 %v1057_v20, %v1056_v18 }
 0x201   :  { %v1099_v28 = vadd.f32 %v1098_v23, %v1097_v19 }
 0x202   :  { %v1059_v29 = vpop.f32.mrb[4].mxu0  ;;  %v411_v32 = vadd.f32 %v1058_v24, %v314_v31  ;;  %v623_v31 = vld [vmem:[%s2015_s4 + $0x8] sm:$0xff] }
 0x203   :  { %v1060_v33 = vpop.f32.mrb[5].mxu0  ;;  %v1100_v34 = vpop.f32.mrb[2].mxu1  ;;  %v491_v37 = vadd.f32 %v1099_v28, %v406_v26  ;;  %v622_v26 = vld [vmem:[%s2015_s4] sm:$0xff] }
 0x204   :  { %v1061_v27 = vadd.f32 %v1060_v33, %v1059_v29  ;;  %v1101_v30 = vpop.f32.mrb[3].mxu1  ;;  %v606_v28 = vld [vmem:[%s2016_s3] sm:$0xff]  ;;  %v624_v33 = vld [vmem:[%s2015_s4 + $0x10] sm:$0xff] }
 0x205   :  { %v1102_v39 = vadd.f32 %v1101_v30, %v1100_v34  ;;  %v610_v29 = vld [vmem:[%s2016_s3 + $0x20] sm:$0xff]  ;;  %1189 = vmatprep.mubr.msk.f32.mxu0 %vm772_vm11, %v606_v28  ;;  %v625_v34 = vld [vmem:[%s2015_s4 + $0x18] sm:$0xff] }
 0x206   :  { %v1062_v40 = vpop.f32.mrb[6].mxu0  ;;  %v416_v47 = vadd.f32 %v1061_v27, %v319_v38  ;;  %1195 = vmatprep.mubr.msk.f32.mxu1 %vm772_vm11, %v610_v29  ;;  %v627_v38 = vld [vmem:[%s2015_s4 + $0x28] sm:$0xff]  ;;  %v628_v27 = vld [vmem:[%s2015_s4 + $0x30] sm:$0xff]  ;;  %v629_v30 = vld [vmem:[%s2015_s4 + $0x38] sm:$0xff] }
 0x207   :  { %v1063_v42 = vpop.f32.mrb[7].mxu0  ;;  %v1103_v43 = vpop.f32.mrb[4].mxu1  ;;  %v496_v44 = vadd.f32 %v1102_v39, %v411_v32  ;;  %v630_v32 = vld [vmem:[%s2015_s4 + $0x40] sm:$0xff]  ;;  %v631_v39 = vld [vmem:[%s2015_s4 + $0x48] sm:$0xff] }
 0x208   :  { %v1064_v45 = vadd.f32 %v1063_v42, %v1062_v40  ;;  %v1104_v46 = vpop.f32.mrb[5].mxu1  ;;  %v632_v40 = vld [vmem:[%s2015_s4 + $0x50] sm:$0xff]  ;;  %v633_v42 = vld [vmem:[%s2015_s4 + $0x58] sm:$0xff] }
 0x209   :  { %v1105_v48 = vadd.f32 %v1104_v46, %v1103_v43  ;;  %v634_v43 = vld [vmem:[%s2015_s4 + $0x60] sm:$0xff]  ;;  %v637_v46 = vld [vmem:[%s2015_s4 + $0x78] sm:$0xff] }
 0x20a   :  { %v421_v56 = vadd.f32 %v1064_v45, %v324_v49  ;;  %v636_v45 = vld [vmem:[%s2015_s4 + $0x70] sm:$0xff] }
 0x20b   :  { %v1106_v50 = vpop.f32.mrb[6].mxu1  ;;  %v1161_v51 = vpop.f32.mrb[8].mxu0  ;;  %v501_v52 = vadd.f32 %v1105_v48, %v416_v47 }
 0x20c   :  { %v581_v53 = vadd.f32 %v1161_v51, %v496_v44  ;;  %v1107_v54 = vpop.f32.mrb[7].mxu1  ;;  %v575_v55 = vpop.f32.mrb[9].mxu0  ;;  %v635_v44 = vld [vmem:[%s2015_s4 + $0x68] sm:$0xff] }
 0x20d   :  { %v1108_v57 = vadd.f32 %v1107_v54, %v1106_v50  ;;  %v576_v58 = vadd.f32 %v575_v55, %v491_v37  ;;  %v626_v37 = vld [vmem:[%s2015_s4 + $0x20] sm:$0xff] }
 0x20e   :  { %vm595_vm4 = vcmp.gt.f32.partialorder %v581_v53, 0.0  ;;  %v599_v59 = vmul.f32 0.1, %v581_v53 }
 0x20f   :  { %vm594_vm5 = vcmp.gt.f32.partialorder %v576_v58, 0.0  ;;  %v598_v60 = vmul.f32 0.1, %v576_v58  ;;  %v506_v21 = vadd.f32 %v1108_v57, %v421_v56  ;;  %v1164_v22 = vpop.f32.mrb[10].mxu0 }
 0x210   :  { %v585_v25 = vpop.f32.mrb[11].mxu0  ;;  %v603_v61 = vsel %vm595_vm4, %v581_v53, %v599_v59 }
 0x211   :  { %v591_v62 = vadd.f32 %v1164_v22, %v506_v21  ;;  %v586_v63 = vadd.f32 %v585_v25, %v501_v52  ;;  %v602_v0 = vsel %vm594_vm5, %v576_v58, %v598_v60  ;;  %v607_v25 = vld [vmem:[%s2016_s3 + $0x8] sm:$0xff] }
 0x212   :  { %v1520_v1 = vpack.i.bf16 %v603_v61, %v602_v0  ;;  %v611_v61 = vld [vmem:[%s2016_s3 + $0x28] sm:$0xff]  ;;  %v609_v0 = vld [vmem:[%s2016_s3 + $0x18] sm:$0xff] }
 0x213   :  { %vm597_vm6 = vcmp.gt.f32.partialorder %v591_v62, 0.0  ;;  %v601_v2 = vmul.f32 0.1, %v591_v62  ;;  %vm596_vm7 = vcmp.gt.f32.partialorder %v586_v63, 0.0  ;;  %v600_v3 = vmul.f32 0.1, %v586_v63 }
 0x214   :  { %1521 = vrot.lane.b32.xlu0 %v1520_v1, %s1558_s1  ;;  %v613_v1 = vld [vmem:[%s2016_s3 + $0x38] sm:$0xff] }
 0x215   :  { %v604_v4 = vsel %vm596_vm7, %v586_v63, %v600_v3  ;;  %v605_v5 = vsel %vm597_vm6, %v591_v62, %v601_v2  ;;  %v608_v62 = vld [vmem:[%s2016_s3 + $0x10] sm:$0xff]  ;;  %v614_v2 = vld [vmem:[%s2016_s3 + $0x40] sm:$0xff]  ;;  %v615_v3 = vld [vmem:[%s2016_s3 + $0x48] sm:$0xff] }
 0x216   :  { %v1525_v6 = vpack.i.bf16 %v605_v5, %v604_v4  ;;  %v612_v63 = vld [vmem:[%s2016_s3 + $0x30] sm:$0xff]  ;;  %v617_v5 = vld [vmem:[%s2016_s3 + $0x58] sm:$0xff] }
 0x217   :  { %v616_v4 = vld [vmem:[%s2016_s3 + $0x50] sm:$0xff] }
 0x218   :  { %1526 = vrot.lane.b32.xlu1 %v1525_v6, %s1558_s1  ;;  %v618_v6 = vld [vmem:[%s2016_s3 + $0x60] sm:$0xff] }
 0x286   :  { %v1522_v35 = vpop.permute.xlu0 %1521 }
 0x287   :  { %v1524_v36 = vunpack.i.h.bf16 %v1522_v35  ;;  %v1523_v41 = vunpack.i.l.bf16 %v1522_v35  ;;  %v619_v35 = vld [vmem:[%s2016_s3 + $0x68] sm:$0xff] }
 0x289   :  { %v656_v7 = vsel %vm654_vm8, 0.0, %v1524_v36  ;;  %v655_v8 = vsel %vm654_vm8, 0.0, %v1523_v41  ;;  %v620_v36 = vld [vmem:[%s2016_s3 + $0x70] sm:$0xff]  ;;  %v621_v41 = vld [vmem:[%s2016_s3 + $0x78] sm:$0xff] }
 0x28a   :  { %v661_v10 = vsel %vm659_vm9, %v656_v7, 0.0  ;;  %v660_v11 = vsel %vm659_vm9, %v655_v8, 0.0  ;;  %v1294_v12 = vpack.c.bf16 %v656_v7, %v655_v8  ;;  %v1527_v13 = vpop.permute.xlu1 %1526 }
 0x28b   :  { %v1529_v14 = vunpack.i.h.bf16 %v1527_v13  ;;  %v1528_v15 = vunpack.i.l.bf16 %v1527_v13  ;;  %v1530_v16 = vpack.i.bf16 %v661_v10, %v660_v11 }
 0x28c   :  { %1296 = vmatprep.subr.msk.bf16.mxu0 %vm1806_vm10, %v1294_v12  ;;  %1322 = vmatprep.subr.msk.bf16.mxu1 %vm1806_vm10, %v1294_v12 }
 0x28d   :  { %v658_v17 = vsel %vm654_vm8, 0.0, %v1529_v14  ;;  %v657_v18 = vsel %vm654_vm8, 0.0, %v1528_v15  ;;  %1299 = vmatpush3.bf16.msk.msra.mxu0 %vm1806_vm10, %v1294_v12  ;;  %1328 = vmatpush3.bf16.msk.msra.mxu1 %vm1806_vm10, %v1294_v12 }
 0x28e   :  { %v663_v19 = vsel %vm659_vm9, %v658_v17, 0.0  ;;  %v662_v20 = vsel %vm659_vm9, %v657_v18, 0.0  ;;  %v1300_v23 = vpack.c.bf16 %v658_v17, %v657_v18  ;;  %1531 = vrot.lane.b32.xlu0 %v1530_v16, %s1551_s0 }
 0x28f   :  { %v1535_v24 = vpack.i.bf16 %v663_v19, %v662_v20 }
 0x290   :  { %1302 = vmatprep.subr.msk.bf16.mxu0 %vm1806_vm10, %v1300_v23  ;;  %1323 = vmatprep.subr.msk.bf16.mxu1 %vm1806_vm10, %v1300_v23 }
 0x291   :  { %1536 = vrot.lane.b32.xlu1 %v1535_v24, %s1551_s0  ;;  %1305 = vmatpush3.bf16.msk.msra.mxu0 %vm1806_vm10, %v1300_v23 }
 0x292   :  { %1329 = vmatpush3.bf16.msk.msra.mxu1 %vm1806_vm10, %v1300_v23  ;;  %1541 = vrot.lane.b32.xlu0 %v1530_v16, %s1554_s16 }
 0x295   :  { %1546 = vrot.lane.b32.xlu1 %v1535_v24, %s1554_s16 }
 0x296   :  { %694 = vperm.xlu0 %1519, %v622_v26  }
 0x299   :  { %699 = vperm.xlu1 %1518, %v623_v31  }
 0x29a   :  { %704 = vperm.xlu0 %1519, %v624_v33  }
 0x29d   :  { %709 = vperm.xlu1 %1518, %v625_v34  }
 0x29e   :  { %714 = vperm.xlu0 %1519, %v626_v37  }
 0x2a1   :  { %719 = vperm.xlu1 %1518, %v627_v38  }
 0x2a2   :  { %724 = vperm.xlu0 %1519, %v628_v27  }
 0x2a5   :  { %729 = vperm.xlu1 %1518, %v629_v30  }
 0x2a6   :  { %734 = vperm.xlu0 %1519, %v630_v32  }
 0x2a9   :  { %739 = vperm.xlu1 %1518, %v631_v39  }
 0x2aa   :  { %744 = vperm.xlu0 %1519, %v632_v40  }
 0x2ad   :  { %749 = vperm.xlu1 %1518, %v633_v42  }
 0x2ae   :  { %754 = vperm.xlu0 %1519, %v634_v43  }
 0x2b1   :  { %759 = vperm.xlu1 %1518, %v635_v44  }
 0x2b2   :  { %764 = vperm.xlu0 %1519, %v636_v45  }
 0x2b5   :  { %769 = vperm.xlu1 %1518, %v637_v46  }
 0x300   :  { %v1532_v47 = vpop.permute.xlu0 %1531 }
 0x301   :  { %v1534_v48 = vunpack.i.h.bf16 %v1532_v47  ;;  %v1533_v49 = vunpack.i.l.bf16 %v1532_v47 }
 0x303   :  { %v1306_v50 = vpack.c.bf16 %v1534_v48, %v1533_v49  ;;  %v1537_v51 = vpop.permute.xlu1 %1536 }
 0x304   :  { %v1539_v52 = vunpack.i.h.bf16 %v1537_v51  ;;  %v1538_v53 = vunpack.i.l.bf16 %v1537_v51  ;;  %v1542_v54 = vpop.permute.xlu0 %1541 }
 0x305   :  { %v1544_v55 = vunpack.i.h.bf16 %v1542_v54  ;;  %v1543_v56 = vunpack.i.l.bf16 %v1542_v54  ;;  %1307 = vmatprep.subr.bf16.mxu0 %v1306_v50  ;;  %1324 = vmatprep.subr.bf16.mxu1 %v1306_v50 }
 0x306   :  { %v1310_v57 = vpack.c.bf16 %v1539_v52, %v1538_v53  ;;  %1309 = vmatpush3.bf16.msra.mxu0 %v1306_v50  ;;  %1330 = vmatpush3.bf16.msra.mxu1 %v1306_v50 }
 0x307   :  { %v1547_v58 = vpop.permute.xlu1 %1546  ;;  %v1314_v59 = vpack.c.bf16 %v1544_v55, %v1543_v56 }
 0x308   :  { %1311 = vmatprep.subr.bf16.mxu0 %v1310_v57  ;;  %1325 = vmatprep.subr.bf16.mxu1 %v1310_v57  ;;  %v1549_v60 = vunpack.i.h.bf16 %v1547_v58  ;;  %v1548_v21 = vunpack.i.l.bf16 %v1547_v58 }
 0x30a   :  { %1313 = vmatpush3.bf16.msra.mxu0 %v1310_v57  ;;  %1331 = vmatpush3.bf16.msra.mxu1 %v1310_v57  ;;  %v1318_v22 = vpack.c.bf16 %v1549_v60, %v1548_v21 }
 0x30b   :  { %1315 = vmatprep.subr.bf16.mxu0 %v1314_v59  ;;  %1326 = vmatprep.subr.bf16.mxu1 %v1314_v59 }
 0x30e   :  { %1317 = vmatpush3.bf16.msra.mxu0 %v1314_v59  ;;  %1332 = vmatpush3.bf16.msra.mxu1 %v1314_v59 }
 0x30f   :  { %1319 = vmatprep.subr.bf16.mxu0 %v1318_v22  ;;  %1327 = vmatprep.subr.bf16.mxu1 %v1318_v22 }
 0x312   :  { %1321 = vmatpush3.bf16.msra.mxu0 %v1318_v22  ;;  %1333 = vmatpush3.bf16.msra.mxu1 %v1318_v22 }
 0x315   :  { %1190 = vmatmul.mubr.msk.f32.vlgmr.msra.gmra.mrb[12].mxu0 %vm772_vm11, %v607_v25  ;;  %1196 = vmatmul.mubr.msk.f32.vlgmr.msra.gmra.mrb[8].mxu1 %vm772_vm11, %v611_v61  ;;  %v695_v8 = vpop.permute.xlu0 %694 }
 0x316   :  { %1192 = vmatprep.mubr.msk.f32.mxu0 %vm772_vm11, %v608_v62  ;;  %1198 = vmatprep.mubr.msk.f32.mxu1 %vm772_vm11, %v612_v63 }
 0x318   :  { %v700_v7 = vpop.permute.xlu1 %699 }
 0x319   :  { %1193 = vmatmul.mubr.msk.f32.gmra.mrb[14].mxu0 %vm772_vm11, %v609_v0  ;;  %1199 = vmatmul.mubr.msk.f32.gmra.mrb[10].mxu1 %vm772_vm11, %v613_v1  ;;  %v705_v10 = vpop.permute.xlu0 %704 }
 0x31a   :  { %1201 = vmatprep.mubr.msk.f32.mxu1 %vm772_vm11, %v614_v2 }
 0x31c   :  { %v710_v9 = vpop.permute.xlu1 %709 }
 0x31d   :  { %1202 = vmatmul.mubr.msk.f32.gmra.mrb[12].mxu1 %vm772_vm11, %v615_v3  ;;  %v715_v12 = vpop.permute.xlu0 %714 }
 0x31e   :  { %1204 = vmatprep.mubr.msk.f32.mxu1 %vm772_vm11, %v616_v4 }
 0x320   :  { %v720_v11 = vpop.permute.xlu1 %719 }
 0x321   :  { %1205 = vmatmul.mubr.msk.f32.gmra.mrb[14].mxu1 %vm772_vm11, %v617_v5  ;;  %v725_v14 = vpop.permute.xlu0 %724 }
 0x322   :  { %1207 = vmatprep.mubr.msk.f32.mxu1 %vm772_vm11, %v618_v6 }
 0x324   :  { %v730_v13 = vpop.permute.xlu1 %729 }
 0x325   :  { %1208 = vmatmul.mubr.msk.f32.gmra.mrb[16].mxu1 %vm772_vm11, %v619_v35  ;;  %v735_v28 = vpop.permute.xlu0 %734 }
 0x326   :  { %1210 = vmatprep.mubr.msk.f32.mxu1 %vm772_vm11, %v620_v36 }
 0x328   :  { %v740_v23 = vpop.permute.xlu1 %739 }
 0x329   :  { %1211 = vmatmul.mubr.msk.f32.gmra.mrb[18].mxu1 %vm772_vm11, %v621_v41  ;;  %v745_v40 = vpop.permute.xlu0 %744 }
 0x32c   :  { %v750_v32 = vpop.permute.xlu1 %749 }
 0x32d   :  { %v755_v50 = vpop.permute.xlu0 %754 }
 0x330   :  { %v760_v48 = vpop.permute.xlu1 %759 }
 0x331   :  { %v765_v57 = vpop.permute.xlu0 %764 }
 0x334   :  { %v770_v55 = vpop.permute.xlu1 %769 }
 0x3e8   :  { %v1191_v15 = vpop.f32.mrb[12].mxu0  ;;  %v1197_v16 = vpop.f32.mrb[8].mxu1 }
 0x3e9   :  { %v893_v17 = vadd.f32 %v1191_v15, %v700_v7  ;;  %v913_v18 = vadd.f32 %v1197_v16, %v720_v11  ;;  %v887_v19 = vpop.f32.mrb[13].mxu0  ;;  %v907_v20 = vpop.f32.mrb[9].mxu1 }
 0x3ea   :  { %v888_v24 = vadd.f32 %v887_v19, %v695_v8  ;;  %v908_v26 = vadd.f32 %v907_v20, %v715_v12 }
 0x3eb   :  { %968 = vst.msk [vmem:[%s2017_s5 + $0x8] sm:$0xff] %vm966_vm12, %v893_v17  ;;  %972 = vst.msk [vmem:[%s2017_s5 + $0x28] sm:$0xff] %vm966_vm12, %v913_v18 }
 0x3ec   :  { %967 = vst.msk [vmem:[%s2017_s5] sm:$0xff] %vm966_vm12, %v888_v24  ;;  %971 = vst.msk [vmem:[%s2017_s5 + $0x20] sm:$0xff] %vm966_vm12, %v908_v26  ;;  %v1194_v29 = vpop.f32.mrb[14].mxu0  ;;  %v1200_v31 = vpop.f32.mrb[10].mxu1 }
 0x3ed   :  { %v903_v33 = vadd.f32 %v1194_v29, %v710_v9  ;;  %v923_v34 = vadd.f32 %v1200_v31, %v730_v13  ;;  %v897_v37 = vpop.f32.mrb[15].mxu0  ;;  %v917_v38 = vpop.f32.mrb[11].mxu1 }
 0x3ee   :  { %v898_v27 = vadd.f32 %v897_v37, %v705_v10  ;;  %v918_v30 = vadd.f32 %v917_v38, %v725_v14 }
 0x3ef   :  { %970 = vst.msk [vmem:[%s2017_s5 + $0x18] sm:$0xff] %vm966_vm12, %v903_v33  ;;  %974 = vst.msk [vmem:[%s2017_s5 + $0x38] sm:$0xff] %vm966_vm12, %v923_v34 }
 0x3f0   :  { %969 = vst.msk [vmem:[%s2017_s5 + $0x10] sm:$0xff] %vm966_vm12, %v898_v27  ;;  %973 = vst.msk [vmem:[%s2017_s5 + $0x30] sm:$0xff] %vm966_vm12, %v918_v30  ;;  %v1203_v39 = vpop.f32.mrb[12].mxu1 }
 0x3f1   :  { %v933_v42 = vadd.f32 %v1203_v39, %v740_v23  ;;  %v927_v43 = vpop.f32.mrb[13].mxu1 }
 0x3f2   :  { %v928_v44 = vadd.f32 %v927_v43, %v735_v28 }
 0x3f3   :  { %976 = vst.msk [vmem:[%s2017_s5 + $0x48] sm:$0xff] %vm966_vm12, %v933_v42 }
 0x3f4   :  { %975 = vst.msk [vmem:[%s2017_s5 + $0x40] sm:$0xff] %vm966_vm12, %v928_v44  ;;  %v1206_v45 = vpop.f32.mrb[14].mxu1 }
 0x3f5   :  { %v943_v46 = vadd.f32 %v1206_v45, %v750_v32  ;;  %v937_v47 = vpop.f32.mrb[15].mxu1 }
 0x3f6   :  { %v938_v49 = vadd.f32 %v937_v47, %v745_v40 }
 0x3f7   :  { %978 = vst.msk [vmem:[%s2017_s5 + $0x58] sm:$0xff] %vm966_vm12, %v943_v46 }
 0x3f8   :  { %977 = vst.msk [vmem:[%s2017_s5 + $0x50] sm:$0xff] %vm966_vm12, %v938_v49  ;;  %v1209_v51 = vpop.f32.mrb[16].mxu1 }
 0x3f9   :  { %v953_v52 = vadd.f32 %v1209_v51, %v760_v48  ;;  %v947_v53 = vpop.f32.mrb[17].mxu1 }
 0x3fa   :  { %v948_v54 = vadd.f32 %v947_v53, %v755_v50 }
 0x3fb   :  { %980 = vst.msk [vmem:[%s2017_s5 + $0x68] sm:$0xff] %vm966_vm12, %v953_v52 }
 0x3fc   :  { %979 = vst.msk [vmem:[%s2017_s5 + $0x60] sm:$0xff] %vm966_vm12, %v948_v54  ;;  %v1212_v56 = vpop.f32.mrb[18].mxu1 }
 0x3fd   :  { %v963_v58 = vadd.f32 %v1212_v56, %v770_v55  ;;  %v957_v59 = vpop.f32.mrb[19].mxu1 }
 0x3fe   :  { %v958_v60 = vadd.f32 %v957_v59, %v765_v57 }
 0x3ff   :  { %982 = vst.msk [vmem:[%s2017_s5 + $0x78] sm:$0xff] %vm966_vm12, %v963_v58 }
 0x400   :  { %981 = vst.msk [vmem:[%s2017_s5 + $0x70] sm:$0xff] %vm966_vm12, %v958_v60 }

// kernel: forward.4
= control target key start
LH: loop header
LB: loop body
LE: loop exit
PB: predicated region body
PF: predicated region fallthrough
CT: control target
= control target key end

     0   :  { %s2131_s22 = smov 1   ;;  %vm82_vm2 = vcmask 7168   ;;  %vm85_vm3 = vcmask 531456   ;;  %vm112_vm5 = vcmask 392192   ;;  %s2132_s25 = smov 126   ;;  %v2134_v18 = vmov 0   ;;  %s2563_s0 = inlined_call_operand.vmem [shape: f32[16,64], index: 0, kind: input, shape index: {}]   ;;  %s2564_s1 = inlined_call_operand.vmem [shape: f32[16,48], index: 1, kind: input, shape index: {}]   ;;  %s2565_s2 = inlined_call_operand.vmem [shape: f32[16,1], index: 2, kind: input, shape index: {}]   ;;  %s2566_s3 = inlined_call_operand.vmem [shape: f32[16,48], index: 3, kind: input, shape index: {}]   ;;  %s2567_s4 = inlined_call_operand.vmem [shape: f32[16,1], index: 4, kind: input, shape index: {}]   ;;  %s2568_s5 = inlined_call_operand.vmem [shape: f32[16,48], index: 5, kind: input, shape index: {}]   ;;  %s2569_s6 = inlined_call_operand.vmem [shape: f32[16,1], index: 6, kind: input, shape index: {}]   ;;  %s2570_s10 = inlined_call_operand.vmem [shape: f32[16,1], index: 10, kind: input, shape index: {}]   ;;  %s2571_s9 = inlined_call_operand.vmem [shape: f32[16,112], index: 9, kind: input, shape index: {}]   ;;  %s2572_s7 = inlined_call_operand.vmem [shape: f32[16,48], index: 7, kind: input, shape index: {}]   ;;  %s2573_s12 = inlined_call_operand.vmem [shape: f32[16,1], index: 12, kind: input, shape index: {}]   ;;  %s2574_s11 = inlined_call_operand.vmem [shape: f32[16,112], index: 11, kind: input, shape index: {}]   ;;  %s2575_s14 = inlined_call_operand.vmem [shape: f32[16,1], index: 14, kind: input, shape index: {}]   ;;  %s2576_s13 = inlined_call_operand.vmem [shape: f32[16,112], index: 13, kind: input, shape index: {}]   ;;  %s2577_s8 = inlined_call_operand.vmem [shape: f32[16,1], index: 8, kind: input, shape index: {}]   ;;  %s2578_s16 = inlined_call_operand.vmem [shape: f32[16,1], index: 16, kind: input, shape index: {}]   ;;  %s2579_s15 = inlined_call_operand.vmem [shape: f32[16,112], index: 15, kind: input, shape index: {}]   ;;  %s2580_s17 = inlined_call_operand.vmem [shape: f32[32,48], index: 17, kind: input, shape index: {}]   ;;  %s2581_s18 = inlined_call_operand.vmem [shape: f32[32,1], index: 18, kind: input, shape index: {}]   ;;  %s2582_s19 = inlined_call_operand.vmem [shape: f32[32,64], index: 19, kind: output, shape index: {}]  }
   0x1   :  { %2587 = sst [smem:[#allocation2_spill]] %s2563_s0  ;;  %vm2269_vm4 = vmpackc.low %vm85_vm3, %vm85_vm3  ;;  %1929 = vset.pattern.permute.xlu1 %v2134_v18  ;;  %1930 = vset.pattern.permute.xlu0 %v2134_v18  ;;  %v203_v51 = vld [vmem:[%s2567_s4 + $0x8] sm:$0xff]  ;;  %v202_v52 = vld [vmem:[%s2567_s4] sm:$0xff]  ;;  %s2135_s4 = smov 3   ;;  %vm341_vm8 = vcmask 23552   ;;  %vm344_vm11 = vcmask 547840  }
   0x2   :  { %2588 = sst [smem:[#allocation3_spill]] %s2564_s1  ;;  %s2591_s20 = sld [smem:[#allocation2_spill]]  ;;  %vm2344_vm12 = vmpackc.low %vm344_vm11, %vm344_vm11  ;;  %vm643_vm13 = vcmask 916480   ;;  %v1200_v12 = vld [vmem:[%s2581_s18 + $0x10] sm:$0xff] }
   0x3   :  { %2589 = sst [smem:[#allocation4_spill]] %s2565_s2  ;;  %s2594_s24 = sld [smem:[#allocation3_spill]] }
   0x4   :  { %2590 = sst [smem:[#allocation5_spill]] %s2566_s3  ;;  %s2133_s3 = smov 127  }
   0x5   :  { %s2595_s28 = sld [smem:[#allocation4_spill]]  ;;  %s2596_s2 = sld [smem:[#allocation5_spill]] }
   0x6   :  { %s2137_s21 = smov 125   ;;  %s2138_s1 = smov 124  }
   0x7   :  { %s2142_s26 = smov 119   ;;  %s2144_s27 = smov 113  }
   0x8   :  { %v2248_v0 = vld [vmem:[%s2591_s20] sm:$0xff]  ;;  %v2253_v1 = vld [vmem:[%s2591_s20 + $0x8] sm:$0xff]  ;;  %s2136_s20 = smov 122  }
   0x9   :  { %vm64_vm0 = vcmp.gt.f32.partialorder %v2248_v0, 0.0  ;;  %vm65_vm1 = vcmp.gt.f32.partialorder %v2253_v1, 0.0  ;;  %v66_v2 = vmul.f32 0.1, %v2248_v0  ;;  %v67_v3 = vmul.f32 0.1, %v2253_v1 }
   0xa   :  { %v70_v17 = vld [vmem:[%s2594_s24] sm:$0xff]  ;;  %v71_v29 = vld [vmem:[%s2594_s24 + $0x8] sm:$0xff] }
   0xb   :  { %v68_v4 = vsel %vm64_vm0, %v2248_v0, %v66_v2  ;;  %v69_v5 = vsel %vm65_vm1, %v2253_v1, %v67_v3  ;;  %1510 = vmatprep.mubr.msk.f32.mxu1 %vm112_vm5, %v70_v17  ;;  %v72_v19 = vld [vmem:[%s2595_s28] sm:$0xff]  ;;  %v73_v20 = vld [vmem:[%s2595_s28 + $0x8] sm:$0xff] }
   0xc   :  { %v2261_v6 = vpack.i.bf16 %v69_v5, %v68_v4  ;;  %v200_v50 = vld [vmem:[%s2596_s2] sm:$0xff]  ;;  %v201_v61 = vld [vmem:[%s2596_s2 + $0x8] sm:$0xff]  ;;  %s2139_s2 = smov 123  }
   0xe   :  { %1915 = vrot.lane.b32.xlu0 %v2261_v6, %s2131_s22 }
  0x80   :  { %v1916_v7 = vpop.permute.xlu0 %1915 }
  0x81   :  { %v1918_v8 = vunpack.i.h.bf16 %v1916_v7  ;;  %v1917_v9 = vunpack.i.l.bf16 %v1916_v7 }
  0x83   :  { %v83_v10 = vsel %vm82_vm2, 0.0, %v1917_v9  ;;  %v84_v11 = vsel %vm82_vm2, 0.0, %v1918_v8 }
  0x84   :  { %v1700_v13 = vpack.c.bf16 %v84_v11, %v83_v10  ;;  %v86_v14 = vsel %vm85_vm3, %v83_v10, 0.0  ;;  %v87_v15 = vsel %vm85_vm3, %v84_v11, 0.0 }
  0x85   :  { %v1924_v16 = vpack.i.bf16 %v87_v15, %v86_v14 }
  0x86   :  { %1702 = vmatprep.subr.msk.bf16.mxu1 %vm2269_vm4, %v1700_v13 }
  0x87   :  { %1705 = vmatpush3.bf16.msk.msra.mxu1 %vm2269_vm4, %v1700_v13  ;;  %1925 = vrot.lane.b32.xlu1 %v1924_v16, %s2132_s25 }
  0x88   :  { %1920 = vrot.lane.b32.xlu0 %v1924_v16, %s2133_s3 }
  0x8b   :  { %104 = vperm.xlu1 %1929, %v72_v19  }
  0x8c   :  { %109 = vperm.xlu0 %1930, %v73_v20  }
  0xf9   :  { %v1926_v21 = vpop.permute.xlu1 %1925 }
  0xfa   :  { %v1921_v22 = vpop.permute.xlu0 %1920  ;;  %v1928_v23 = vunpack.i.h.bf16 %v1926_v21  ;;  %v1927_v24 = vunpack.i.l.bf16 %v1926_v21 }
  0xfb   :  { %v1923_v25 = vunpack.i.h.bf16 %v1921_v22  ;;  %v1922_v26 = vunpack.i.l.bf16 %v1921_v22 }
  0xfc   :  { %v1710_v28 = vpack.c.bf16 %v1928_v23, %v1927_v24 }
  0xfd   :  { %v1706_v27 = vpack.c.bf16 %v1923_v25, %v1922_v26  ;;  %v460_v26 = vld [vmem:[%s2577_s8] sm:$0xff] }
  0xff   :  { %1707 = vmatprep.subr.bf16.mxu1 %v1706_v27 }
 0x100   :  { %1709 = vmatpush3.bf16.msra.mxu1 %v1706_v27 }
 0x101   :  { %1711 = vmatprep.subr.bf16.mxu1 %v1710_v28 }
 0x104   :  { %1713 = vmatpush3.bf16.msra.mxu1 %v1710_v28 }
 0x107   :  { %1511 = vmatmul.mubr.msk.f32.vlgmr.msra.gmra.mrb[0].mxu1 %vm112_vm5, %v71_v29 }
 0x108   :  { %1525 = vmatprep.mubr.msk.f32.mxu1 %vm112_vm5, %v200_v50 }
 0x10a   :  { %v105_v31 = vpop.permute.xlu1 %104 }
 0x10b   :  { %v110_v30 = vpop.permute.xlu0 %109 }
 0x1da   :  { %v1512_v32 = vpop.f32.mrb[0].mxu1 }
 0x1db   :  { %v191_v33 = vadd.f32 %v1512_v32, %v110_v30  ;;  %v185_v34 = vpop.f32.mrb[1].mxu1  ;;  %v329_v32 = vld [vmem:[%s2568_s5] sm:$0xff] }
 0x1dc   :  { %v186_v35 = vadd.f32 %v185_v34, %v105_v31  ;;  %1540 = vmatprep.mubr.msk.f32.mxu0 %vm112_vm5, %v329_v32  ;;  %v332_v34 = vld [vmem:[%s2569_s6 + $0x8] sm:$0xff] }
 0x1dd   :  { %vm195_vm6 = vcmp.gt.f32.partialorder %v191_v33, 0.0  ;;  %v197_v36 = vmul.f32 0.1, %v191_v33 }
 0x1de   :  { %vm194_vm7 = vcmp.gt.f32.partialorder %v186_v35, 0.0  ;;  %v196_v37 = vmul.f32 0.1, %v186_v35 }
 0x1df   :  { %v199_v38 = vsel %vm195_vm6, %v191_v33, %v197_v36  ;;  %v584_v36 = vld [vmem:[%s2570_s10 + $0x8] sm:$0xff] }
 0x1e0   :  { %v198_v39 = vsel %vm194_vm7, %v186_v35, %v196_v37  ;;  %v331_v35 = vld [vmem:[%s2569_s6] sm:$0xff] }
 0x1e1   :  { %v1931_v40 = vpack.i.bf16 %v199_v38, %v198_v39  ;;  %v583_v37 = vld [vmem:[%s2570_s10] sm:$0xff] }
 0x1e3   :  { %1932 = vrot.lane.b32.xlu1 %v1931_v40, %s2131_s22 }
 0x255   :  { %v1933_v41 = vpop.permute.xlu1 %1932 }
 0x256   :  { %v1935_v42 = vunpack.i.h.bf16 %v1933_v41  ;;  %v1934_v43 = vunpack.i.l.bf16 %v1933_v41 }
 0x258   :  { %v213_v44 = vsel %vm82_vm2, 0.0, %v1935_v42  ;;  %v212_v45 = vsel %vm82_vm2, 0.0, %v1934_v43 }
 0x259   :  { %v215_v46 = vsel %vm85_vm3, %v213_v44, 0.0  ;;  %v214_v47 = vsel %vm85_vm3, %v212_v45, 0.0  ;;  %v1714_v48 = vpack.c.bf16 %v213_v44, %v212_v45 }
 0x25a   :  { %v1941_v49 = vpack.i.bf16 %v215_v46, %v214_v47 }
 0x25b   :  { %1716 = vmatprep.subr.msk.bf16.mxu1 %vm2269_vm4, %v1714_v48 }
 0x25c   :  { %1719 = vmatpush3.bf16.msk.msra.mxu1 %vm2269_vm4, %v1714_v48  ;;  %1942 = vrot.lane.b32.xlu0 %v1941_v49, %s2132_s25 }
 0x25d   :  { %1937 = vrot.lane.b32.xlu1 %v1941_v49, %s2133_s3  ;;  %v330_v49 = vld [vmem:[%s2568_s5 + $0x8] sm:$0xff]  ;;  %s2141_s5 = smov 116  }
 0x260   :  { %237 = vperm.xlu0 %1930, %v203_v51   ;;  %v581_v51 = vld [vmem:[%s2571_s9] sm:$0xff] }
 0x261   :  { %232 = vperm.xlu1 %1929, %v202_v52  }
 0x264   :  { %1952 = vrot.lane.b32.xlu0 %v2261_v6, %s2135_s4 }
 0x2ce   :  { %v1943_v53 = vpop.permute.xlu0 %1942 }
 0x2cf   :  { %v1938_v54 = vpop.permute.xlu1 %1937  ;;  %v1945_v55 = vunpack.i.h.bf16 %v1943_v53  ;;  %v1944_v56 = vunpack.i.l.bf16 %v1943_v53 }
 0x2d0   :  { %v1940_v57 = vunpack.i.h.bf16 %v1938_v54  ;;  %v1939_v58 = vunpack.i.l.bf16 %v1938_v54 }
 0x2d1   :  { %v1724_v60 = vpack.c.bf16 %v1945_v55, %v1944_v56 }
 0x2d2   :  { %v1720_v59 = vpack.c.bf16 %v1940_v57, %v1939_v58 }
 0x2d4   :  { %1721 = vmatprep.subr.bf16.mxu1 %v1720_v59 }
 0x2d5   :  { %1723 = vmatpush3.bf16.msra.mxu1 %v1720_v59 }
 0x2d6   :  { %1725 = vmatprep.subr.bf16.mxu1 %v1724_v60 }
 0x2d9   :  { %1727 = vmatpush3.bf16.msra.mxu1 %v1724_v60 }
 0x2dc   :  { %1526 = vmatmul.mubr.msk.f32.vlgmr.msra.gmra.mrb[2].mxu1 %vm112_vm5, %v201_v61 }
 0x2df   :  { %v238_v62 = vpop.permute.xlu0 %237 }
 0x2e0   :  { %v233_v5 = vpop.permute.xlu1 %232 }
 0x2e3   :  { %v1953_v63 = vpop.permute.xlu0 %1952 }
 0x2e4   :  { %v1955_v2 = vunpack.i.h.bf16 %v1953_v63  ;;  %v1954_v3 = vunpack.i.l.bf16 %v1953_v63 }
 0x2e6   :  { %v592_v9 = vsel %vm341_vm8, 0.0, %v1955_v2  ;;  %v591_v10 = vsel %vm341_vm8, 0.0, %v1954_v3 }
 0x2e7   :  { %v2324_v13 = vpack.c.bf16 %v592_v9, %v591_v10  ;;  %v594_v23 = vsel %vm344_vm11, %v592_v9, 0.0  ;;  %v593_v27 = vsel %vm344_vm11, %v591_v10, 0.0 }
 0x2e8   :  { %v1971_v33 = vpack.i.bf16 %v594_v23, %v593_v27 }
 0x3af   :  { %v1527_v4 = vpop.f32.mrb[2].mxu1 }
 0x3b0   :  { %v318_v7 = vadd.f32 %v1527_v4, %v238_v62  ;;  %v312_v8 = vpop.f32.mrb[3].mxu1 }
 0x3b1   :  { %v313_v11 = vadd.f32 %v312_v8, %v233_v5 }
 0x3b2   :  { %v2327_v14 = vadd.f32 %v318_v7, %v2253_v1 }
 0x3b3   :  { %v2330_v6 = vadd.f32 %v313_v11, %v2248_v0  ;;  %v582_v11 = vld [vmem:[%s2571_s9 + $0x8] sm:$0xff]  ;;  %s2143_s9 = smov 110  }
 0x3b4   :  { %vm324_vm9 = vcmp.gt.f32.partialorder %v2327_v14, 0.0  ;;  %v326_v15 = vmul.f32 0.1, %v2327_v14 }
 0x3b5   :  { %vm323_vm10 = vcmp.gt.f32.partialorder %v2330_v6, 0.0  ;;  %v325_v16 = vmul.f32 0.1, %v2330_v6 }
 0x3b6   :  { %v328_v17 = vsel %vm324_vm9, %v2327_v14, %v326_v15  ;;  %vm896_vm9 = vcmask 72704  }
 0x3b7   :  { %v327_v18 = vsel %vm323_vm10, %v2330_v6, %v325_v16  ;;  %vm899_vm10 = vcmask 596992  }
 0x3b8   :  { %v1946_v19 = vpack.i.bf16 %v328_v17, %v327_v18 }
 0x3ba   :  { %1947 = vrot.lane.b32.xlu1 %v1946_v19, %s2135_s4 }
 0x42c   :  { %v1948_v20 = vpop.permute.xlu1 %1947 }
 0x42d   :  { %v1950_v21 = vunpack.i.h.bf16 %v1948_v20  ;;  %v1949_v22 = vunpack.i.l.bf16 %v1948_v20 }
 0x42f   :  { %v342_v24 = vsel %vm341_vm8, 0.0, %v1949_v22  ;;  %v343_v25 = vsel %vm341_vm8, 0.0, %v1950_v21 }
 0x430   :  { %v345_v28 = vsel %vm344_vm11, %v342_v24, 0.0  ;;  %v346_v29 = vsel %vm344_vm11, %v343_v25, 0.0  ;;  %v1728_v30 = vpack.c.bf16 %v343_v25, %v342_v24 }
 0x431   :  { %v1961_v31 = vpack.i.bf16 %v346_v29, %v345_v28 }
 0x432   :  { %1730 = vmatprep.subr.msk.bf16.mxu0 %vm2344_vm12, %v1728_v30 }
 0x433   :  { %1733 = vmatpush3.bf16.msk.msra.mxu0 %vm2344_vm12, %v1728_v30  ;;  %1962 = vrot.lane.b32.xlu0 %v1961_v31, %s2136_s20 }
 0x434   :  { %1957 = vrot.lane.b32.xlu1 %v1961_v31, %s2137_s21 }
 0x437   :  { %1972 = vrot.lane.b32.xlu0 %v1971_v33, %s2132_s25 }
 0x438   :  { %1967 = vrot.lane.b32.xlu1 %v1971_v33, %s2133_s3 }
 0x43b   :  { %1982 = vrot.lane.b32.xlu0 %v1971_v33, %s2138_s1 }
 0x43c   :  { %1977 = vrot.lane.b32.xlu1 %v1971_v33, %s2137_s21 }
 0x43f   :  { %1992 = vrot.lane.b32.xlu0 %v1971_v33, %s2136_s20 }
 0x440   :  { %1987 = vrot.lane.b32.xlu1 %v1971_v33, %s2139_s2 }
 0x443   :  { %368 = vperm.xlu0 %1930, %v332_v34  }
 0x444   :  { %363 = vperm.xlu1 %1929, %v331_v35  }
 0x447   :  { %640 = vperm.xlu0 %1930, %v584_v36  }
 0x448   :  { %635 = vperm.xlu1 %1929, %v583_v37  }
 0x4a5   :  { %v1963_v38 = vpop.permute.xlu0 %1962 }
 0x4a6   :  { %v1958_v39 = vpop.permute.xlu1 %1957  ;;  %v1965_v40 = vunpack.i.h.bf16 %v1963_v38  ;;  %v1964_v41 = vunpack.i.l.bf16 %v1963_v38 }
 0x4a7   :  { %v1960_v42 = vunpack.i.h.bf16 %v1958_v39  ;;  %v1959_v43 = vunpack.i.l.bf16 %v1958_v39 }
 0x4a8   :  { %v1738_v45 = vpack.c.bf16 %v1965_v40, %v1964_v41 }
 0x4a9   :  { %v1734_v44 = vpack.c.bf16 %v1960_v42, %v1959_v43  ;;  %v1973_v52 = vpop.permute.xlu0 %1972 }
 0x4aa   :  { %v1968_v46 = vpop.permute.xlu1 %1967  ;;  %v1975_v53 = vunpack.i.h.bf16 %v1973_v52  ;;  %v1974_v54 = vunpack.i.l.bf16 %v1973_v52 }
 0x4ab   :  { %1735 = vmatprep.subr.bf16.mxu0 %v1734_v44  ;;  %v1970_v47 = vunpack.i.h.bf16 %v1968_v46  ;;  %v1969_v48 = vunpack.i.l.bf16 %v1968_v46  ;;  %v458_v46 = vld [vmem:[%s2572_s7] sm:$0xff] }
 0x4ac   :  { %1737 = vmatpush3.bf16.msra.mxu0 %v1734_v44  ;;  %v1766_v56 = vpack.c.bf16 %v1975_v53, %v1974_v54  ;;  %1555 = vmatprep.mubr.msk.f32.mxu1 %vm112_vm5, %v458_v46 }
 0x4ad   :  { %1739 = vmatprep.subr.bf16.mxu0 %v1738_v45  ;;  %v1762_v50 = vpack.c.bf16 %v1970_v47, %v1969_v48  ;;  %v1983_v59 = vpop.permute.xlu0 %1982 }
 0x4ae   :  { %v1978_v55 = vpop.permute.xlu1 %1977  ;;  %v1985_v60 = vunpack.i.h.bf16 %v1983_v59  ;;  %v1984_v61 = vunpack.i.l.bf16 %v1983_v59 }
 0x4af   :  { %v1980_v57 = vunpack.i.h.bf16 %v1978_v55  ;;  %v1979_v58 = vunpack.i.l.bf16 %v1978_v55 }
 0x4b0   :  { %1741 = vmatpush3.bf16.msra.mxu0 %v1738_v45  ;;  %v1774_v2 = vpack.c.bf16 %v1985_v60, %v1984_v61 }
 0x4b1   :  { %1758 = vmatprep.subr.msk.bf16.mxu0 %vm2344_vm12, %v2324_v13  ;;  %v1770_v62 = vpack.c.bf16 %v1980_v57, %v1979_v58  ;;  %v1993_v5 = vpop.permute.xlu0 %1992  ;;  %v733_v57 = vld [vmem:[%s2573_s12] sm:$0xff] }
 0x4b2   :  { %v1988_v63 = vpop.permute.xlu1 %1987  ;;  %v1995_v7 = vunpack.i.h.bf16 %v1993_v5  ;;  %v1994_v8 = vunpack.i.l.bf16 %v1993_v5  ;;  %v731_v5 = vld [vmem:[%s2574_s11] sm:$0xff] }
 0x4b3   :  { %1541 = vmatmul.mubr.msk.f32.vlgmr.msra.gmra.mrb[0].mxu0 %vm112_vm5, %v330_v49  ;;  %v1990_v3 = vunpack.i.h.bf16 %v1988_v63  ;;  %v1989_v4 = vunpack.i.l.bf16 %v1988_v63 }
 0x4b4   :  { %1761 = vmatpush3.bf16.msk.msra.mxu0 %vm2344_vm12, %v2324_v13  ;;  %1586 = vmatprep.mubr.msk.f32.mxu0 %vm643_vm13, %v581_v51  ;;  %v1782_v10 = vpack.c.bf16 %v1995_v7, %v1994_v8 }
 0x4b5   :  { %1763 = vmatprep.subr.bf16.mxu0 %v1762_v50  ;;  %v1778_v9 = vpack.c.bf16 %v1990_v3, %v1989_v4  ;;  %v459_v4 = vld [vmem:[%s2572_s7 + $0x8] sm:$0xff] }
 0x4b8   :  { %1765 = vmatpush3.bf16.msra.mxu0 %v1762_v50 }
 0x4b9   :  { %1767 = vmatprep.subr.bf16.mxu0 %v1766_v56 }
 0x4bc   :  { %1769 = vmatpush3.bf16.msra.mxu0 %v1766_v56  ;;  %v734_v56 = vld [vmem:[%s2573_s12 + $0x8] sm:$0xff] }
 0x4bd   :  { %1771 = vmatprep.subr.bf16.mxu0 %v1770_v62 }
 0x4c0   :  { %1773 = vmatpush3.bf16.msra.mxu0 %v1770_v62 }
 0x4c1   :  { %1775 = vmatprep.subr.bf16.mxu0 %v1774_v2 }
 0x4c2   :  { %v369_v13 = vpop.permute.xlu0 %368 }
 0x4c3   :  { %v364_v16 = vpop.permute.xlu1 %363 }
 0x4c4   :  { %1777 = vmatpush3.bf16.msra.mxu0 %v1774_v2 }
 0x4c5   :  { %1779 = vmatprep.subr.bf16.mxu0 %v1778_v9 }
 0x4c6   :  { %v641_v25 = vpop.permute.xlu0 %640 }
 0x4c7   :  { %v636_v28 = vpop.permute.xlu1 %635 }
 0x4c8   :  { %1781 = vmatpush3.bf16.msra.mxu0 %v1778_v9 }
 0x4c9   :  { %1783 = vmatprep.subr.bf16.mxu0 %v1782_v10 }
 0x4cc   :  { %1785 = vmatpush3.bf16.msra.mxu0 %v1782_v10 }
 0x4cf   :  { %1587 = vmatmul.mubr.msk.f32.vlgmr.msra.gmra.mrb[2].mxu0 %vm643_vm13, %v582_v11 }
 0x586   :  { %v1542_v15 = vpop.f32.mrb[0].mxu0 }
 0x587   :  { %v449_v17 = vadd.f32 %v1542_v15, %v369_v13  ;;  %v443_v18 = vpop.f32.mrb[1].mxu0 }
 0x588   :  { %v444_v19 = vadd.f32 %v443_v18, %v364_v16 }
 0x589   :  { %vm453_vm14 = vcmp.gt.f32.partialorder %v449_v17, 0.0  ;;  %v455_v20 = vmul.f32 0.1, %v449_v17 }
 0x58a   :  { %vm452_vm15 = vcmp.gt.f32.partialorder %v444_v19, 0.0  ;;  %v454_v21 = vmul.f32 0.1, %v444_v19 }
 0x58b   :  { %v457_v22 = vsel %vm453_vm14, %v449_v17, %v455_v20  ;;  %vm1817_vm14 = vmpackc.low %vm899_vm10, %vm899_vm10 }
 0x58c   :  { %v456_v23 = vsel %vm452_vm15, %v444_v19, %v454_v21 }
 0x58d   :  { %v1996_v24 = vpack.i.bf16 %v457_v22, %v456_v23 }
 0x58f   :  { %1997 = vrot.lane.b32.xlu1 %v1996_v24, %s2131_s22 }
 0x5a2   :  { %v1588_v27 = vpop.f32.mrb[2].mxu0 }
 0x5a3   :  { %v722_v29 = vadd.f32 %v1588_v27, %v641_v25  ;;  %v716_v30 = vpop.f32.mrb[3].mxu0 }
 0x5a4   :  { %v717_v31 = vadd.f32 %v716_v30, %v636_v28 }
 0x5a5   :  { %vm726_vm0 = vcmp.gt.f32.partialorder %v722_v29, 0.0  ;;  %v728_v32 = vmul.f32 0.1, %v722_v29 }
 0x5a6   :  { %vm725_vm1 = vcmp.gt.f32.partialorder %v717_v31, 0.0  ;;  %v727_v33 = vmul.f32 0.1, %v717_v31 }
 0x5a7   :  { %v730_v34 = vsel %vm726_vm0, %v722_v29, %v728_v32 }
 0x5a8   :  { %v729_v35 = vsel %vm725_vm1, %v717_v31, %v727_v33 }
 0x5a9   :  { %v2001_v36 = vpack.i.bf16 %v730_v34, %v729_v35  ;;  %v732_v34 = vld [vmem:[%s2574_s11 + $0x8] sm:$0xff]  ;;  %s2140_s11 = smov 9  }
 0x5ab   :  { %2002 = vrot.lane.b32.xlu0 %v2001_v36, %s2135_s4 }
 0x601   :  { %v1998_v37 = vpop.permute.xlu1 %1997 }
 0x602   :  { %v2000_v38 = vunpack.i.h.bf16 %v1998_v37  ;;  %v1999_v39 = vunpack.i.l.bf16 %v1998_v37 }
 0x604   :  { %v471_v40 = vsel %vm82_vm2, 0.0, %v2000_v38  ;;  %v470_v41 = vsel %vm82_vm2, 0.0, %v1999_v39 }
 0x605   :  { %v473_v42 = vsel %vm85_vm3, %v471_v40, 0.0  ;;  %v472_v43 = vsel %vm85_vm3, %v470_v41, 0.0  ;;  %v1742_v44 = vpack.c.bf16 %v471_v40, %v470_v41 }
 0x606   :  { %v2011_v45 = vpack.i.bf16 %v473_v42, %v472_v43 }
 0x607   :  { %1744 = vmatprep.subr.msk.bf16.mxu1 %vm2269_vm4, %v1742_v44 }
 0x608   :  { %1747 = vmatpush3.bf16.msk.msra.mxu1 %vm2269_vm4, %v1742_v44  ;;  %2012 = vrot.lane.b32.xlu0 %v2011_v45, %s2132_s25 }
 0x609   :  { %2007 = vrot.lane.b32.xlu1 %v2011_v45, %s2133_s3 }
 0x61d   :  { %v2003_v47 = vpop.permute.xlu0 %2002 }
 0x61e   :  { %v2005_v48 = vunpack.i.h.bf16 %v2003_v47  ;;  %v2004_v49 = vunpack.i.l.bf16 %v2003_v47 }
 0x620   :  { %v744_v50 = vsel %vm341_vm8, 0.0, %v2005_v48  ;;  %v743_v51 = vsel %vm341_vm8, 0.0, %v2004_v49 }
 0x621   :  { %v746_v52 = vsel %vm344_vm11, %v744_v50, 0.0  ;;  %v745_v53 = vsel %vm344_vm11, %v743_v51, 0.0  ;;  %v1786_v54 = vpack.c.bf16 %v744_v50, %v743_v51 }
 0x622   :  { %v2021_v55 = vpack.i.bf16 %v746_v52, %v745_v53 }
 0x624   :  { %2022 = vrot.lane.b32.xlu0 %v2021_v55, %s2132_s25  ;;  %2017 = vrot.lane.b32.xlu1 %v2021_v55, %s2133_s3 }
 0x628   :  { %2032 = vrot.lane.b32.xlu0 %v2021_v55, %s2138_s1  ;;  %2027 = vrot.lane.b32.xlu1 %v2021_v55, %s2137_s21 }
 0x62c   :  { %2042 = vrot.lane.b32.xlu0 %v2021_v55, %s2136_s20  ;;  %2037 = vrot.lane.b32.xlu1 %v2021_v55, %s2139_s2  ;;  %v887_v55 = vld [vmem:[%s2575_s14 + $0x8] sm:$0xff] }
 0x630   :  { %792 = vperm.xlu0 %1930, %v734_v56   ;;  %787 = vperm.xlu1 %1929, %v733_v57   ;;  %v886_v56 = vld [vmem:[%s2575_s14] sm:$0xff] }
 0x631   :  { %v884_v57 = vld [vmem:[%s2576_s13] sm:$0xff] }
 0x632   :  { %1648 = vmatprep.mubr.msk.f32.mxu0 %vm643_vm13, %v884_v57 }
 0x67a   :  { %v2013_v58 = vpop.permute.xlu0 %2012 }
 0x67b   :  { %v2008_v59 = vpop.permute.xlu1 %2007  ;;  %v2015_v60 = vunpack.i.h.bf16 %v2013_v58  ;;  %v2014_v61 = vunpack.i.l.bf16 %v2013_v58 }
 0x67c   :  { %v2010_v62 = vunpack.i.h.bf16 %v2008_v59  ;;  %v2009_v63 = vunpack.i.l.bf16 %v2008_v59 }
 0x67d   :  { %v1752_v3 = vpack.c.bf16 %v2015_v60, %v2014_v61 }
 0x67e   :  { %v1748_v2 = vpack.c.bf16 %v2010_v62, %v2009_v63 }
 0x680   :  { %1749 = vmatprep.subr.bf16.mxu1 %v1748_v2 }
 0x681   :  { %1751 = vmatpush3.bf16.msra.mxu1 %v1748_v2 }
 0x682   :  { %1753 = vmatprep.subr.bf16.mxu1 %v1752_v3 }
 0x685   :  { %1755 = vmatpush3.bf16.msra.mxu1 %v1752_v3 }
 0x686   :  { %1788 = vmatprep.subr.msk.bf16.mxu1 %vm2344_vm12, %v1786_v54 }
 0x688   :  { %1556 = vmatmul.mubr.msk.f32.vlgmr.msra.gmra.mrb[4].mxu1 %vm112_vm5, %v459_v4 }
 0x689   :  { %1791 = vmatpush3.bf16.msk.msra.mxu1 %vm2344_vm12, %v1786_v54  ;;  %1617 = vmatprep.mubr.msk.f32.mxu1 %vm643_vm13, %v731_v5 }
 0x696   :  { %v2023_v7 = vpop.permute.xlu0 %2022  ;;  %v2018_v8 = vpop.permute.xlu1 %2017 }
 0x697   :  { %v2025_v9 = vunpack.i.h.bf16 %v2023_v7  ;;  %v2024_v10 = vunpack.i.l.bf16 %v2023_v7  ;;  %v2020_v11 = vunpack.i.h.bf16 %v2018_v8  ;;  %v2019_v13 = vunpack.i.l.bf16 %v2018_v8 }
 0x699   :  { %v1792_v15 = vpack.c.bf16 %v2020_v11, %v2019_v13  ;;  %v1796_v17 = vpack.c.bf16 %v2025_v9, %v2024_v10 }
 0x69a   :  { %v2028_v16 = vpop.permute.xlu1 %2027  ;;  %v2033_v20 = vpop.permute.xlu0 %2032 }
 0x69b   :  { %v2030_v18 = vunpack.i.h.bf16 %v2028_v16  ;;  %v2029_v19 = vunpack.i.l.bf16 %v2028_v16  ;;  %1793 = vmatprep.subr.bf16.mxu1 %v1792_v15  ;;  %v2035_v21 = vunpack.i.h.bf16 %v2033_v20  ;;  %v2034_v22 = vunpack.i.l.bf16 %v2033_v20 }
 0x69c   :  { %1795 = vmatpush3.bf16.msra.mxu1 %v1792_v15 }
 0x69d   :  { %1797 = vmatprep.subr.bf16.mxu1 %v1796_v17  ;;  %v1800_v23 = vpack.c.bf16 %v2030_v18, %v2029_v19  ;;  %v1804_v25 = vpack.c.bf16 %v2035_v21, %v2034_v22 }
 0x69e   :  { %v2038_v24 = vpop.permute.xlu1 %2037  ;;  %v2043_v29 = vpop.permute.xlu0 %2042 }
 0x69f   :  { %v2040_v27 = vunpack.i.h.bf16 %v2038_v24  ;;  %v2039_v28 = vunpack.i.l.bf16 %v2038_v24  ;;  %v2045_v30 = vunpack.i.h.bf16 %v2043_v29  ;;  %v2044_v31 = vunpack.i.l.bf16 %v2043_v29 }
 0x6a0   :  { %1799 = vmatpush3.bf16.msra.mxu1 %v1796_v17 }
 0x6a1   :  { %1801 = vmatprep.subr.bf16.mxu1 %v1800_v23  ;;  %v1808_v32 = vpack.c.bf16 %v2040_v27, %v2039_v28  ;;  %v1812_v33 = vpack.c.bf16 %v2045_v30, %v2044_v31 }
 0x6a4   :  { %1803 = vmatpush3.bf16.msra.mxu1 %v1800_v23  ;;  %v885_v23 = vld [vmem:[%s2576_s13 + $0x8] sm:$0xff] }
 0x6a5   :  { %1805 = vmatprep.subr.bf16.mxu1 %v1804_v25 }
 0x6a8   :  { %1807 = vmatpush3.bf16.msra.mxu1 %v1804_v25 }
 0x6a9   :  { %1809 = vmatprep.subr.bf16.mxu1 %v1808_v32 }
 0x6ac   :  { %1811 = vmatpush3.bf16.msra.mxu1 %v1808_v32 }
 0x6ad   :  { %1813 = vmatprep.subr.bf16.mxu1 %v1812_v33 }
 0x6af   :  { %v793_v35 = vpop.permute.xlu0 %792  ;;  %v788_v37 = vpop.permute.xlu1 %787 }
 0x6b0   :  { %1815 = vmatpush3.bf16.msra.mxu1 %v1812_v33 }
 0x6b3   :  { %1618 = vmatmul.mubr.msk.f32.vlgmr.msra.gmra.mrb[6].mxu1 %vm643_vm13, %v732_v34 }
 0x786   :  { %v1619_v36 = vpop.f32.mrb[6].mxu1 }
 0x787   :  { %v873_v38 = vadd.f32 %v1619_v36, %v793_v35  ;;  %v867_v39 = vpop.f32.mrb[7].mxu1 }
 0x788   :  { %v868_v40 = vadd.f32 %v867_v39, %v788_v37 }
 0x789   :  { %v2446_v41 = vadd.f32 %v873_v38, %v2253_v1 }
 0x78a   :  { %v2449_v42 = vadd.f32 %v868_v40, %v2248_v0 }
 0x78b   :  { %vm879_vm6 = vcmp.gt.f32.partialorder %v2446_v41, 0.0  ;;  %v881_v43 = vmul.f32 0.1, %v2446_v41 }
 0x78c   :  { %vm878_vm7 = vcmp.gt.f32.partialorder %v2449_v42, 0.0  ;;  %v880_v44 = vmul.f32 0.1, %v2449_v42 }
 0x78d   :  { %v883_v45 = vsel %vm879_vm6, %v2446_v41, %v881_v43 }
 0x78e   :  { %v882_v46 = vsel %vm878_vm7, %v2449_v42, %v880_v44 }
 0x78f   :  { %v2046_v47 = vpack.i.bf16 %v883_v45, %v882_v46 }
 0x791   :  { %2047 = vrot.lane.b32.xlu1 %v2046_v47, %s2140_s11  ;;  %v461_v47 = vld [vmem:[%s2577_s8 + $0x8] sm:$0xff] }
 0x803   :  { %v2048_v1 = vpop.permute.xlu1 %2047 }
 0x804   :  { %v2050_v0 = vunpack.i.h.bf16 %v2048_v1  ;;  %v2049_v48 = vunpack.i.l.bf16 %v2048_v1  ;;  %v1040_v1 = vld [vmem:[%s2578_s16 + $0x8] sm:$0xff] }
 0x806   :  { %v898_v49 = vsel %vm896_vm9, 0.0, %v2050_v0  ;;  %v897_v50 = vsel %vm896_vm9, 0.0, %v2049_v48  ;;  %v1039_v0 = vld [vmem:[%s2578_s16] sm:$0xff] }
 0x807   :  { %v901_v51 = vsel %vm899_vm10, %v898_v49, 0.0  ;;  %v900_v52 = vsel %vm899_vm10, %v897_v50, 0.0  ;;  %v1816_v53 = vpack.c.bf16 %v898_v49, %v897_v50  ;;  %v1037_v48 = vld [vmem:[%s2579_s15] sm:$0xff] }
 0x808   :  { %v2056_v54 = vpack.i.bf16 %v901_v51, %v900_v52  ;;  %1679 = vmatprep.mubr.msk.f32.mxu1 %vm643_vm13, %v1037_v48 }
 0x809   :  { %1818 = vmatprep.subr.msk.bf16.mxu0 %vm1817_vm14, %v1816_v53 }
 0x80a   :  { %1821 = vmatpush3.bf16.msk.msra.mxu0 %vm1817_vm14, %v1816_v53  ;;  %2057 = vrot.lane.b32.xlu1 %v2056_v54, %s2136_s20 }
 0x80b   :  { %2052 = vrot.lane.b32.xlu0 %v2056_v54, %s2137_s21 }
 0x80e   :  { %2067 = vrot.lane.b32.xlu1 %v2056_v54, %s2141_s5 }
 0x80f   :  { %2062 = vrot.lane.b32.xlu0 %v2056_v54, %s2142_s26 }
 0x812   :  { %2077 = vrot.lane.b32.xlu1 %v2056_v54, %s2143_s9 }
 0x813   :  { %2072 = vrot.lane.b32.xlu0 %v2056_v54, %s2144_s27 }
 0x816   :  { %947 = vperm.xlu1 %1929, %v887_v55  }
 0x817   :  { %942 = vperm.xlu0 %1930, %v886_v56  }
 0x87c   :  { %v2058_v58 = vpop.permute.xlu1 %2057 }
 0x87d   :  { %v2053_v59 = vpop.permute.xlu0 %2052  ;;  %v2060_v60 = vunpack.i.h.bf16 %v2058_v58  ;;  %v2059_v61 = vunpack.i.l.bf16 %v2058_v58 }
 0x87e   :  { %v2055_v62 = vunpack.i.h.bf16 %v2053_v59  ;;  %v2054_v63 = vunpack.i.l.bf16 %v2053_v59 }
 0x87f   :  { %v1826_v4 = vpack.c.bf16 %v2060_v60, %v2059_v61 }
 0x880   :  { %v1822_v2 = vpack.c.bf16 %v2055_v62, %v2054_v63  ;;  %v2068_v8 = vpop.permute.xlu1 %2067 }
 0x881   :  { %v2063_v3 = vpop.permute.xlu0 %2062  ;;  %v2070_v9 = vunpack.i.h.bf16 %v2068_v8  ;;  %v2069_v10 = vunpack.i.l.bf16 %v2068_v8 }
 0x882   :  { %v2065_v5 = vunpack.i.h.bf16 %v2063_v3  ;;  %v2064_v7 = vunpack.i.l.bf16 %v2063_v3  ;;  %1823 = vmatprep.subr.bf16.mxu0 %v1822_v2 }
 0x883   :  { %1825 = vmatpush3.bf16.msra.mxu0 %v1822_v2  ;;  %v1834_v15 = vpack.c.bf16 %v2070_v9, %v2069_v10 }
 0x884   :  { %1827 = vmatprep.subr.bf16.mxu0 %v1826_v4  ;;  %v1830_v11 = vpack.c.bf16 %v2065_v5, %v2064_v7  ;;  %v2078_v18 = vpop.permute.xlu1 %2077 }
 0x885   :  { %v2073_v13 = vpop.permute.xlu0 %2072  ;;  %v2080_v19 = vunpack.i.h.bf16 %v2078_v18  ;;  %v2079_v20 = vunpack.i.l.bf16 %v2078_v18 }
 0x886   :  { %v2075_v16 = vunpack.i.h.bf16 %v2073_v13  ;;  %v2074_v17 = vunpack.i.l.bf16 %v2073_v13  ;;  %v1038_v13 = vld [vmem:[%s2579_s15 + $0x8] sm:$0xff] }
 0x887   :  { %1829 = vmatpush3.bf16.msra.mxu0 %v1826_v4  ;;  %v1842_v22 = vpack.c.bf16 %v2080_v19, %v2079_v20 }
 0x888   :  { %1831 = vmatprep.subr.bf16.mxu0 %v1830_v11  ;;  %v1838_v21 = vpack.c.bf16 %v2075_v16, %v2074_v17 }
 0x88b   :  { %1833 = vmatpush3.bf16.msra.mxu0 %v1830_v11 }
 0x88c   :  { %1835 = vmatprep.subr.bf16.mxu0 %v1834_v15 }
 0x88f   :  { %1837 = vmatpush3.bf16.msra.mxu0 %v1834_v15 }
 0x890   :  { %1839 = vmatprep.subr.bf16.mxu0 %v1838_v21 }
 0x893   :  { %1841 = vmatpush3.bf16.msra.mxu0 %v1838_v21 }
 0x894   :  { %1843 = vmatprep.subr.bf16.mxu0 %v1842_v22 }
 0x895   :  { %v948_v24 = vpop.permute.xlu1 %947 }
 0x896   :  { %v943_v27 = vpop.permute.xlu0 %942 }
 0x897   :  { %1845 = vmatpush3.bf16.msra.mxu0 %v1842_v22 }
 0x89a   :  { %1649 = vmatmul.mubr.msk.f32.vlgmr.msra.gmra.mrb[4].mxu0 %vm643_vm13, %v885_v23 }
 0x96d   :  { %v1650_v25 = vpop.f32.mrb[4].mxu0 }
 0x96e   :  { %v1028_v28 = vadd.f32 %v1650_v25, %v948_v24  ;;  %v1022_v29 = vpop.f32.mrb[5].mxu0 }
 0x96f   :  { %v1023_v30 = vadd.f32 %v1022_v29, %v943_v27 }
 0x970   :  { %vm1032_vm15 = vcmp.gt.f32.partialorder %v1028_v28, 0.0  ;;  %v1034_v31 = vmul.f32 0.1, %v1028_v28 }
 0x971   :  { %vm1031_vm0 = vcmp.gt.f32.partialorder %v1023_v30, 0.0  ;;  %v1033_v32 = vmul.f32 0.1, %v1023_v30 }
 0x972   :  { %v1036_v33 = vsel %vm1032_vm15, %v1028_v28, %v1034_v31 }
 0x973   :  { %v1035_v34 = vsel %vm1031_vm0, %v1023_v30, %v1033_v32 }
 0x974   :  { %v2081_v35 = vpack.i.bf16 %v1036_v33, %v1035_v34 }
 0x976   :  { %2082 = vrot.lane.b32.xlu0 %v2081_v35, %s2135_s4 }
 0x9e8   :  { %v2083_v36 = vpop.permute.xlu0 %2082 }
 0x9e9   :  { %v2085_v37 = vunpack.i.h.bf16 %v2083_v36  ;;  %v2084_v38 = vunpack.i.l.bf16 %v2083_v36 }
 0x9eb   :  { %v1050_v39 = vsel %vm341_vm8, 0.0, %v2085_v37  ;;  %v1049_v40 = vsel %vm341_vm8, 0.0, %v2084_v38 }
 0x9ec   :  { %v1052_v43 = vsel %vm344_vm11, %v1050_v39, 0.0  ;;  %v1051_v44 = vsel %vm344_vm11, %v1049_v40, 0.0  ;;  %v1846_v45 = vpack.c.bf16 %v1050_v39, %v1049_v40 }
 0x9ed   :  { %v2091_v46 = vpack.i.bf16 %v1052_v43, %v1051_v44  ;;  %v1194_v44 = vld [vmem:[%s2580_s17] sm:$0xff] }
 0x9ee   :  { %1848 = vmatprep.subr.msk.bf16.mxu1 %vm2344_vm12, %v1846_v45  ;;  %1694 = vmatprep.mubr.msk.f32.mxu0 %vm112_vm5, %v1194_v44 }
 0x9ef   :  { %1851 = vmatpush3.bf16.msk.msra.mxu1 %vm2344_vm12, %v1846_v45  ;;  %2092 = vrot.lane.b32.xlu0 %v2091_v46, %s2132_s25  ;;  %v1199_v45 = vld [vmem:[%s2581_s18 + $0x8] sm:$0xff] }
 0x9f0   :  { %2087 = vrot.lane.b32.xlu1 %v2091_v46, %s2133_s3 }
 0x9f3   :  { %2102 = vrot.lane.b32.xlu0 %v2091_v46, %s2138_s1 }
 0x9f4   :  { %2097 = vrot.lane.b32.xlu1 %v2091_v46, %s2137_s21 }
 0x9f7   :  { %2112 = vrot.lane.b32.xlu0 %v2091_v46, %s2136_s20 }
 0x9f8   :  { %2107 = vrot.lane.b32.xlu1 %v2091_v46, %s2139_s2  ;;  %v1198_v46 = vld [vmem:[%s2581_s18] sm:$0xff] }
 0x9fb   :  { %495 = vperm.xlu0 %1930, %v461_v47   ;;  %v1201_v47 = vld [vmem:[%s2581_s18 + $0x18] sm:$0xff] }
 0x9fc   :  { %490 = vperm.xlu1 %1929, %v460_v26  }
 0x9ff   :  { %1098 = vperm.xlu0 %1930, %v1040_v1  }
 0xa00   :  { %1093 = vperm.xlu1 %1929, %v1039_v0  }
 0xa61   :  { %v2093_v49 = vpop.permute.xlu0 %2092 }
 0xa62   :  { %v2088_v50 = vpop.permute.xlu1 %2087  ;;  %v2095_v51 = vunpack.i.h.bf16 %v2093_v49  ;;  %v2094_v52 = vunpack.i.l.bf16 %v2093_v49 }
 0xa63   :  { %v2090_v53 = vunpack.i.h.bf16 %v2088_v50  ;;  %v2089_v54 = vunpack.i.l.bf16 %v2088_v50 }
 0xa64   :  { %v1856_v57 = vpack.c.bf16 %v2095_v51, %v2094_v52 }
 0xa65   :  { %v1852_v55 = vpack.c.bf16 %v2090_v53, %v2089_v54  ;;  %v2103_v60 = vpop.permute.xlu0 %2102  ;;  %v1195_v53 = vld [vmem:[%s2580_s17 + $0x8] sm:$0xff]  ;;  %v1196_v54 = vld [vmem:[%s2580_s17 + $0x10] sm:$0xff] }
 0xa66   :  { %v2098_v56 = vpop.permute.xlu1 %2097  ;;  %v2105_v61 = vunpack.i.h.bf16 %v2103_v60  ;;  %v2104_v62 = vunpack.i.l.bf16 %v2103_v60 }
 0xa67   :  { %v2100_v58 = vunpack.i.h.bf16 %v2098_v56  ;;  %v2099_v59 = vunpack.i.l.bf16 %v2098_v56  ;;  %1853 = vmatprep.subr.bf16.mxu1 %v1852_v55 }
 0xa68   :  { %1855 = vmatpush3.bf16.msra.mxu1 %v1852_v55  ;;  %v1864_v3 = vpack.c.bf16 %v2105_v61, %v2104_v62  ;;  %v1197_v55 = vld [vmem:[%s2580_s17 + $0x18] sm:$0xff] }
 0xa69   :  { %1857 = vmatprep.subr.bf16.mxu1 %v1856_v57  ;;  %v1860_v63 = vpack.c.bf16 %v2100_v58, %v2099_v59  ;;  %v2113_v7 = vpop.permute.xlu0 %2112 }
 0xa6a   :  { %v2108_v2 = vpop.permute.xlu1 %2107  ;;  %v2115_v8 = vunpack.i.h.bf16 %v2113_v7  ;;  %v2114_v9 = vunpack.i.l.bf16 %v2113_v7 }
 0xa6b   :  { %v2110_v4 = vunpack.i.h.bf16 %v2108_v2  ;;  %v2109_v5 = vunpack.i.l.bf16 %v2108_v2 }
 0xa6c   :  { %1859 = vmatpush3.bf16.msra.mxu1 %v1856_v57  ;;  %v1872_v11 = vpack.c.bf16 %v2115_v8, %v2114_v9 }
 0xa6d   :  { %1861 = vmatprep.subr.bf16.mxu1 %v1860_v63  ;;  %v1868_v10 = vpack.c.bf16 %v2110_v4, %v2109_v5 }
 0xa70   :  { %1863 = vmatpush3.bf16.msra.mxu1 %v1860_v63 }
 0xa71   :  { %1865 = vmatprep.subr.bf16.mxu1 %v1864_v3 }
 0xa74   :  { %1867 = vmatpush3.bf16.msra.mxu1 %v1864_v3 }
 0xa75   :  { %1869 = vmatprep.subr.bf16.mxu1 %v1868_v10 }
 0xa78   :  { %1871 = vmatpush3.bf16.msra.mxu1 %v1868_v10 }
 0xa79   :  { %1873 = vmatprep.subr.bf16.mxu1 %v1872_v11 }
 0xa7a   :  { %v496_v15 = vpop.permute.xlu0 %495 }
 0xa7b   :  { %v491_v16 = vpop.permute.xlu1 %490  ;;  %v1890_v17 = vadd.f32 %v496_v15, %v2327_v14 }
 0xa7c   :  { %1875 = vmatpush3.bf16.msra.mxu1 %v1872_v11  ;;  %v1894_v18 = vadd.f32 %v491_v16, %v2330_v6 }
 0xa7d   :  { %v1891_v19 = vadd.f32 %v1890_v17, %v2446_v41 }
 0xa7e   :  { %v1099_v20 = vpop.permute.xlu0 %1098  ;;  %v1895_v21 = vadd.f32 %v1894_v18, %v2449_v42 }
 0xa7f   :  { %1680 = vmatmul.mubr.msk.f32.vlgmr.msra.gmra.mrb[4].mxu1 %vm643_vm13, %v1038_v13  ;;  %v1094_v22 = vpop.permute.xlu1 %1093  ;;  %v1892_v23 = vadd.f32 %v1891_v19, %v1099_v20 }
 0xa80   :  { %v1896_v24 = vadd.f32 %v1895_v21, %v1094_v22 }
 0xb52   :  { %v1681_v25 = vpop.f32.mrb[4].mxu1 }
 0xb53   :  { %v1893_v27 = vadd.f32 %v1892_v23, %v1681_v25  ;;  %v1173_v28 = vpop.f32.mrb[5].mxu1 }
 0xb54   :  { %v1897_v29 = vadd.f32 %v1896_v24, %v1173_v28 }
 0xb55   :  { %v1187_v30 = vmul.f32 0.5, %v1893_v27 }
 0xb56   :  { %v1186_v31 = vmul.f32 0.5, %v1897_v29 }
 0xb57   :  { %vm1189_vm8 = vcmp.gt.f32.partialorder %v1187_v30, 0.0  ;;  %v1191_v32 = vmul.f32 0.1, %v1187_v30 }
 0xb58   :  { %vm1188_vm11 = vcmp.gt.f32.partialorder %v1186_v31, 0.0  ;;  %v1190_v14 = vmul.f32 0.1, %v1186_v31 }
 0xb59   :  { %v1193_v33 = vsel %vm1189_vm8, %v1187_v30, %v1191_v32 }
 0xb5a   :  { %v1192_v6 = vsel %vm1188_vm11, %v1186_v31, %v1190_v14 }
 0xb5b   :  { %v2116_v34 = vpack.i.bf16 %v1193_v33, %v1192_v6 }
 0xb5d   :  { %2117 = vrot.lane.b32.xlu1 %v2116_v34, %s2131_s22 }
 0xbcf   :  { %v2118_v41 = vpop.permute.xlu1 %2117 }
 0xbd0   :  { %v2120_v42 = vunpack.i.h.bf16 %v2118_v41  ;;  %v2119_v35 = vunpack.i.l.bf16 %v2118_v41 }
 0xbd2   :  { %v1211_v36 = vsel %vm82_vm2, 0.0, %v2120_v42  ;;  %v1210_v37 = vsel %vm82_vm2, 0.0, %v2119_v35  ;;  %vm1345_vm2 = vcmask 523264  }
 0xbd3   :  { %v1213_v38 = vsel %vm85_vm3, %v1211_v36, 0.0  ;;  %v1212_v39 = vsel %vm85_vm3, %v1210_v37, 0.0  ;;  %v1876_v40 = vpack.c.bf16 %v1211_v36, %v1210_v37 }
 0xbd4   :  { %v2126_v43 = vpack.i.bf16 %v1213_v38, %v1212_v39 }
 0xbd5   :  { %1878 = vmatprep.subr.msk.bf16.mxu0 %vm2269_vm4, %v1876_v40 }
 0xbd6   :  { %1881 = vmatpush3.bf16.msk.msra.mxu0 %vm2269_vm4, %v1876_v40  ;;  %2127 = vrot.lane.b32.xlu1 %v2126_v43, %s2132_s25 }
 0xbd7   :  { %2122 = vrot.lane.b32.xlu0 %v2126_v43, %s2133_s3 }
 0xbda   :  { %1235 = vperm.xlu1 %1929, %v1199_v45  }
 0xbdb   :  { %1230 = vperm.xlu0 %1930, %v1198_v46  }
 0xbde   :  { %1245 = vperm.xlu1 %1929, %v1201_v47  }
 0xbdf   :  { %1240 = vperm.xlu0 %1930, %v1200_v12  }
 0xc48   :  { %v2128_v26 = vpop.permute.xlu1 %2127 }
 0xc49   :  { %v2123_v1 = vpop.permute.xlu0 %2122  ;;  %v2130_v0 = vunpack.i.h.bf16 %v2128_v26  ;;  %v2129_v48 = vunpack.i.l.bf16 %v2128_v26 }
 0xc4a   :  { %v2125_v49 = vunpack.i.h.bf16 %v2123_v1  ;;  %v2124_v50 = vunpack.i.l.bf16 %v2123_v1 }
 0xc4b   :  { %v1886_v52 = vpack.c.bf16 %v2130_v0, %v2129_v48 }
 0xc4c   :  { %v1882_v51 = vpack.c.bf16 %v2125_v49, %v2124_v50 }
 0xc4e   :  { %1883 = vmatprep.subr.bf16.mxu0 %v1882_v51 }
 0xc4f   :  { %1885 = vmatpush3.bf16.msra.mxu0 %v1882_v51 }
 0xc50   :  { %1887 = vmatprep.subr.bf16.mxu0 %v1886_v52 }
 0xc53   :  { %1889 = vmatpush3.bf16.msra.mxu0 %v1886_v52 }
 0xc56   :  { %1695 = vmatmul.mubr.msk.f32.vlgmr.msra.gmra.mrb[6].mxu0 %vm112_vm5, %v1195_v53 }
 0xc57   :  { %1697 = vmatprep.mubr.msk.f32.mxu0 %vm112_vm5, %v1196_v54 }
 0xc59   :  { %v1236_v56 = vpop.permute.xlu1 %1235 }
 0xc5a   :  { %1698 = vmatmul.mubr.msk.f32.gmra.mrb[8].mxu0 %vm112_vm5, %v1197_v55  ;;  %v1231_v57 = vpop.permute.xlu0 %1230 }
 0xc5d   :  { %v1246_v62 = vpop.permute.xlu1 %1245 }
 0xc5e   :  { %v1241_v2 = vpop.permute.xlu0 %1240 }
 0xd29   :  { %v1696_v58 = vpop.f32.mrb[6].mxu0 }
 0xd2a   :  { %v1332_v59 = vadd.f32 %v1696_v58, %v1236_v56  ;;  %v1326_v60 = vpop.f32.mrb[7].mxu0 }
 0xd2b   :  { %v1327_v61 = vadd.f32 %v1326_v60, %v1231_v57 }
 0xd2c   :  { %1347 = vst.msk [vmem:[%s2582_s19 + $0x8] sm:$0xff] %vm1345_vm2, %v1332_v59 }
 0xd2d   :  { %1346 = vst.msk [vmem:[%s2582_s19] sm:$0xff] %vm1345_vm2, %v1327_v61  ;;  %v1699_v63 = vpop.f32.mrb[8].mxu0 }
 0xd2e   :  { %v1342_v3 = vadd.f32 %v1699_v63, %v1246_v62  ;;  %v1336_v4 = vpop.f32.mrb[9].mxu0 }
 0xd2f   :  { %v1337_v5 = vadd.f32 %v1336_v4, %v1241_v2 }
 0xd30   :  { %1349 = vst.msk [vmem:[%s2582_s19 + $0x18] sm:$0xff] %vm1345_vm2, %v1342_v3 }
 0xd31   :  { %1348 = vst.msk [vmem:[%s2582_s19 + $0x10] sm:$0xff] %vm1345_vm2, %v1337_v5 }

// kernel: forward.5
= control target key start
LH: loop header
LB: loop body
LE: loop exit
PB: predicated region body
PF: predicated region fallthrough
CT: control target
= control target key end

     0   :  { %s2233_s0 = inlined_call_operand.vmem [shape: f32[8,256], index: 0, kind: input, shape index: {}]   ;;  %s2234_s1 = inlined_call_operand.vmem [shape: f32[8,24], index: 1, kind: input, shape index: {}]   ;;  %s2235_s2 = inlined_call_operand.vmem [shape: f32[8,1], index: 2, kind: input, shape index: {}]   ;;  %s2236_s3 = inlined_call_operand.vmem [shape: f32[8,24], index: 3, kind: input, shape index: {}]   ;;  %s2237_s4 = inlined_call_operand.vmem [shape: f32[8,1], index: 4, kind: input, shape index: {}]   ;;  %s2238_s5 = inlined_call_operand.vmem [shape: f32[8,24], index: 5, kind: input, shape index: {}]   ;;  %s2239_s6 = inlined_call_operand.vmem [shape: f32[8,1], index: 6, kind: input, shape index: {}]   ;;  %s2240_s7 = inlined_call_operand.vmem [shape: f32[8,24], index: 7, kind: input, shape index: {}]   ;;  %s2241_s8 = inlined_call_operand.vmem [shape: f32[8,1], index: 8, kind: input, shape index: {}]   ;;  %s2242_s9 = inlined_call_operand.vmem [shape: f32[8,56], index: 9, kind: input, shape index: {}]   ;;  %s2243_s10 = inlined_call_operand.vmem [shape: f32[8,1], index: 10, kind: input, shape index: {}]   ;;  %s2244_s11 = inlined_call_operand.vmem [shape: f32[8,56], index: 11, kind: input, shape index: {}]   ;;  %s2245_s12 = inlined_call_operand.vmem [shape: f32[8,1], index: 12, kind: input, shape index: {}]   ;;  %s2246_s13 = inlined_call_operand.vmem [shape: f32[8,56], index: 13, kind: input, shape index: {}]   ;;  %s2247_s14 = inlined_call_operand.vmem [shape: f32[8,1], index: 14, kind: input, shape index: {}]   ;;  %s2248_s15 = inlined_call_operand.vmem [shape: f32[8,56], index: 15, kind: input, shape index: {}]   ;;  %s2249_s16 = inlined_call_operand.vmem [shape: f32[8,1], index: 16, kind: input, shape index: {}]   ;;  %s2250_s17 = inlined_call_operand.vmem [shape: f32[1,56], index: 17, kind: input, shape index: {}]   ;;  %s2251_s18 = inlined_call_operand.<no memory space> [shape: f32[1,1], index: 18, kind: input, shape index: {}]   ;;  %s2252_s19 = inlined_call_operand.hbm [shape: f32[1,256], index: 19, kind: output, shape index: {}]  }
   0x1   :  { %2255 = sst [smem:[#allocation6_spill]] %s2233_s0  ;;  %v24_v0 = vstv %s2251_s18 }
   0x2   :  { %2256 = sst [smem:[#allocation7_spill]] %s2234_s1  ;;  %25 = vst [vmem:[#allocation2] sm:$0x1] %v24_v0 }
   0x3   :  { %2257 = sst [smem:[#allocation8_spill]] %s2235_s2 }
   0x4   :  { %2258 = sst [smem:[#allocation9_spill]] %s2236_s3 }
   0x5   :  { %s2259_s1 = sld [smem:[#allocation6_spill]] }
   0xb   :  { %v1867_v1 = vld [vmem:[%s2259_s1] sm:$0xff]  ;;  %v1872_v2 = vld [vmem:[%s2259_s1 + $0x8] sm:$0xff] }
   0xc   :  { %vm67_vm0 = vcmp.gt.f32.partialorder %v1867_v1, 0.0  ;;  %v69_v3 = vmul.f32 0.1, %v1867_v1  ;;  %v70_v4 = vmul.f32 0.1, %v1872_v2  ;;  %vm68_vm1 = vcmp.gt.f32.partialorder %v1872_v2, 0.0 }
   0xd   :  { %26 = vsyncpa [#allocation4], 0  ;;  %s1743_s18 = smov 1   ;;  %vm81_vm2 = vcmask 7168   ;;  %s1744_s23 = smov 126   ;;  %v1745_v12 = vmov 0.0  }
   0xe   :  { %v1879_v5 = vsel %vm67_vm0, %v1867_v1, %v69_v3  ;;  %v1884_v6 = vsel %vm68_vm1, %v1872_v2, %v70_v4  ;;  %185 = vmatprep.mubr.f32.mxu1 %v1745_v12  ;;  %432 = vmatprep.mubr.f32.mxu0 %v1745_v12  ;;  %s1746_s24 = smov 127   ;;  %v1747_v13 = vmov 0   ;;  %s2260_s26 = sld [smem:[#allocation8_spill]]  ;;  %vm96_vm3 = vcmask 1039360   ;;  %vm1418_vm4 = vmneg %vm81_vm2  ;;  %v199_v46 = vld [vmem:[%s2237_s4] sm:$0xff] }
   0xf   :  { %77 = vrot.lane.b32.xlu0 %v1879_v5, %s1743_s18  ;;  %1563 = vset.pattern.permute.xlu1 %v1747_v13  ;;  %vm2254_vm5 = vmmov 1   ;;  %vm107_vm7 = vcmask 1031168   ;;  %s2263_s29 = sld [smem:[#allocation7_spill]]  ;;  %vm117_vm8 = vcmask 195584   ;;  %s2264_s21 = sld [smem:[#allocation9_spill]]  ;;  %vm329_vm13 = vcmask 23552  }
  0x10   :  { %1604 = vset.pattern.permute.xlu0 %v1747_v13  ;;  %vm1905_vm6 = vmpackc.low %vm2254_vm5, %vm1418_vm4  ;;  %s1749_s1 = smov 3   ;;  %s1750_s22 = smov 125   ;;  %vm344_vm14 = vcmask 1022976   ;;  %vm355_vm1 = vcmask 998400   ;;  %vm623_vm4 = vcmask 1006592  }
  0x11   :  { %s1751_s2 = smov 122   ;;  %s1752_s25 = smov 123   ;;  %vm1424_vm15 = vmneg %vm329_vm13 }
  0x12   :  { %s1753_s3 = smov 124   ;;  %vm2007_vm0 = vmpackc.low %vm2254_vm5, %vm1424_vm15  ;;  %s1755_s20 = smov 116  }
  0x13   :  { %79 = vrot.lane.b32.xlu0 %v1884_v6, %s1743_s18  ;;  %s1758_s27 = smov 110  }
  0x14   :  { %v74_v15 = vld [vmem:[%s2260_s26] sm:$0xff]  ;;  %s1757_s26 = smov 113  }
  0x15   :  { %v73_v29 = vld [vmem:[%s2263_s29] sm:$0xff] }
  0x16   :  { %v198_v60 = vld [vmem:[%s2264_s21] sm:$0xff]  ;;  %s1756_s21 = smov 119  }
  0x81   :  { %v78_v7 = vpop.permute.xlu0 %77 }
  0x82   :  { %v86_v14 = vsel %vm81_vm2, 0.0, %v78_v7 }
  0x85   :  { %v80_v8 = vpop.permute.xlu0 %79 }
  0x86   :  { %v82_v9 = vsel %vm81_vm2, %v78_v7, %v80_v8  ;;  %v87_v10 = vsel %vm81_vm2, %v80_v8, 0.0 }
  0x87   :  { %103 = vrot.lane.b32.xlu0 %v82_v9, %s1744_s23  ;;  %v1558_v11 = vpack.i.bf16 %v87_v10, %v82_v9 }
  0x89   :  { %1559 = vrot.lane.b32.xlu1 %v1558_v11, %s1746_s24 }
  0x8b   :  { %101 = vrot.lane.b32.xlu0 %v86_v14, %s1744_s23 }
  0x8d   :  { %90 = vrot.lane.b32.xlu1 %v86_v14, %s1746_s24 }
  0x91   :  { %105 = vrot.lane.b32.xlu1 %v87_v10, %s1744_s23 }
  0x95   :  { %114 = vperm.xlu1 %1563, %v74_v15  }
  0xf9   :  { %v104_v19 = vpop.permute.xlu0 %103 }
  0xfb   :  { %v1560_v16 = vpop.permute.xlu1 %1559 }
  0xfc   :  { %v1562_v17 = vunpack.i.h.bf16 %v1560_v16  ;;  %v1561_v18 = vunpack.i.l.bf16 %v1560_v16 }
  0xfd   :  { %v102_v26 = vpop.permute.xlu0 %101 }
  0xfe   :  { %v98_v20 = vsel %vm96_vm3, %v1561_v18, %v1562_v17  ;;  %v108_v30 = vsel %vm107_vm7, %v102_v26, %v104_v19  ;;  %v322_v26 = vld [vmem:[%s2239_s6] sm:$0xff] }
  0xff   :  { %v91_v21 = vpop.permute.xlu1 %90  ;;  %v1445_v22 = vpack.c.bf16 %v98_v20, %v82_v9 }
 0x100   :  { %v97_v23 = vsel %vm96_vm3, %v91_v21, %v1561_v18 }
 0x101   :  { %v1447_v25 = vpack.c.bf16 %v97_v23, %v78_v7  ;;  %1446 = vmatprep.subr.bf16.mxu1 %v1445_v22 }
 0x103   :  { %v106_v27 = vpop.permute.xlu1 %105  ;;  %1449 = vmatpush1.bf16.msk.msra.mxu1 %vm1905_vm6, %v1447_v25 }
 0x104   :  { %v109_v28 = vsel %vm107_vm7, %v104_v19, %v106_v27  ;;  %v563_v27 = vld [vmem:[%s2243_s10] sm:$0xff] }
 0x105   :  { %125 = vmatprep.subr.mxu1 %v109_v28 }
 0x107   :  { %126 = vmatpush1.msra.mxu1 %v108_v30 }
 0x108   :  { %1420 = vmatmul.mubr.msk.f32.vlgmr.msra.gmra.mrb[0].mxu1 %vm117_vm8, %v73_v29 }
 0x109   :  { %306 = vmatprep.mubr.f32.mxu1 %v1745_v12 }
 0x114   :  { %v115_v31 = vpop.permute.xlu1 %114 }
 0x1db   :  { %v187_v32 = vpop.f32.mrb[0].mxu1 }
 0x1dc   :  { %v188_v33 = vadd.f32 %v187_v32, %v115_v31  ;;  %v189_v34 = vpop.f32.mrb[1].mxu1 }
 0x1dd   :  { %v190_v35 = vadd.f32 %v189_v34, %v115_v31 }
 0x1de   :  { %v194_v36 = vmul.f32 0.1, %v188_v33  ;;  %vm192_vm9 = vcmp.gt.f32.partialorder %v188_v33, 0.0 }
 0x1df   :  { %v195_v37 = vmul.f32 0.1, %v190_v35  ;;  %vm193_vm10 = vcmp.gt.f32.partialorder %v190_v35, 0.0 }
 0x1e0   :  { %v196_v38 = vsel %vm192_vm9, %v188_v33, %v194_v36  ;;  %vm612_vm9 = vcmask 1014784  }
 0x1e1   :  { %202 = vrot.lane.b32.xlu0 %v196_v38, %s1743_s18  ;;  %v197_v39 = vsel %vm193_vm10, %v190_v35, %v195_v37  ;;  %vm643_vm10 = vcmask 457728  }
 0x1e2   :  { %204 = vrot.lane.b32.xlu1 %v197_v39, %s1743_s18 }
 0x253   :  { %v203_v40 = vpop.permute.xlu0 %202 }
 0x254   :  { %v205_v41 = vpop.permute.xlu1 %204  ;;  %v210_v42 = vsel %vm81_vm2, 0.0, %v203_v40 }
 0x255   :  { %v206_v43 = vsel %vm81_vm2, %v203_v40, %v205_v41  ;;  %v211_v44 = vsel %vm81_vm2, %v205_v41, 0.0  ;;  %214 = vrot.lane.b32.xlu1 %v210_v42, %s1746_s24 }
 0x256   :  { %v1564_v45 = vpack.i.bf16 %v211_v44, %v206_v43 }
 0x258   :  { %1565 = vrot.lane.b32.xlu0 %v1564_v45, %s1746_s24 }
 0x259   :  { %228 = vrot.lane.b32.xlu1 %v211_v44, %s1744_s23 }
 0x25c   :  { %226 = vrot.lane.b32.xlu0 %v206_v43, %s1744_s23 }
 0x25d   :  { %236 = vperm.xlu1 %1563, %v199_v46  }
 0x260   :  { %224 = vrot.lane.b32.xlu0 %v210_v42, %s1744_s23 }
 0x2c7   :  { %v215_v47 = vpop.permute.xlu1 %214 }
 0x2ca   :  { %v1566_v48 = vpop.permute.xlu0 %1565 }
 0x2cb   :  { %v1568_v49 = vunpack.i.h.bf16 %v1566_v48  ;;  %v1567_v50 = vunpack.i.l.bf16 %v1566_v48  ;;  %v229_v56 = vpop.permute.xlu1 %228 }
 0x2cd   :  { %v220_v51 = vsel %vm96_vm3, %v215_v47, %v1567_v50  ;;  %v221_v52 = vsel %vm96_vm3, %v1567_v50, %v1568_v49 }
 0x2ce   :  { %v1452_v53 = vpack.c.bf16 %v220_v51, %v203_v40  ;;  %v227_v54 = vpop.permute.xlu0 %226  ;;  %v1450_v55 = vpack.c.bf16 %v221_v52, %v206_v43 }
 0x2cf   :  { %v231_v57 = vsel %vm107_vm7, %v227_v54, %v229_v56  ;;  %v321_v56 = vld [vmem:[%s2238_s5] sm:$0xff] }
 0x2d0   :  { %1451 = vmatprep.subr.bf16.mxu1 %v1450_v55 }
 0x2d1   :  { %1454 = vmatpush1.bf16.msk.msra.mxu1 %vm1905_vm6, %v1452_v53 }
 0x2d2   :  { %v225_v58 = vpop.permute.xlu0 %224  ;;  %246 = vmatprep.subr.mxu1 %v231_v57 }
 0x2d3   :  { %v230_v59 = vsel %vm107_vm7, %v225_v58, %v227_v54 }
 0x2d5   :  { %247 = vmatpush1.msra.mxu1 %v230_v59 }
 0x2d6   :  { %1423 = vmatmul.mubr.msk.f32.vlgmr.msra.gmra.mrb[2].mxu1 %vm117_vm8, %v198_v60 }
 0x2d7   :  { %553 = vmatprep.mubr.f32.mxu1 %v1745_v12 }
 0x2dc   :  { %v237_v61 = vpop.permute.xlu1 %236 }
 0x3a9   :  { %v308_v62 = vpop.f32.mrb[2].mxu1 }
 0x3aa   :  { %v309_v63 = vadd.f32 %v308_v62, %v237_v61  ;;  %v310_v0 = vpop.f32.mrb[3].mxu1 }
 0x3ab   :  { %v311_v3 = vadd.f32 %v310_v0, %v237_v61 }
 0x3ac   :  { %v1943_v4 = vadd.f32 %v309_v63, %v1867_v1 }
 0x3ad   :  { %v1946_v7 = vadd.f32 %v311_v3, %v1872_v2 }
 0x3ae   :  { %vm315_vm11 = vcmp.gt.f32.partialorder %v1943_v4, 0.0  ;;  %v317_v8 = vmul.f32 0.1, %v1943_v4 }
 0x3af   :  { %vm316_vm12 = vcmp.gt.f32.partialorder %v1946_v7, 0.0  ;;  %v318_v9 = vmul.f32 0.1, %v1946_v7 }
 0x3b0   :  { %v319_v10 = vsel %vm315_vm11, %v1943_v4, %v317_v8 }
 0x3b1   :  { %325 = vrot.lane.b32.xlu0 %v319_v10, %s1749_s1  ;;  %v320_v11 = vsel %vm316_vm12, %v1946_v7, %v318_v9 }
 0x3b2   :  { %327 = vrot.lane.b32.xlu1 %v320_v11, %s1749_s1 }
 0x3b5   :  { %564 = vrot.lane.b32.xlu0 %v1879_v5, %s1749_s1 }
 0x3b6   :  { %566 = vrot.lane.b32.xlu1 %v1884_v6, %s1749_s1 }
 0x423   :  { %v1960_v13 = vpop.permute.xlu0 %325 }
 0x424   :  { %v328_v14 = vpop.permute.xlu1 %327  ;;  %v334_v5 = vsel %vm329_vm13, 0.0, %v1960_v13 }
 0x425   :  { %v330_v20 = vsel %vm329_vm13, %v1960_v13, %v328_v14  ;;  %v335_v21 = vsel %vm329_vm13, %v328_v14, 0.0 }
 0x426   :  { %v1584_v23 = vpack.i.bf16 %v335_v21, %v330_v20 }
 0x427   :  { %v1962_v15 = vpop.permute.xlu0 %564 }
 0x428   :  { %v567_v16 = vpop.permute.xlu1 %566  ;;  %v572_v22 = vsel %vm329_vm13, 0.0, %v1962_v15 }
 0x429   :  { %v573_v17 = vsel %vm329_vm13, %v567_v16, 0.0  ;;  %v1967_v18 = vsel %vm329_vm13, %v1962_v15, %v567_v16 }
 0x42a   :  { %v1574_v19 = vpack.i.bf16 %v573_v17, %v1967_v18  ;;  %v1579_v6 = vpack.i.bf16 %v1967_v18, %v334_v5  ;;  %v1589_v25 = vpack.i.bf16 %v572_v22, %v573_v17 }
 0x42c   :  { %1575 = vrot.lane.b32.xlu1 %v1574_v19, %s1744_s23  ;;  %1570 = vrot.lane.b32.xlu0 %v1574_v19, %s1746_s24 }
 0x430   :  { %1580 = vrot.lane.b32.xlu1 %v1579_v6, %s1750_s22  ;;  %576 = vrot.lane.b32.xlu0 %v572_v22, %s1746_s24 }
 0x434   :  { %349 = vrot.lane.b32.xlu1 %v334_v5, %s1751_s2  ;;  %1585 = vrot.lane.b32.xlu0 %v1584_v23, %s1750_s22 }
 0x438   :  { %353 = vrot.lane.b32.xlu1 %v335_v21, %s1751_s2  ;;  %1590 = vrot.lane.b32.xlu0 %v1589_v25, %s1750_s22 }
 0x43c   :  { %586 = vrot.lane.b32.xlu1 %v572_v22, %s1744_s23  ;;  %351 = vrot.lane.b32.xlu0 %v330_v20, %s1751_s2 }
 0x440   :  { %1600 = vrot.lane.b32.xlu1 %v1574_v19, %s1752_s25  ;;  %1595 = vrot.lane.b32.xlu0 %v1574_v19, %s1753_s3 }
 0x444   :  { %617 = vrot.lane.b32.xlu1 %v572_v22, %s1752_s25  ;;  %606 = vrot.lane.b32.xlu0 %v572_v22, %s1753_s3 }
 0x448   :  { %632 = vrot.lane.b32.xlu1 %v573_v17, %s1751_s2  ;;  %630 = vrot.lane.b32.xlu0 %v1967_v18, %s1751_s2 }
 0x44c   :  { %362 = vperm.xlu1 %1563, %v322_v26   ;;  %628 = vrot.lane.b32.xlu0 %v572_v22, %s1751_s2  ;;  %v562_v26 = vld [vmem:[%s2242_s9] sm:$0xff] }
 0x450   :  { %640 = vperm.xlu0 %1604, %v563_v27  }
 0x49e   :  { %v1576_v28 = vpop.permute.xlu1 %1575  ;;  %v1571_v29 = vpop.permute.xlu0 %1570 }
 0x49f   :  { %v1573_v37 = vunpack.i.h.bf16 %v1571_v29  ;;  %v1572_v38 = vunpack.i.l.bf16 %v1571_v29  ;;  %v1578_v47 = vunpack.i.h.bf16 %v1576_v28  ;;  %v1577_v48 = vunpack.i.l.bf16 %v1576_v28 }
 0x4a1   :  { %v583_v50 = vsel %vm96_vm3, %v1572_v38, %v1573_v37  ;;  %v593_v61 = vsel %vm107_vm7, %v1577_v48, %v1578_v47 }
 0x4a2   :  { %v1581_v30 = vpop.permute.xlu1 %1580  ;;  %v577_v31 = vpop.permute.xlu0 %576  ;;  %v1465_v59 = vpack.c.bf16 %v583_v50, %v1967_v18 }
 0x4a3   :  { %v1582_v34 = vunpack.i.l.bf16 %v1581_v30  ;;  %v1583_v49 = vunpack.i.h.bf16 %v1581_v30  ;;  %v582_v51 = vsel %vm96_vm3, %v577_v31, %v1572_v38 }
 0x4a4   :  { %v1467_v60 = vpack.c.bf16 %v582_v51, %v1962_v15 }
 0x4a6   :  { %v350_v32 = vpop.permute.xlu1 %349  ;;  %v1586_v33 = vpop.permute.xlu0 %1585 }
 0x4a7   :  { %v1588_v35 = vunpack.i.h.bf16 %v1586_v33  ;;  %v1587_v36 = vunpack.i.l.bf16 %v1586_v33 }
 0x4a9   :  { %v346_v39 = vsel %vm344_vm14, %v1587_v36, %v1588_v35  ;;  %v345_v40 = vsel %vm344_vm14, %v1582_v34, %v1587_v36 }
 0x4aa   :  { %v354_v41 = vpop.permute.xlu1 %353  ;;  %v1591_v42 = vpop.permute.xlu0 %1590  ;;  %v1455_v43 = vpack.c.bf16 %v346_v39, %v330_v20  ;;  %v1457_v44 = vpack.c.bf16 %v345_v40, %v1960_v13 }
 0x4ab   :  { %v1592_v46 = vunpack.i.l.bf16 %v1591_v42  ;;  %v1593_v58 = vunpack.i.h.bf16 %v1591_v42 }
 0x4ac   :  { %1456 = vmatprep.subr.bf16.mxu0 %v1455_v43 }
 0x4ad   :  { %1459 = vmatpush1.bf16.msk.msra.mxu0 %vm2007_vm0, %v1457_v44  ;;  %v603_v57 = vsel %vm344_vm14, %v1583_v49, %v1592_v46  ;;  %v602_v13 = vsel %vm344_vm14, %v1593_v58, %v1583_v49 }
 0x4ae   :  { %v587_v52 = vpop.permute.xlu1 %586  ;;  %v352_v53 = vpop.permute.xlu0 %351  ;;  %v1470_v3 = vpack.c.bf16 %v603_v57, %v593_v61  ;;  %v725_v61 = vld [vmem:[%s2245_s12] sm:$0xff] }
 0x4af   :  { %v357_v54 = vsel %vm355_vm1, %v352_v53, %v354_v41  ;;  %v356_v55 = vsel %vm355_vm1, %v350_v32, %v352_v53  ;;  %v592_v62 = vsel %vm107_vm7, %v587_v52, %v1577_v48 }
 0x4b0   :  { %372 = vmatprep.subr.mxu0 %v357_v54  ;;  %v1472_v14 = vpack.c.bf16 %v602_v13, %v592_v62 }
 0x4b1   :  { %373 = vmatpush1.msra.mxu0 %v356_v55 }
 0x4b2   :  { %v1601_v63 = vpop.permute.xlu1 %1600  ;;  %v1596_v0 = vpop.permute.xlu0 %1595  ;;  %1426 = vmatmul.mubr.msk.f32.vlgmr.msra.gmra.mrb[0].mxu0 %vm117_vm8, %v321_v56  ;;  %1466 = vmatprep.subr.bf16.mxu0 %v1465_v59 }
 0x4b3   :  { %v1603_v8 = vunpack.i.h.bf16 %v1601_v63  ;;  %v1602_v9 = vunpack.i.l.bf16 %v1601_v63  ;;  %v1598_v10 = vunpack.i.h.bf16 %v1596_v0  ;;  %v1597_v11 = vunpack.i.l.bf16 %v1596_v0  ;;  %1469 = vmatpush1.bf16.msk.msra.mxu0 %vm2007_vm0, %v1467_v60  ;;  %711 = vmatprep.mubr.f32.mxu0 %v1745_v12 }
 0x4b4   :  { %1471 = vmatprep.subr.bf16.mxu0 %v1470_v3 }
 0x4b5   :  { %v614_v15 = vsel %vm612_vm9, %v1597_v11, %v1598_v10  ;;  %v625_v16 = vsel %vm623_vm4, %v1602_v9, %v1603_v8 }
 0x4b6   :  { %v618_v17 = vpop.permute.xlu1 %617  ;;  %v607_v18 = vpop.permute.xlu0 %606  ;;  %v1474_v19 = vpack.c.bf16 %v625_v16, %v614_v15 }
 0x4b7   :  { %v624_v5 = vsel %vm623_vm4, %v618_v17, %v1602_v9  ;;  %v613_v6 = vsel %vm612_vm9, %v607_v18, %v1597_v11  ;;  %1473 = vmatpush1.bf16.msra.mxu0 %v1472_v14 }
 0x4b8   :  { %v1476_v20 = vpack.c.bf16 %v624_v5, %v613_v6  ;;  %1475 = vmatprep.subr.bf16.mxu0 %v1474_v19 }
 0x4ba   :  { %v633_v21 = vpop.permute.xlu1 %632  ;;  %v631_v22 = vpop.permute.xlu0 %630 }
 0x4bb   :  { %1477 = vmatpush1.bf16.msra.mxu0 %v1476_v20  ;;  %v635_v23 = vsel %vm355_vm1, %v631_v22, %v633_v21 }
 0x4bc   :  { %659 = vmatprep.subr.mxu0 %v635_v23 }
 0x4be   :  { %v629_v25 = vpop.permute.xlu0 %628 }
 0x4bf   :  { %v634_v27 = vsel %vm355_vm1, %v629_v25, %v631_v22 }
 0x4c0   :  { %660 = vmatpush1.msra.mxu0 %v634_v27 }
 0x4c1   :  { %1432 = vmatmul.mubr.msk.f32.vlgmr.msra.gmra.mrb[2].mxu0 %vm643_vm10, %v562_v26 }
 0x4c2   :  { %1040 = vmatprep.mubr.f32.mxu0 %v1745_v12 }
 0x4cb   :  { %v363_v28 = vpop.permute.xlu1 %362 }
 0x4cf   :  { %v641_v37 = vpop.permute.xlu0 %640 }
 0x585   :  { %v434_v29 = vpop.f32.mrb[0].mxu0 }
 0x586   :  { %v435_v30 = vadd.f32 %v434_v29, %v363_v28  ;;  %v436_v31 = vpop.f32.mrb[1].mxu0 }
 0x587   :  { %v437_v32 = vadd.f32 %v436_v31, %v363_v28  ;;  %v445_v28 = vld [vmem:[%s2240_s7] sm:$0xff] }
 0x588   :  { %v441_v33 = vmul.f32 0.1, %v435_v30  ;;  %vm439_vm11 = vcmp.gt.f32.partialorder %v435_v30, 0.0 }
 0x589   :  { %v442_v34 = vmul.f32 0.1, %v437_v32  ;;  %vm440_vm12 = vcmp.gt.f32.partialorder %v437_v32, 0.0 }
 0x58a   :  { %v443_v35 = vsel %vm439_vm11, %v435_v30, %v441_v33  ;;  %vm930_vm11 = vcmask 973824  }
 0x58b   :  { %449 = vrot.lane.b32.xlu1 %v443_v35, %s1743_s18  ;;  %v444_v36 = vsel %vm440_vm12, %v437_v32, %v442_v34  ;;  %vm2267_vm12 = vmmov 1  }
 0x58f   :  { %451 = vrot.lane.b32.xlu1 %v444_v36, %s1743_s18 }
 0x594   :  { %v713_v38 = vpop.f32.mrb[2].mxu0 }
 0x595   :  { %v714_v39 = vadd.f32 %v713_v38, %v641_v37  ;;  %v715_v40 = vpop.f32.mrb[3].mxu0 }
 0x596   :  { %v716_v41 = vadd.f32 %v715_v40, %v641_v37 }
 0x597   :  { %v720_v42 = vmul.f32 0.1, %v714_v39  ;;  %vm718_vm15 = vcmp.gt.f32.partialorder %v714_v39, 0.0 }
 0x598   :  { %v721_v43 = vmul.f32 0.1, %v716_v41  ;;  %vm719_vm5 = vcmp.gt.f32.partialorder %v716_v41, 0.0 }
 0x599   :  { %v722_v44 = vsel %vm718_vm15, %v714_v39, %v720_v42 }
 0x59a   :  { %728 = vrot.lane.b32.xlu0 %v722_v44, %s1749_s1  ;;  %v723_v46 = vsel %vm719_vm5, %v716_v41, %v721_v43 }
 0x59b   :  { %730 = vrot.lane.b32.xlu1 %v723_v46, %s1749_s1 }
 0x5fd   :  { %v450_v47 = vpop.permute.xlu1 %449 }
 0x5fe   :  { %v457_v48 = vsel %vm81_vm2, 0.0, %v450_v47 }
 0x5ff   :  { %471 = vrot.lane.b32.xlu1 %v457_v48, %s1744_s23 }
 0x601   :  { %v452_v49 = vpop.permute.xlu1 %451 }
 0x602   :  { %v453_v50 = vsel %vm81_vm2, %v450_v47, %v452_v49  ;;  %v458_v51 = vsel %vm81_vm2, %v452_v49, 0.0 }
 0x603   :  { %v1605_v52 = vpack.i.bf16 %v458_v51, %v453_v50  ;;  %475 = vrot.lane.b32.xlu1 %v458_v51, %s1744_s23 }
 0x605   :  { %1606 = vrot.lane.b32.xlu0 %v1605_v52, %s1746_s24 }
 0x609   :  { %473 = vrot.lane.b32.xlu0 %v453_v50, %s1744_s23 }
 0x60c   :  { %v2052_v53 = vpop.permute.xlu0 %728 }
 0x60d   :  { %v736_v54 = vsel %vm329_vm13, 0.0, %v2052_v53  ;;  %v731_v55 = vpop.permute.xlu1 %730 }
 0x60e   :  { %v732_v56 = vsel %vm329_vm13, %v2052_v53, %v731_v55  ;;  %750 = vrot.lane.b32.xlu0 %v736_v54, %s1744_s23  ;;  %v737_v58 = vsel %vm329_vm13, %v731_v55, 0.0 }
 0x60f   :  { %v1610_v57 = vpack.i.bf16 %v732_v56, %v457_v48  ;;  %v1615_v59 = vpack.i.bf16 %v736_v54, %v737_v58  ;;  %v1625_v60 = vpack.i.bf16 %v737_v58, %v732_v56 }
 0x611   :  { %1611 = vrot.lane.b32.xlu1 %v1610_v57, %s1746_s24 }
 0x612   :  { %770 = vrot.lane.b32.xlu0 %v736_v54, %s1753_s3 }
 0x615   :  { %760 = vrot.lane.b32.xlu1 %v736_v54, %s1750_s22 }
 0x616   :  { %1616 = vrot.lane.b32.xlu0 %v1615_v59, %s1746_s24 }
 0x619   :  { %1626 = vrot.lane.b32.xlu1 %v1625_v60, %s1750_s22 }
 0x61a   :  { %1621 = vrot.lane.b32.xlu0 %v1625_v60, %s1744_s23 }
 0x61d   :  { %1636 = vrot.lane.b32.xlu1 %v1625_v60, %s1752_s25 }
 0x61e   :  { %1631 = vrot.lane.b32.xlu0 %v1625_v60, %s1753_s3  ;;  %v724_v60 = vld [vmem:[%s2244_s11] sm:$0xff]  ;;  %s1754_s11 = smov 9  }
 0x621   :  { %780 = vrot.lane.b32.xlu1 %v736_v54, %s1752_s25 }
 0x622   :  { %792 = vrot.lane.b32.xlu0 %v732_v56, %s1751_s2 }
 0x625   :  { %794 = vrot.lane.b32.xlu1 %v737_v58, %s1751_s2 }
 0x626   :  { %790 = vrot.lane.b32.xlu0 %v736_v54, %s1751_s2 }
 0x629   :  { %802 = vperm.xlu1 %1563, %v725_v61  }
 0x671   :  { %v472_v3 = vpop.permute.xlu1 %471 }
 0x675   :  { %v476_v11 = vpop.permute.xlu1 %475 }
 0x677   :  { %v1607_v62 = vpop.permute.xlu0 %1606 }
 0x678   :  { %v1609_v63 = vunpack.i.h.bf16 %v1607_v62  ;;  %v1608_v0 = vunpack.i.l.bf16 %v1607_v62 }
 0x67a   :  { %v468_v8 = vsel %vm96_vm3, %v1608_v0, %v1609_v63 }
 0x67b   :  { %v474_v9 = vpop.permute.xlu0 %473  ;;  %v1460_v10 = vpack.c.bf16 %v468_v8, %v453_v50 }
 0x67c   :  { %v478_v22 = vsel %vm107_vm7, %v474_v9, %v476_v11  ;;  %v477_v23 = vsel %vm107_vm7, %v472_v3, %v474_v9 }
 0x67d   :  { %1461 = vmatprep.subr.bf16.mxu1 %v1460_v10 }
 0x680   :  { %v751_v13 = vpop.permute.xlu0 %750 }
 0x683   :  { %v1612_v14 = vpop.permute.xlu1 %1611 }
 0x684   :  { %v1613_v15 = vunpack.i.l.bf16 %v1612_v14  ;;  %v771_v16 = vpop.permute.xlu0 %770  ;;  %v1614_v6 = vunpack.i.h.bf16 %v1612_v14 }
 0x686   :  { %v467_v17 = vsel %vm96_vm3, %v1613_v15, %v1608_v0 }
 0x687   :  { %v1462_v18 = vpack.c.bf16 %v467_v17, %v450_v47  ;;  %v761_v19 = vpop.permute.xlu1 %760 }
 0x688   :  { %v1617_v5 = vpop.permute.xlu0 %1616 }
 0x689   :  { %v1619_v20 = vunpack.i.h.bf16 %v1617_v5  ;;  %v1618_v21 = vunpack.i.l.bf16 %v1617_v5  ;;  %1464 = vmatpush1.bf16.msk.msra.mxu1 %vm1905_vm6, %v1462_v18  ;;  %vm895_vm6 = vcmask 72704  }
 0x68a   :  { %493 = vmatprep.subr.mxu1 %v478_v22 }
 0x68b   :  { %v746_v25 = vsel %vm96_vm3, %v1619_v20, %v1614_v6  ;;  %v1627_v26 = vpop.permute.xlu1 %1626  ;;  %v747_v27 = vsel %vm96_vm3, %v1614_v6, %v1618_v21 }
 0x68c   :  { %v1480_v29 = vpack.c.bf16 %v746_v25, %v2052_v53  ;;  %v1629_v30 = vunpack.i.h.bf16 %v1627_v26  ;;  %v1628_v31 = vunpack.i.l.bf16 %v1627_v26  ;;  %v1622_v24 = vpop.permute.xlu0 %1621  ;;  %v1478_v32 = vpack.c.bf16 %v747_v27, %v732_v56 }
 0x68d   :  { %v1624_v33 = vunpack.i.h.bf16 %v1622_v24  ;;  %v1623_v34 = vunpack.i.l.bf16 %v1622_v24  ;;  %494 = vmatpush1.msra.mxu1 %v477_v23 }
 0x68e   :  { %v766_v35 = vsel %vm344_vm14, %v761_v19, %v1628_v31  ;;  %1479 = vmatprep.subr.bf16.mxu1 %v1478_v32  ;;  %1429 = vmatmul.mubr.msk.f32.vlgmr.msra.gmra.mrb[4].mxu1 %vm117_vm8, %v445_v28  ;;  %v767_v36 = vsel %vm344_vm14, %v1628_v31, %v1629_v30  ;;  %v888_v19 = vld [vmem:[%s2247_s14] sm:$0xff]  ;;  %vm1436_vm8 = vmneg %vm895_vm6 }
 0x68f   :  { %v756_v37 = vsel %vm107_vm7, %v751_v13, %v1623_v34  ;;  %v1637_v38 = vpop.permute.xlu1 %1636  ;;  %1482 = vmatpush1.bf16.msk.msra.mxu1 %vm2007_vm0, %v1480_v29  ;;  %v757_v39 = vsel %vm107_vm7, %v1623_v34, %v1624_v33  ;;  %872 = vmatprep.mubr.f32.mxu1 %v1745_v12  ;;  %vm1494_vm15 = vmpackc.low %vm2267_vm12, %vm1436_vm8 }
 0x690   :  { %v1485_v40 = vpack.c.bf16 %v766_v35, %v756_v37  ;;  %v1639_v41 = vunpack.i.h.bf16 %v1637_v38  ;;  %v1638_v42 = vunpack.i.l.bf16 %v1637_v38  ;;  %v1632_v43 = vpop.permute.xlu0 %1631  ;;  %v1483_v44 = vpack.c.bf16 %v767_v36, %v757_v39 }
 0x691   :  { %v1634_v46 = vunpack.i.h.bf16 %v1632_v43  ;;  %v1633_v47 = vunpack.i.l.bf16 %v1632_v43 }
 0x692   :  { %1484 = vmatprep.subr.bf16.mxu1 %v1483_v44  ;;  %v787_v48 = vsel %vm623_vm4, %v1638_v42, %v1639_v41 }
 0x693   :  { %v781_v49 = vpop.permute.xlu1 %780  ;;  %v776_v50 = vsel %vm612_vm9, %v771_v16, %v1633_v47  ;;  %1486 = vmatpush1.bf16.msra.mxu1 %v1485_v40  ;;  %v777_v51 = vsel %vm612_vm9, %v1633_v47, %v1634_v46 }
 0x694   :  { %v786_v52 = vsel %vm623_vm4, %v781_v49, %v1638_v42  ;;  %v793_v53 = vpop.permute.xlu0 %792  ;;  %v1487_v54 = vpack.c.bf16 %v787_v48, %v777_v51 }
 0x695   :  { %v1489_v55 = vpack.c.bf16 %v786_v52, %v776_v50 }
 0x696   :  { %1488 = vmatprep.subr.bf16.mxu1 %v1487_v54 }
 0x697   :  { %v795_v56 = vpop.permute.xlu1 %794  ;;  %1490 = vmatpush1.bf16.msra.mxu1 %v1489_v55 }
 0x698   :  { %v791_v57 = vpop.permute.xlu0 %790  ;;  %v797_v58 = vsel %vm355_vm1, %v793_v53, %v795_v56 }
 0x699   :  { %v796_v59 = vsel %vm355_vm1, %v791_v57, %v793_v53  ;;  %820 = vmatprep.subr.mxu1 %v797_v58 }
 0x69b   :  { %821 = vmatpush1.msra.mxu1 %v796_v59 }
 0x69c   :  { %1435 = vmatmul.mubr.msk.f32.vlgmr.msra.gmra.mrb[6].mxu1 %vm643_vm10, %v724_v60  ;;  %v887_v60 = vld [vmem:[%s2246_s13] sm:$0xff] }
 0x69d   :  { %1201 = vmatprep.mubr.f32.mxu1 %v1745_v12 }
 0x6a8   :  { %v803_v61 = vpop.permute.xlu1 %802 }
 0x76f   :  { %v874_v62 = vpop.f32.mrb[6].mxu1 }
 0x770   :  { %v875_v63 = vadd.f32 %v874_v62, %v803_v61  ;;  %v876_v0 = vpop.f32.mrb[7].mxu1 }
 0x771   :  { %v877_v3 = vadd.f32 %v876_v0, %v803_v61 }
 0x772   :  { %v2107_v8 = vadd.f32 %v875_v63, %v1867_v1 }
 0x773   :  { %v2110_v9 = vadd.f32 %v877_v3, %v1872_v2 }
 0x774   :  { %vm881_vm2 = vcmp.gt.f32.partialorder %v2107_v8, 0.0  ;;  %v883_v10 = vmul.f32 0.1, %v2107_v8 }
 0x775   :  { %vm882_vm5 = vcmp.gt.f32.partialorder %v2110_v9, 0.0  ;;  %v884_v11 = vmul.f32 0.1, %v2110_v9 }
 0x776   :  { %v885_v13 = vsel %vm881_vm2, %v2107_v8, %v883_v10  ;;  %vm952_vm2 = vcmask 924672  }
 0x777   :  { %891 = vrot.lane.b32.xlu0 %v885_v13, %s1754_s11  ;;  %v886_v14 = vsel %vm882_vm5, %v2110_v9, %v884_v11  ;;  %vm941_vm5 = vcmask 949248  }
 0x778   :  { %893 = vrot.lane.b32.xlu1 %v886_v14, %s1754_s11 }
 0x7e9   :  { %v892_v1 = vpop.permute.xlu0 %891 }
 0x7ea   :  { %v900_v2 = vsel %vm895_vm6, 0.0, %v892_v1  ;;  %v894_v15 = vpop.permute.xlu1 %893 }
 0x7eb   :  { %914 = vrot.lane.b32.xlu0 %v900_v2, %s1751_s2  ;;  %904 = vrot.lane.b32.xlu1 %v900_v2, %s1750_s22  ;;  %v896_v16 = vsel %vm895_vm6, %v892_v1, %v894_v15  ;;  %v901_v17 = vsel %vm895_vm6, %v894_v15, 0.0  ;;  %vm963_vm6 = vcmask 900096  }
 0x7ec   :  { %v1650_v18 = vpack.i.bf16 %v901_v17, %v896_v16 }
 0x7ef   :  { %935 = vrot.lane.b32.xlu0 %v900_v2, %s1755_s20  ;;  %924 = vrot.lane.b32.xlu1 %v900_v2, %s1756_s21 }
 0x7f3   :  { %1651 = vrot.lane.b32.xlu1 %v1650_v18, %s1756_s21  ;;  %1641 = vrot.lane.b32.xlu0 %v1650_v18, %s1750_s22 }
 0x7f7   :  { %1661 = vrot.lane.b32.xlu1 %v1650_v18, %s1757_s26  ;;  %1646 = vrot.lane.b32.xlu0 %v1650_v18, %s1751_s2 }
 0x7fb   :  { %946 = vrot.lane.b32.xlu1 %v900_v2, %s1757_s26  ;;  %1656 = vrot.lane.b32.xlu0 %v1650_v18, %s1755_s20  ;;  %v446_v18 = vld [vmem:[%s2241_s8] sm:$0xff] }
 0x7ff   :  { %961 = vrot.lane.b32.xlu1 %v901_v17, %s1758_s27  ;;  %959 = vrot.lane.b32.xlu0 %v896_v16, %s1758_s27 }
 0x803   :  { %970 = vperm.xlu1 %1563, %v888_v19   ;;  %957 = vrot.lane.b32.xlu0 %v900_v2, %s1758_s27  ;;  %v1054_v19 = vld [vmem:[%s2249_s16] sm:$0xff] }
 0x85d   :  { %v915_v5 = vpop.permute.xlu0 %914  ;;  %v905_v6 = vpop.permute.xlu1 %904 }
 0x861   :  { %v936_v20 = vpop.permute.xlu0 %935  ;;  %v925_v21 = vpop.permute.xlu1 %924 }
 0x865   :  { %v1652_v22 = vpop.permute.xlu1 %1651  ;;  %v1642_v23 = vpop.permute.xlu0 %1641 }
 0x866   :  { %v1644_v25 = vunpack.i.h.bf16 %v1642_v23  ;;  %v1643_v26 = vunpack.i.l.bf16 %v1642_v23  ;;  %v1654_v27 = vunpack.i.h.bf16 %v1652_v22  ;;  %v1653_v28 = vunpack.i.l.bf16 %v1652_v22 }
 0x868   :  { %v910_v29 = vsel %vm344_vm14, %v905_v6, %v1643_v26  ;;  %v911_v30 = vsel %vm344_vm14, %v1643_v26, %v1644_v25  ;;  %v931_v36 = vsel %vm930_vm11, %v925_v21, %v1653_v28  ;;  %v932_v37 = vsel %vm930_vm11, %v1653_v28, %v1654_v27 }
 0x869   :  { %v1493_v31 = vpack.c.bf16 %v910_v29, %v892_v1  ;;  %v1662_v24 = vpop.permute.xlu1 %1661  ;;  %v1647_v32 = vpop.permute.xlu0 %1646  ;;  %v1491_v33 = vpack.c.bf16 %v911_v30, %v896_v16 }
 0x86a   :  { %v1649_v34 = vunpack.i.h.bf16 %v1647_v32  ;;  %v1648_v35 = vunpack.i.l.bf16 %v1647_v32  ;;  %v1664_v38 = vunpack.i.h.bf16 %v1662_v24  ;;  %v1663_v39 = vunpack.i.l.bf16 %v1662_v24 }
 0x86b   :  { %1492 = vmatprep.subr.bf16.mxu0 %v1491_v33 }
 0x86c   :  { %v920_v40 = vsel %vm355_vm1, %v915_v5, %v1648_v35  ;;  %1495 = vmatpush1.bf16.msk.msra.mxu0 %vm1494_vm15, %v1493_v31  ;;  %v921_v41 = vsel %vm355_vm1, %v1648_v35, %v1649_v34  ;;  %v954_v52 = vsel %vm952_vm2, %v1663_v39, %v1664_v38 }
 0x86d   :  { %v1498_v42 = vpack.c.bf16 %v931_v36, %v920_v40  ;;  %v947_v43 = vpop.permute.xlu1 %946  ;;  %v1657_v44 = vpop.permute.xlu0 %1656  ;;  %v1496_v46 = vpack.c.bf16 %v932_v37, %v921_v41 }
 0x86e   :  { %v1659_v47 = vunpack.i.h.bf16 %v1657_v44  ;;  %v1658_v48 = vunpack.i.l.bf16 %v1657_v44  ;;  %v953_v49 = vsel %vm952_vm2, %v947_v43, %v1663_v39 }
 0x86f   :  { %1497 = vmatprep.subr.bf16.mxu0 %v1496_v46 }
 0x870   :  { %v942_v50 = vsel %vm941_vm5, %v936_v20, %v1658_v48  ;;  %1499 = vmatpush1.bf16.msra.mxu0 %v1498_v42  ;;  %v943_v51 = vsel %vm941_vm5, %v1658_v48, %v1659_v47 }
 0x871   :  { %v1502_v53 = vpack.c.bf16 %v953_v49, %v942_v50  ;;  %v962_v54 = vpop.permute.xlu1 %961  ;;  %v960_v55 = vpop.permute.xlu0 %959  ;;  %v1500_v56 = vpack.c.bf16 %v954_v52, %v943_v51 }
 0x872   :  { %v965_v57 = vsel %vm963_vm6, %v960_v55, %v962_v54 }
 0x873   :  { %1501 = vmatprep.subr.bf16.mxu0 %v1500_v56 }
 0x874   :  { %1503 = vmatpush1.bf16.msra.mxu0 %v1502_v53 }
 0x875   :  { %v958_v58 = vpop.permute.xlu0 %957  ;;  %988 = vmatprep.subr.mxu0 %v965_v57 }
 0x876   :  { %v964_v59 = vsel %vm963_vm6, %v958_v58, %v960_v55 }
 0x878   :  { %989 = vmatpush1.msra.mxu0 %v964_v59 }
 0x879   :  { %1438 = vmatmul.mubr.msk.f32.vlgmr.msra.gmra.mrb[4].mxu0 %vm643_vm10, %v887_v60  ;;  %v1053_v60 = vld [vmem:[%s2248_s15] sm:$0xff] }
 0x87a   :  { %1372 = vmatprep.mubr.f32.mxu0 %v1745_v12 }
 0x882   :  { %v971_v61 = vpop.permute.xlu1 %970 }
 0x94c   :  { %v1042_v62 = vpop.f32.mrb[4].mxu0 }
 0x94d   :  { %v1043_v63 = vadd.f32 %v1042_v62, %v971_v61  ;;  %v1044_v0 = vpop.f32.mrb[5].mxu0 }
 0x94e   :  { %v1045_v3 = vadd.f32 %v1044_v0, %v971_v61 }
 0x94f   :  { %v1049_v10 = vmul.f32 0.1, %v1043_v63  ;;  %vm1047_vm8 = vcmp.gt.f32.partialorder %v1043_v63, 0.0 }
 0x950   :  { %v1050_v11 = vmul.f32 0.1, %v1045_v3  ;;  %vm1048_vm11 = vcmp.gt.f32.partialorder %v1045_v3, 0.0 }
 0x951   :  { %v1051_v13 = vsel %vm1047_vm8, %v1043_v63, %v1049_v10 }
 0x952   :  { %1057 = vrot.lane.b32.xlu0 %v1051_v13, %s1749_s1  ;;  %v1052_v14 = vsel %vm1048_vm11, %v1045_v3, %v1050_v11 }
 0x953   :  { %1059 = vrot.lane.b32.xlu1 %v1052_v14, %s1749_s1 }
 0x9c4   :  { %v1058_v1 = vpop.permute.xlu0 %1057 }
 0x9c5   :  { %v1065_v2 = vsel %vm329_vm13, 0.0, %v1058_v1  ;;  %v1060_v15 = vpop.permute.xlu1 %1059 }
 0x9c6   :  { %1079 = vrot.lane.b32.xlu0 %v1065_v2, %s1744_s23  ;;  %1069 = vrot.lane.b32.xlu1 %v1065_v2, %s1746_s24  ;;  %v1061_v12 = vsel %vm329_vm13, %v1058_v1, %v1060_v15  ;;  %v1066_v16 = vsel %vm329_vm13, %v1060_v15, 0.0 }
 0x9c7   :  { %v1675_v17 = vpack.i.bf16 %v1066_v16, %v1061_v12 }
 0x9ca   :  { %1099 = vrot.lane.b32.xlu0 %v1065_v2, %s1753_s3  ;;  %1089 = vrot.lane.b32.xlu1 %v1065_v2, %s1750_s22 }
 0x9ce   :  { %1676 = vrot.lane.b32.xlu1 %v1675_v17, %s1750_s22  ;;  %1666 = vrot.lane.b32.xlu0 %v1675_v17, %s1746_s24 }
 0x9d2   :  { %1686 = vrot.lane.b32.xlu1 %v1675_v17, %s1752_s25  ;;  %1671 = vrot.lane.b32.xlu0 %v1675_v17, %s1744_s23 }
 0x9d6   :  { %1109 = vrot.lane.b32.xlu1 %v1065_v2, %s1752_s25  ;;  %1681 = vrot.lane.b32.xlu0 %v1675_v17, %s1753_s3 }
 0x9da   :  { %1123 = vrot.lane.b32.xlu1 %v1066_v16, %s1751_s2  ;;  %1121 = vrot.lane.b32.xlu0 %v1061_v12, %s1751_s2 }
 0x9de   :  { %483 = vperm.xlu1 %1563, %v446_v18   ;;  %1119 = vrot.lane.b32.xlu0 %v1065_v2, %s1751_s2 }
 0x9e2   :  { %1131 = vperm.xlu0 %1604, %v1054_v19  }
 0xa38   :  { %v1080_v5 = vpop.permute.xlu0 %1079  ;;  %v1070_v6 = vpop.permute.xlu1 %1069 }
 0xa3c   :  { %v1100_v20 = vpop.permute.xlu0 %1099  ;;  %v1090_v21 = vpop.permute.xlu1 %1089 }
 0xa40   :  { %v1677_v22 = vpop.permute.xlu1 %1676  ;;  %v1667_v23 = vpop.permute.xlu0 %1666 }
 0xa41   :  { %v1669_v25 = vunpack.i.h.bf16 %v1667_v23  ;;  %v1668_v26 = vunpack.i.l.bf16 %v1667_v23  ;;  %v1679_v27 = vunpack.i.h.bf16 %v1677_v22  ;;  %v1678_v28 = vunpack.i.l.bf16 %v1677_v22 }
 0xa43   :  { %v1075_v29 = vsel %vm96_vm3, %v1070_v6, %v1668_v26  ;;  %v1076_v30 = vsel %vm96_vm3, %v1668_v26, %v1669_v25  ;;  %v1095_v36 = vsel %vm344_vm14, %v1090_v21, %v1678_v28  ;;  %v1096_v37 = vsel %vm344_vm14, %v1678_v28, %v1679_v27  ;;  %v1221_v21 = vld [vmem:[#allocation2] sm:$0x1] }
 0xa44   :  { %v1506_v31 = vpack.c.bf16 %v1075_v29, %v1058_v1  ;;  %v1687_v24 = vpop.permute.xlu1 %1686  ;;  %v1672_v32 = vpop.permute.xlu0 %1671  ;;  %v1504_v33 = vpack.c.bf16 %v1076_v30, %v1061_v12 }
 0xa45   :  { %v1674_v34 = vunpack.i.h.bf16 %v1672_v32  ;;  %v1673_v35 = vunpack.i.l.bf16 %v1672_v32  ;;  %v1689_v38 = vunpack.i.h.bf16 %v1687_v24  ;;  %v1688_v39 = vunpack.i.l.bf16 %v1687_v24 }
 0xa46   :  { %1505 = vmatprep.subr.bf16.mxu1 %v1504_v33 }
 0xa47   :  { %v1085_v40 = vsel %vm107_vm7, %v1080_v5, %v1673_v35  ;;  %1508 = vmatpush1.bf16.msk.msra.mxu1 %vm2007_vm0, %v1506_v31  ;;  %v1086_v41 = vsel %vm107_vm7, %v1673_v35, %v1674_v34  ;;  %v1116_v52 = vsel %vm623_vm4, %v1688_v39, %v1689_v38 }
 0xa48   :  { %v1511_v42 = vpack.c.bf16 %v1095_v36, %v1085_v40  ;;  %v1110_v43 = vpop.permute.xlu1 %1109  ;;  %v1682_v44 = vpop.permute.xlu0 %1681  ;;  %v1509_v46 = vpack.c.bf16 %v1096_v37, %v1086_v41 }
 0xa49   :  { %v1684_v47 = vunpack.i.h.bf16 %v1682_v44  ;;  %v1683_v48 = vunpack.i.l.bf16 %v1682_v44  ;;  %v1115_v49 = vsel %vm623_vm4, %v1110_v43, %v1688_v39 }
 0xa4a   :  { %1510 = vmatprep.subr.bf16.mxu1 %v1509_v46 }
 0xa4b   :  { %v1105_v50 = vsel %vm612_vm9, %v1100_v20, %v1683_v48  ;;  %1512 = vmatpush1.bf16.msra.mxu1 %v1511_v42  ;;  %v1106_v51 = vsel %vm612_vm9, %v1683_v48, %v1684_v47 }
 0xa4c   :  { %v1515_v53 = vpack.c.bf16 %v1115_v49, %v1105_v50  ;;  %v1124_v54 = vpop.permute.xlu1 %1123  ;;  %v1122_v55 = vpop.permute.xlu0 %1121  ;;  %v1513_v56 = vpack.c.bf16 %v1116_v52, %v1106_v51 }
 0xa4d   :  { %v1126_v57 = vsel %vm355_vm1, %v1122_v55, %v1124_v54 }
 0xa4e   :  { %1514 = vmatprep.subr.bf16.mxu1 %v1513_v56 }
 0xa4f   :  { %1516 = vmatpush1.bf16.msra.mxu1 %v1515_v53 }
 0xa50   :  { %v1120_v58 = vpop.permute.xlu0 %1119  ;;  %1149 = vmatprep.subr.mxu1 %v1126_v57 }
 0xa51   :  { %v1125_v59 = vsel %vm355_vm1, %v1120_v58, %v1122_v55 }
 0xa53   :  { %1150 = vmatpush1.msra.mxu1 %v1125_v59 }
 0xa54   :  { %1441 = vmatmul.mubr.msk.f32.vlgmr.msra.gmra.mrb[4].mxu1 %vm643_vm10, %v1053_v60 }
 0xa5d   :  { %v484_v61 = vpop.permute.xlu1 %483 }
 0xa5e   :  { %v1530_v62 = vadd.f32 %v484_v61, %v1943_v4  ;;  %v1534_v63 = vadd.f32 %v484_v61, %v1946_v7 }
 0xa60   :  { %v1531_v0 = vadd.f32 %v1530_v62, %v2107_v8  ;;  %v1535_v3 = vadd.f32 %v1534_v63, %v2110_v9  ;;  %v1220_v63 = vld [vmem:[%s2250_s17] sm:$0x1]  ;;  %s1760_s17 = smov [#allocation3]  }
 0xa61   :  { %v1132_v10 = vpop.permute.xlu0 %1131 }
 0xa62   :  { %v1532_v11 = vadd.f32 %v1531_v0, %v1132_v10  ;;  %v1536_v13 = vadd.f32 %v1535_v3, %v1132_v10  ;;  %v1301_v0 = vlaneseq }
 0xa64   :  { %v1302_v3 = vshrl.u32 %v1301_v0, 7 }
 0xa66   :  { %v1303_v10 = vsub.s32 0, %v1302_v3 }
 0xb27   :  { %v1203_v14 = vpop.f32.mrb[4].mxu1 }
 0xb28   :  { %v1533_v1 = vadd.f32 %v1532_v11, %v1203_v14  ;;  %v1205_v2 = vpop.f32.mrb[5].mxu1 }
 0xb29   :  { %v1537_v15 = vadd.f32 %v1536_v13, %v1205_v2 }
 0xb2a   :  { %v1212_v12 = vmul.f32 0.5, %v1533_v1 }
 0xb2b   :  { %v1213_v16 = vmul.f32 0.5, %v1537_v15 }
 0xb2c   :  { %v1216_v17 = vmul.f32 0.01, %v1212_v12  ;;  %vm1214_vm12 = vcmp.gt.f32.partialorder %v1212_v12, 0.0 }
 0xb2d   :  { %v1217_v18 = vmul.f32 0.01, %v1213_v16  ;;  %vm1215_vm15 = vcmp.gt.f32.partialorder %v1213_v16, 0.0 }
 0xb2e   :  { %v1218_v4 = vsel %vm1214_vm12, %v1212_v12, %v1216_v17  ;;  %v1759_v12 = vmov 1966171168  }
 0xb2f   :  { %1224 = vrot.lane.b32.xlu1 %v1218_v4, %s1749_s1  ;;  %v1219_v7 = vsel %vm1215_vm15, %v1213_v16, %v1217_v18  ;;  %v1385_v16 = vunpack.c.l.s4 %v1759_v12 }
 0xb30   :  { %1226 = vrot.lane.b32.xlu0 %v1219_v7, %s1749_s1 }
 0xb31   :  { %v1386_v17 = vunpack.c.0.s8 %v1385_v16 }
 0xb33   :  { %v1389_v4 = vsub.s32 %v1386_v17, %v1302_v3 }
 0xba1   :  { %v1225_v8 = vpop.permute.xlu1 %1224 }
 0xba2   :  { %v1232_v9 = vsel %vm329_vm13, 0.0, %v1225_v8  ;;  %v1227_v19 = vpop.permute.xlu0 %1226 }
 0xba3   :  { %1246 = vrot.lane.b32.xlu1 %v1232_v9, %s1744_s23  ;;  %1236 = vrot.lane.b32.xlu0 %v1232_v9, %s1746_s24  ;;  %v1228_v5 = vsel %vm329_vm13, %v1225_v8, %v1227_v19  ;;  %v1233_v6 = vsel %vm329_vm13, %v1227_v19, 0.0 }
 0xba4   :  { %v1700_v20 = vpack.i.bf16 %v1233_v6, %v1228_v5 }
 0xba7   :  { %1266 = vrot.lane.b32.xlu1 %v1232_v9, %s1753_s3  ;;  %1256 = vrot.lane.b32.xlu0 %v1232_v9, %s1750_s22 }
 0xbab   :  { %1701 = vrot.lane.b32.xlu0 %v1700_v20, %s1750_s22  ;;  %1691 = vrot.lane.b32.xlu1 %v1700_v20, %s1746_s24  ;;  %s1410_s24 = sshll.u32 %s1760_s17, 4  ;;  %s1411_s24 = int_to_ptr.vmem [resolvable:$true] %s1410_s24 }
 0xbac   :  { %s1719_s1 = scalar_lea.vmem %s1411_s24, 32  ;;  %p1724_p1 = scmp.lt.s32.totalorder %s1411_s24, %s1411_s24 }
 0xbad   :  { %p1720_p0 = scmp.ne.s32.totalorder %s1411_s24, %s1719_s1  ;;  %p1725_p2 = scmp.lt.s32.totalorder %s1719_s1, %s1719_s1 }
 0xbaf   :  { %1711 = vrot.lane.b32.xlu0 %v1700_v20, %s1752_s25  ;;  %1696 = vrot.lane.b32.xlu1 %v1700_v20, %s1744_s23  ;;  %p1726_p3 = por %p1725_p2, %p1724_p1 }
 0xbb1   :  { %p1727_p4 = pnand %p1726_p3, %p1720_p0 }
 0xbb3   :  { %1276 = vrot.lane.b32.xlu0 %v1232_v9, %s1752_s25  ;;  %1706 = vrot.lane.b32.xlu1 %v1700_v20, %s1753_s3 }
 0xbb7   :  { %1290 = vrot.lane.b32.xlu0 %v1233_v6, %s1751_s2  ;;  %1288 = vrot.lane.b32.xlu1 %v1228_v5, %s1751_s2 }
 0xbbb   :  { %1298 = vperm.xlu0 %1604, %v1221_v21   ;;  %1286 = vrot.lane.b32.xlu1 %v1232_v9, %s1751_s2 }
 0xc15   :  { %v1247_v22 = vpop.permute.xlu1 %1246  ;;  %v1237_v23 = vpop.permute.xlu0 %1236 }
 0xc19   :  { %v1267_v25 = vpop.permute.xlu1 %1266  ;;  %v1257_v26 = vpop.permute.xlu0 %1256 }
 0xc1d   :  { %v1692_v27 = vpop.permute.xlu1 %1691  ;;  %v1702_v28 = vpop.permute.xlu0 %1701 }
 0xc1e   :  { %v1694_v29 = vunpack.i.h.bf16 %v1692_v27  ;;  %v1693_v30 = vunpack.i.l.bf16 %v1692_v27  ;;  %v1704_v31 = vunpack.i.h.bf16 %v1702_v28  ;;  %v1703_v24 = vunpack.i.l.bf16 %v1702_v28 }
 0xc20   :  { %v1242_v32 = vsel %vm96_vm3, %v1237_v23, %v1693_v30  ;;  %v1243_v33 = vsel %vm96_vm3, %v1693_v30, %v1694_v29  ;;  %v1262_v40 = vsel %vm344_vm14, %v1257_v26, %v1703_v24  ;;  %v1263_v41 = vsel %vm344_vm14, %v1703_v24, %v1704_v31 }
 0xc21   :  { %v1519_v34 = vpack.c.bf16 %v1242_v32, %v1225_v8  ;;  %v1697_v35 = vpop.permute.xlu1 %1696  ;;  %v1712_v36 = vpop.permute.xlu0 %1711  ;;  %v1517_v37 = vpack.c.bf16 %v1243_v33, %v1228_v5  ;;  %vm1401_vm3 = vcmp.lt.s32.totalorder %v1301_v0, 256 }
 0xc22   :  { %v1699_v38 = vunpack.i.h.bf16 %v1697_v35  ;;  %v1698_v39 = vunpack.i.l.bf16 %v1697_v35  ;;  %v1714_v43 = vunpack.i.h.bf16 %v1712_v36  ;;  %v1713_v44 = vunpack.i.l.bf16 %v1712_v36 }
 0xc23   :  { %1518 = vmatprep.subr.bf16.mxu0 %v1517_v37 }
 0xc24   :  { %v1252_v42 = vsel %vm107_vm7, %v1247_v22, %v1698_v39  ;;  %1521 = vmatpush1.bf16.msk.msra.mxu0 %vm2007_vm0, %v1519_v34  ;;  %v1253_v46 = vsel %vm107_vm7, %v1698_v39, %v1699_v38  ;;  %v1283_v56 = vsel %vm623_vm4, %v1713_v44, %v1714_v43 }
 0xc25   :  { %v1524_v47 = vpack.c.bf16 %v1262_v40, %v1252_v42  ;;  %v1707_v48 = vpop.permute.xlu1 %1706  ;;  %v1277_v49 = vpop.permute.xlu0 %1276  ;;  %v1522_v50 = vpack.c.bf16 %v1263_v41, %v1253_v46 }
 0xc26   :  { %v1709_v51 = vunpack.i.h.bf16 %v1707_v48  ;;  %v1708_v52 = vunpack.i.l.bf16 %v1707_v48  ;;  %v1282_v54 = vsel %vm623_vm4, %v1277_v49, %v1713_v44 }
 0xc27   :  { %1523 = vmatprep.subr.bf16.mxu0 %v1522_v50 }
 0xc28   :  { %v1272_v53 = vsel %vm612_vm9, %v1267_v25, %v1708_v52  ;;  %1525 = vmatpush1.bf16.msra.mxu0 %v1524_v47  ;;  %v1273_v55 = vsel %vm612_vm9, %v1708_v52, %v1709_v51 }
 0xc29   :  { %v1528_v45 = vpack.c.bf16 %v1282_v54, %v1272_v53  ;;  %v1289_v57 = vpop.permute.xlu1 %1288  ;;  %v1291_v58 = vpop.permute.xlu0 %1290  ;;  %v1526_v59 = vpack.c.bf16 %v1283_v56, %v1273_v55 }
 0xc2a   :  { %v1293_v60 = vsel %vm355_vm1, %v1289_v57, %v1291_v58 }
 0xc2b   :  { %1527 = vmatprep.subr.bf16.mxu0 %v1526_v59 }
 0xc2c   :  { %1529 = vmatpush1.bf16.msra.mxu0 %v1528_v45 }
 0xc2d   :  { %v1287_v61 = vpop.permute.xlu1 %1286  ;;  %1320 = vmatprep.subr.mxu0 %v1293_v60 }
 0xc2e   :  { %v1292_v62 = vsel %vm355_vm1, %v1287_v61, %v1289_v57 }
 0xc30   :  { %1321 = vmatpush1.msra.mxu0 %v1292_v62 }
 0xc31   :  { %1444 = vmatmul.mubr.msk.f32.vlgmr.msra.gmra.mrb[6].mxu0 %vm643_vm10, %v1220_v63 }
 0xc3a   :  { %v1299_v11 = vpop.permute.xlu0 %1298 }
 0xc3b   :  { %v1304_v13 = vrot.slane %v1299_v11, %v1303_v10 }
 0xd04   :  { %v1374_v14 = vpop.f32.mrb[6].mxu0 }
 0xd05   :  { %v1375_v1 = vadd.f32 %v1374_v14, %v1304_v13  ;;  %v1376_v2 = vpop.f32.mrb[7].mxu0 }
 0xd06   :  { %v1377_v15 = vadd.f32 %v1376_v2, %v1304_v13 }
 0xd07   :  { %1715 = vtanh.f32 %v1375_v1 }
 0xd08   :  { %1717 = vtanh.f32 %v1377_v15 }
 0xd11   :  { %v1716_v18 = vpop.eup %1715 }
 0xd12   :  { %v1718_v7 = vpop.eup %1717 }
 0xd13   :  { %v1383_v8 = vcombine.low %v1716_v18, %v1718_v7 }
 0xd15   :  { %v1390_v9 = vrot.slane %v1383_v8, %v1389_v4 }
 0xd17   :  { %v1397_v19 = vrot.slane %v1390_v9, %v1389_v4 }
 0xd19   :  { %1403 = vst.msk [vmem:[#allocation3] sm:$0x3] %vm1401_vm3, %v1397_v19 }
 0xd1a   :  { %1730 = shalt.err (!%p1727_p4)
}
 0xd1b   :  { %s1731_s25 = scalar_lea.hbm %s2252_s19, 32 }
 0xd1c   :  { %p1732_p5 = scmp.ne.s32.totalorder %s2252_s19, %s1731_s25  ;;  %p1735_p6 = scmp.lt.u32.totalorder %s1731_s25, %s2252_s19 }
 0xd1e   :  { %p1737_p7 = pnand %p1735_p6, %p1732_p5 }
 0xd20   :  { %1740 = shalt.err (!%p1737_p7)
}
 0xd21   :  { %1413 = dma.vmem_to_hbm [thread:$0]  %s1411_s24, 32, %s2252_s19, [#allocation4]  }
 0xd22   :  { %1741 = dma.done.wait [#allocation4], 32  }
 0xd23   :  { %1742 = vsyncadd [#allocation4], 4294967264 }
 0xd24   :  { %1417 = vsyncpa [#allocation4], 1 }

</bundles_post_ra>
